<compile_context>
chip_gen: v6e
topology: v6e:2x2x1
jax: 0.10.0
libtpu: 0.0.40
codegen_flags: <defaults>
</compile_context>

<pallas_src>
import functools
import math

import numpy as np
import jax
import jax.numpy as jnp
from jax.experimental import pallas as pl
from jax.experimental.pallas import tpu as pltpu


def _adapter_kernel(x_ref, mask_ref, w1_ref, b1_ref, wf_ref, b2p_ref, out_ref,
                    *, L, W, kt, kh, kw, n_taps):
    """One grid step: `batch_tile` batch elements, R = batch_tile*T*L token rows."""
    xs = x_ref[0]                                   # (R, C) native dtype
    R = xs.shape[0]
    Cap = w1_ref.shape[1]                           # adapter channels padded to 128

    # ---- fc1 on the MXU (bf16 operands, f32 accumulation) ----------------------
    h = jnp.dot(xs.astype(jnp.bfloat16), w1_ref[...],
                preferred_element_type=jnp.float32) + b1_ref[...]        # (R, Cap) f32

    # ---- pad rows once so every conv tap is a static in-bounds row shift -------
    pt, ph, pw = kt // 2, kh // 2, kw // 2
    P = pt * L + ph * W + pw                        # max |linear row shift|
    if P > 0:
        zpad = jnp.zeros((P, Cap), jnp.float32)
        h_pad = jnp.concatenate([zpad, h, zpad], axis=0)                 # (R+2P, Cap)
    else:
        h_pad = h

    mask = mask_ref[...]                            # (R, n_taps+1) f32 {0,1}

    # ---- gather the masked, shifted tap copies into one lane-aligned wide slab --
    pieces = []
    tap = 0
    for ot in range(-pt, pt + 1):                   # statically unrolled taps
        for oh in range(-ph, ph + 1):
            for ow in range(-pw, pw + 1):
                s = ot * L + oh * W + ow
                shifted = h_pad[P + s:P + s + R, :]                      # (R, Cap)
                pieces.append(
                    (shifted * mask[:, tap:tap + 1]).astype(jnp.bfloat16))
                tap += 1
    S = jnp.concatenate(pieces, axis=1)             # (R, n_taps*Cap) bf16, 128-aligned

    # ---- depthwise conv + fc2 fused as ONE deep-K MXU matmul -------------------
    delta = jnp.dot(S, wf_ref[...],
                    preferred_element_type=jnp.float32) + b2p_ref[...]   # (R, C) f32

    # ---- fused residual: spatial tokens get the adapter delta, cls passes through
    spatial = mask[:, n_taps:n_taps + 1]            # (R, 1) spatial-row mask
    out_ref[0] = (xs.astype(jnp.float32) + delta * spatial).astype(out_ref.dtype)


@functools.lru_cache(maxsize=None)
def _build_mask(batch_tile, T, L, H, W, kt, kh, kw):
    """{0,1} masks per output row: one column per conv tap + one spatial-row column."""
    R = batch_tile * T * L
    r = np.arange(R)
    q = r % L                       # 0 == cls token, 1..H*W == spatial tokens
    t = (r // L) % T                # frame index within its batch element
    p = q - 1
    i = p // W
    j = p % W
    spatial = (q > 0)
    pt, ph, pw = kt // 2, kh // 2, kw // 2
    cols = []
    for ot in range(-pt, pt + 1):
        for oh in range(-ph, ph + 1):
            for ow in range(-pw, pw + 1):
                valid = (spatial
                         & (t + ot >= 0) & (t + ot < T)
                         & (i + oh >= 0) & (i + oh < H)
                         & (j + ow >= 0) & (j + ow < W))
                cols.append(valid)
    cols.append(spatial)            # last column: residual mask (cls rows untouched)
    return np.stack(cols, axis=1).astype(np.float32)           # (R, n_taps + 1)


def _pick_batch_tile(B, T, L, C, Cap, n_taps, x_itemsize):
    """Largest divisor of B fitting a conservative VMEM budget, with grid >= 2."""
    rows = T * L
    per_be = rows * (4 * C * x_itemsize            # in + out tiles, double-buffered
                     + 2 * (n_taps + 1) * 4        # merged mask, double-buffered
                     + 2 * Cap * 4                 # h + h_pad (f32)
                     + n_taps * Cap * 2            # wide tap slab (bf16)
                     + C * 4)                      # delta (f32)
    budget = 24 * 1024 * 1024                      # safe for v5e/v6e/v7x scoped VMEM
    cap = max(1, budget // max(per_be, 1))
    if B >= 2:
        cap = min(cap, B // 2)                     # keep grid >= 2 for v7x's two TCs
    bt = 1
    for d in range(1, B + 1):
        if B % d == 0 and d <= cap:
            bt = d
    return bt


@functools.partial(jax.jit, static_argnames=("T", "batch_tile"))
def _adapter_forward_impl(x, fc1_w, fc1_b, conv_w, conv_b, fc2_w, fc2_b,
                          *, T, batch_tile):
    BT, L, C = x.shape
    B = BT // T
    Ca = conv_w.shape[0]
    kt, kh, kw = (int(d) for d in conv_w.shape[2:])
    H = W = round(math.sqrt(L - 1))
    n_taps = kt * kh * kw
    Cap = ((Ca + 127) // 128) * 128                # lane-dense adapter width
    G = B // batch_tile
    RB = batch_tile * T * L

    f32 = jnp.float32
    # ---- parameter prep (compiled once per shape thanks to jit cache) ----------
    w1_t = jnp.zeros((C, Cap), f32).at[:, :Ca].set(jnp.transpose(fc1_w).astype(f32))
    w1_t = w1_t.astype(jnp.bfloat16)                                    # (C, Cap)
    b1 = jnp.zeros((1, Cap), f32).at[:, :Ca].set(fc1_b.astype(f32).reshape(1, Ca))
    wconv_t = jnp.transpose(conv_w.reshape(Ca, n_taps)).astype(f32)     # (n_taps, Ca)
    w2_t = jnp.transpose(fc2_w).astype(f32)                             # (Ca, C)
    # fused depthwise-conv x fc2 weight: Wf[tap*Cap + c, :] = conv_w[tap,c] * fc2_w.T[c,:]
    wf = jnp.zeros((n_taps, Cap, C), f32).at[:, :Ca, :].set(
        wconv_t[:, :, None] * w2_t[None, :, :])
    wf = wf.reshape(n_taps * Cap, C).astype(jnp.bfloat16)               # (n_taps*Cap, C)
    # fused bias: fc2(conv bias) folded in
    b2p = (fc2_b.astype(f32) + conv_b.astype(f32) @ w2_t).reshape(1, C)

    mask = jnp.asarray(_build_mask(batch_tile, T, L, H, W, kt, kh, kw))  # (RB, n_taps+1)

    xg = x.reshape(G, RB, C)                       # metadata-only regroup, native dtype

    # ---- explicit VMEM limit (review: v5e 16 MiB default / v7x 64 MiB physical) -
    est = (RB * (4 * C * x.dtype.itemsize + 2 * (n_taps + 1) * 4
                 + 2 * Cap * 4 + n_taps * Cap * 2 + C * 4)
           + 2 * (w1_t.size * 2 + wf.size * 2) + 4 * (b1.size + b2p.size))
    vmem_limit = int(min(64 * 1024 * 1024, max(32 * 1024 * 1024, 2 * int(est))))

    kernel = functools.partial(_adapter_kernel, L=L, W=W, kt=kt, kh=kh, kw=kw,
                               n_taps=n_taps)
    out = pl.pallas_call(
        kernel,
        out_shape=jax.ShapeDtypeStruct((G, RB, C), x.dtype),
        grid=(G,),
        in_specs=[
            pl.BlockSpec((1, RB, C), lambda g: (g, 0, 0)),        # token tile
            pl.BlockSpec((RB, n_taps + 1), lambda g: (0, 0)),     # tap + spatial masks
            pl.BlockSpec((C, Cap), lambda g: (0, 0)),             # fc1.weight^T (bf16)
            pl.BlockSpec((1, Cap), lambda g: (0, 0)),             # fc1.bias
            pl.BlockSpec((n_taps * Cap, C), lambda g: (0, 0)),    # fused conv+fc2 weight
            pl.BlockSpec((1, C), lambda g: (0, 0)),               # fused bias
        ],
        out_specs=pl.BlockSpec((1, RB, C), lambda g: (g, 0, 0)),
        compiler_params=pltpu.CompilerParams(
            dimension_semantics=("parallel",),
            vmem_limit_bytes=vmem_limit),
    )(xg, mask, w1_t, b1, wf, b2p)
    return out.reshape(BT, L, C)


def adapter_forward(x, T, fc1_w, fc1_b, conv_w, conv_b, fc2_w, fc2_b, *, batch_tile=None):
    """x: (BT, L, C) like the PyTorch module.  Returns (BT, L, C) in x.dtype."""
    BT, L, C = x.shape
    assert BT % T == 0
    B = BT // T
    Ca = conv_w.shape[0]
    kt, kh, kw = (int(d) for d in conv_w.shape[2:])
    H = W = round(math.sqrt(L - 1))
    assert L - 1 == H * W
    assert kt % 2 == 1 and kh % 2 == 1 and kw % 2 == 1, "module requires odd kernel sizes"
    n_taps = kt * kh * kw
    Cap = ((Ca + 127) // 128) * 128
    if batch_tile is None:
        batch_tile = _pick_batch_tile(B, T, L, C, Cap, n_taps, x.dtype.itemsize)
    assert B % batch_tile == 0
    return _adapter_forward_impl(x, fc1_w, fc1_b, conv_w, conv_b, fc2_w, fc2_b,
                                 T=T, batch_tile=batch_tile)


def _reference(x, T, fc1_w, fc1_b, conv_w, conv_b, fc2_w, fc2_b):
    """Plain-JAX f32 replica of the PyTorch forward (independent check)."""
    BT, L, C = x.shape
    B = BT // T
    Ca, _, kt, kh, kw = conv_w.shape
    H = W = round(math.sqrt(L - 1))
    xs = x[:, 1:, :]
    h = xs @ fc1_w.T + fc1_b                                        # (BT, HW, Ca)
    h = h.reshape(B, T, H, W, Ca).transpose(0, 4, 1, 2, 3)          # (B, Ca, T, H, W)
    y = jax.lax.conv_general_dilated(
        h, conv_w, window_strides=(1, 1, 1),
        padding=((kt // 2, kt // 2), (kh // 2, kh // 2), (kw // 2, kw // 2)),
        dimension_numbers=("NCDHW", "OIDHW", "NCDHW"),
        feature_group_count=Ca)
    y = y + conv_b.reshape(1, Ca, 1, 1, 1)
    y = y.transpose(0, 2, 3, 4, 1).reshape(BT, H * W, Ca)
    y = y @ fc2_w.T + fc2_b                                         # (BT, HW, C)
    return x.at[:, 1:, :].add(y)


if __name__ == "__main__":
    # Small, module-consistent shapes: in_channels=128 (lane-dense output),
    # adapter_channels=8, kernel_size=(3,3,3), T=4 frames, 4x4 spatial (L=17), B=2.
    B, T = 2, 4
    H = W = 4
    L = H * W + 1
    C, Ca = 128, 8
    ks = (3, 3, 3)
    BT = B * T

    key = jax.random.PRNGKey(0)
    k = jax.random.split(key, 7)
    x = jax.random.normal(k[0], (BT, L, C), jnp.float32)

    # PyTorch parameter shapes. (The module zero-inits conv & biases; we use
    # non-zero values so the correctness check is not vacuous.)
    fc1_w = jax.random.normal(k[1], (Ca, C), jnp.float32) / math.sqrt(C)
    fc1_b = 0.1 * jax.random.normal(k[2], (Ca,), jnp.float32)
    conv_w = jax.random.normal(k[3], (Ca, 1) + ks, jnp.float32) / math.sqrt(ks[0] * ks[1] * ks[2])
    conv_b = 0.1 * jax.random.normal(k[4], (Ca,), jnp.float32)
    fc2_w = jax.random.normal(k[5], (C, Ca), jnp.float32) / math.sqrt(Ca)
    fc2_b = 0.1 * jax.random.normal(k[6], (C,), jnp.float32)

    ref = _reference(x, T, fc1_w, fc1_b, conv_w, conv_b, fc2_w, fc2_b)

    # bt=None -> auto (batch_tile=1, grid of 2 parallel steps: v7x dual-TC friendly);
    # bt=2    -> whole batch fused in a single grid step.
    for bt in (None, 2):
        out = adapter_forward(x, T, fc1_w, fc1_b, conv_w, conv_b, fc2_w, fc2_b,
                              batch_tile=bt)
        out = jax.block_until_ready(out)
        assert out.shape == (BT, L, C), out.shape
        err = float(jnp.max(jnp.abs(out - ref)))
        # bf16 MXU operands with f32 accumulation -> loosened tolerance vs f32 reference
        assert jnp.allclose(out, ref, atol=5e-2, rtol=5e-2), (bt, err)
        # cls tokens must pass through bit-exact
        assert jnp.array_equal(out[:, 0, :], x[:, 0, :]), "cls token modified"

    print("KERNEL_OK")
</pallas_src>

<mosaic_0001>
module attributes {stable_mosaic.version = 11 : i64} {
  func.func @_adapter_kernel(%arg0: i32, %arg1: memref<1x68x128xf32, #tpu.memory_space<vmem>>, %arg2: memref<68x28xf32, #tpu.memory_space<vmem>>, %arg3: memref<128x128xbf16, #tpu.memory_space<vmem>>, %arg4: memref<1x128xf32, #tpu.memory_space<vmem>>, %arg5: memref<3456x128xbf16, #tpu.memory_space<vmem>>, %arg6: memref<1x128xf32, #tpu.memory_space<vmem>>, %arg7: memref<1x68x128xf32, #tpu.memory_space<vmem>>) attributes {dimension_semantics = [#tpu.dimension_semantics<parallel>], iteration_bounds = array<i64: 2>, scalar_prefetch = 0 : i64, scratch_operands = 0 : i64, tpu.core_type = #tpu.core_type<tc>, window_params = [{transform_indices = @transform_0, window_bounds = array<i64: 1, 68, 128>}, {pipeline_mode = #tpu.pipeline_mode<synchronous>, transform_indices = @transform_1, window_bounds = array<i64: 68, 28>}, {pipeline_mode = #tpu.pipeline_mode<synchronous>, transform_indices = @transform_2, window_bounds = array<i64: 128, 128>}, {pipeline_mode = #tpu.pipeline_mode<synchronous>, transform_indices = @transform_3, window_bounds = array<i64: 1, 128>}, {pipeline_mode = #tpu.pipeline_mode<synchronous>, transform_indices = @transform_4, window_bounds = array<i64: 3456, 128>}, {pipeline_mode = #tpu.pipeline_mode<synchronous>, transform_indices = @transform_5, window_bounds = array<i64: 1, 128>}, {transform_indices = @transform_6, window_bounds = array<i64: 1, 68, 128>}]} {
    %c0 = arith.constant 0 : index
    %c0_0 = arith.constant 0 : index
    %c0_1 = arith.constant 0 : index
    %0 = vector.load %arg1[%c0, %c0_0, %c0_1] : memref<1x68x128xf32, #tpu.memory_space<vmem>>, vector<1x68x128xf32>
    %1 = vector.shape_cast %0 : vector<1x68x128xf32> to vector<68x128xf32>
    %2 = arith.truncf %1 : vector<68x128xf32> to vector<68x128xbf16>
    %c0_2 = arith.constant 0 : index
    %c0_3 = arith.constant 0 : index
    %3 = vector.load %arg3[%c0_2, %c0_3] : memref<128x128xbf16, #tpu.memory_space<vmem>>, vector<128x128xbf16>
    %cst = arith.constant dense<0.000000e+00> : vector<68x128xf32>
    %4 = tpu.matmul %2, %3, %cst {dimension_numbers = #tpu.dot_dimension_numbers<[1], [0], [0], [1], [0, 0, 1, 1], [], []>} : vector<68x128xbf16>, vector<128x128xbf16>, vector<68x128xf32> -> vector<68x128xf32>
    %c0_4 = arith.constant 0 : index
    %c0_5 = arith.constant 0 : index
    %5 = vector.load %arg4[%c0_4, %c0_5] : memref<1x128xf32, #tpu.memory_space<vmem>>, vector<1x128xf32>
    %6 = vector.broadcast %5 : vector<1x128xf32> to vector<68x128xf32>
    %7 = arith.addf %4, %6 : vector<68x128xf32>
    %cst_6 = arith.constant 0.000000e+00 : f32
    %8 = vector.broadcast %cst_6 : f32 to vector<22x128xf32>
    %9 = tpu.concatenate %8, %7, %8 in 0 : vector<22x128xf32>, vector<68x128xf32>, vector<22x128xf32> -> vector<112x128xf32>
    %c0_7 = arith.constant 0 : index
    %c0_8 = arith.constant 0 : index
    %10 = vector.load %arg2[%c0_7, %c0_8] : memref<68x28xf32, #tpu.memory_space<vmem>>, vector<68x28xf32>
    %11 = vector.extract_strided_slice %9 {offsets = [0, 0], sizes = [68, 128], strides = [1, 1]} : vector<112x128xf32> to vector<68x128xf32>
    %12 = vector.extract_strided_slice %10 {offsets = [0, 0], sizes = [68, 1], strides = [1, 1]} : vector<68x28xf32> to vector<68x1xf32>
    %13 = vector.broadcast %12 : vector<68x1xf32> to vector<68x128xf32>
    %14 = arith.mulf %11, %13 : vector<68x128xf32>
    %15 = arith.truncf %14 : vector<68x128xf32> to vector<68x128xbf16>
    %16 = vector.extract_strided_slice %9 {offsets = [1, 0], sizes = [68, 128], strides = [1, 1]} : vector<112x128xf32> to vector<68x128xf32>
    %17 = vector.extract_strided_slice %10 {offsets = [0, 1], sizes = [68, 1], strides = [1, 1]} : vector<68x28xf32> to vector<68x1xf32>
    %18 = vector.broadcast %17 : vector<68x1xf32> to vector<68x128xf32>
    %19 = arith.mulf %16, %18 : vector<68x128xf32>
    %20 = arith.truncf %19 : vector<68x128xf32> to vector<68x128xbf16>
    %21 = vector.extract_strided_slice %9 {offsets = [2, 0], sizes = [68, 128], strides = [1, 1]} : vector<112x128xf32> to vector<68x128xf32>
    %22 = vector.extract_strided_slice %10 {offsets = [0, 2], sizes = [68, 1], strides = [1, 1]} : vector<68x28xf32> to vector<68x1xf32>
    %23 = vector.broadcast %22 : vector<68x1xf32> to vector<68x128xf32>
    %24 = arith.mulf %21, %23 : vector<68x128xf32>
    %25 = arith.truncf %24 : vector<68x128xf32> to vector<68x128xbf16>
    %26 = vector.extract_strided_slice %9 {offsets = [4, 0], sizes = [68, 128], strides = [1, 1]} : vector<112x128xf32> to vector<68x128xf32>
    %27 = vector.extract_strided_slice %10 {offsets = [0, 3], sizes = [68, 1], strides = [1, 1]} : vector<68x28xf32> to vector<68x1xf32>
    %28 = vector.broadcast %27 : vector<68x1xf32> to vector<68x128xf32>
    %29 = arith.mulf %26, %28 : vector<68x128xf32>
    %30 = arith.truncf %29 : vector<68x128xf32> to vector<68x128xbf16>
    %31 = vector.extract_strided_slice %9 {offsets = [5, 0], sizes = [68, 128], strides = [1, 1]} : vector<112x128xf32> to vector<68x128xf32>
    %32 = vector.extract_strided_slice %10 {offsets = [0, 4], sizes = [68, 1], strides = [1, 1]} : vector<68x28xf32> to vector<68x1xf32>
    %33 = vector.broadcast %32 : vector<68x1xf32> to vector<68x128xf32>
    %34 = arith.mulf %31, %33 : vector<68x128xf32>
    %35 = arith.truncf %34 : vector<68x128xf32> to vector<68x128xbf16>
    %36 = vector.extract_strided_slice %9 {offsets = [6, 0], sizes = [68, 128], strides = [1, 1]} : vector<112x128xf32> to vector<68x128xf32>
    %37 = vector.extract_strided_slice %10 {offsets = [0, 5], sizes = [68, 1], strides = [1, 1]} : vector<68x28xf32> to vector<68x1xf32>
    %38 = vector.broadcast %37 : vector<68x1xf32> to vector<68x128xf32>
    %39 = arith.mulf %36, %38 : vector<68x128xf32>
    %40 = arith.truncf %39 : vector<68x128xf32> to vector<68x128xbf16>
    %41 = vector.extract_strided_slice %9 {offsets = [8, 0], sizes = [68, 128], strides = [1, 1]} : vector<112x128xf32> to vector<68x128xf32>
    %42 = vector.extract_strided_slice %10 {offsets = [0, 6], sizes = [68, 1], strides = [1, 1]} : vector<68x28xf32> to vector<68x1xf32>
    %43 = vector.broadcast %42 : vector<68x1xf32> to vector<68x128xf32>
    %44 = arith.mulf %41, %43 : vector<68x128xf32>
    %45 = arith.truncf %44 : vector<68x128xf32> to vector<68x128xbf16>
    %46 = vector.extract_strided_slice %9 {offsets = [9, 0], sizes = [68, 128], strides = [1, 1]} : vector<112x128xf32> to vector<68x128xf32>
    %47 = vector.extract_strided_slice %10 {offsets = [0, 7], sizes = [68, 1], strides = [1, 1]} : vector<68x28xf32> to vector<68x1xf32>
    %48 = vector.broadcast %47 : vector<68x1xf32> to vector<68x128xf32>
    %49 = arith.mulf %46, %48 : vector<68x128xf32>
    %50 = arith.truncf %49 : vector<68x128xf32> to vector<68x128xbf16>
    %51 = vector.extract_strided_slice %9 {offsets = [10, 0], sizes = [68, 128], strides = [1, 1]} : vector<112x128xf32> to vector<68x128xf32>
    %52 = vector.extract_strided_slice %10 {offsets = [0, 8], sizes = [68, 1], strides = [1, 1]} : vector<68x28xf32> to vector<68x1xf32>
    %53 = vector.broadcast %52 : vector<68x1xf32> to vector<68x128xf32>
    %54 = arith.mulf %51, %53 : vector<68x128xf32>
    %55 = arith.truncf %54 : vector<68x128xf32> to vector<68x128xbf16>
    %56 = vector.extract_strided_slice %9 {offsets = [17, 0], sizes = [68, 128], strides = [1, 1]} : vector<112x128xf32> to vector<68x128xf32>
    %57 = vector.extract_strided_slice %10 {offsets = [0, 9], sizes = [68, 1], strides = [1, 1]} : vector<68x28xf32> to vector<68x1xf32>
    %58 = vector.broadcast %57 : vector<68x1xf32> to vector<68x128xf32>
    %59 = arith.mulf %56, %58 : vector<68x128xf32>
    %60 = arith.truncf %59 : vector<68x128xf32> to vector<68x128xbf16>
    %61 = vector.extract_strided_slice %9 {offsets = [18, 0], sizes = [68, 128], strides = [1, 1]} : vector<112x128xf32> to vector<68x128xf32>
    %62 = vector.extract_strided_slice %10 {offsets = [0, 10], sizes = [68, 1], strides = [1, 1]} : vector<68x28xf32> to vector<68x1xf32>
    %63 = vector.broadcast %62 : vector<68x1xf32> to vector<68x128xf32>
    %64 = arith.mulf %61, %63 : vector<68x128xf32>
    %65 = arith.truncf %64 : vector<68x128xf32> to vector<68x128xbf16>
    %66 = vector.extract_strided_slice %9 {offsets = [19, 0], sizes = [68, 128], strides = [1, 1]} : vector<112x128xf32> to vector<68x128xf32>
    %67 = vector.extract_strided_slice %10 {offsets = [0, 11], sizes = [68, 1], strides = [1, 1]} : vector<68x28xf32> to vector<68x1xf32>
    %68 = vector.broadcast %67 : vector<68x1xf32> to vector<68x128xf32>
    %69 = arith.mulf %66, %68 : vector<68x128xf32>
    %70 = arith.truncf %69 : vector<68x128xf32> to vector<68x128xbf16>
    %71 = vector.extract_strided_slice %9 {offsets = [21, 0], sizes = [68, 128], strides = [1, 1]} : vector<112x128xf32> to vector<68x128xf32>
    %72 = vector.extract_strided_slice %10 {offsets = [0, 12], sizes = [68, 1], strides = [1, 1]} : vector<68x28xf32> to vector<68x1xf32>
    %73 = vector.broadcast %72 : vector<68x1xf32> to vector<68x128xf32>
    %74 = arith.mulf %71, %73 : vector<68x128xf32>
    %75 = arith.truncf %74 : vector<68x128xf32> to vector<68x128xbf16>
    %76 = vector.extract_strided_slice %9 {offsets = [22, 0], sizes = [68, 128], strides = [1, 1]} : vector<112x128xf32> to vector<68x128xf32>
    %77 = vector.extract_strided_slice %10 {offsets = [0, 13], sizes = [68, 1], strides = [1, 1]} : vector<68x28xf32> to vector<68x1xf32>
    %78 = vector.broadcast %77 : vector<68x1xf32> to vector<68x128xf32>
    %79 = arith.mulf %76, %78 : vector<68x128xf32>
    %80 = arith.truncf %79 : vector<68x128xf32> to vector<68x128xbf16>
    %81 = vector.extract_strided_slice %9 {offsets = [23, 0], sizes = [68, 128], strides = [1, 1]} : vector<112x128xf32> to vector<68x128xf32>
    %82 = vector.extract_strided_slice %10 {offsets = [0, 14], sizes = [68, 1], strides = [1, 1]} : vector<68x28xf32> to vector<68x1xf32>
    %83 = vector.broadcast %82 : vector<68x1xf32> to vector<68x128xf32>
    %84 = arith.mulf %81, %83 : vector<68x128xf32>
    %85 = arith.truncf %84 : vector<68x128xf32> to vector<68x128xbf16>
    %86 = vector.extract_strided_slice %9 {offsets = [25, 0], sizes = [68, 128], strides = [1, 1]} : vector<112x128xf32> to vector<68x128xf32>
    %87 = vector.extract_strided_slice %10 {offsets = [0, 15], sizes = [68, 1], strides = [1, 1]} : vector<68x28xf32> to vector<68x1xf32>
    %88 = vector.broadcast %87 : vector<68x1xf32> to vector<68x128xf32>
    %89 = arith.mulf %86, %88 : vector<68x128xf32>
    %90 = arith.truncf %89 : vector<68x128xf32> to vector<68x128xbf16>
    %91 = vector.extract_strided_slice %9 {offsets = [26, 0], sizes = [68, 128], strides = [1, 1]} : vector<112x128xf32> to vector<68x128xf32>
    %92 = vector.extract_strided_slice %10 {offsets = [0, 16], sizes = [68, 1], strides = [1, 1]} : vector<68x28xf32> to vector<68x1xf32>
    %93 = vector.broadcast %92 : vector<68x1xf32> to vector<68x128xf32>
    %94 = arith.mulf %91, %93 : vector<68x128xf32>
    %95 = arith.truncf %94 : vector<68x128xf32> to vector<68x128xbf16>
    %96 = vector.extract_strided_slice %9 {offsets = [27, 0], sizes = [68, 128], strides = [1, 1]} : vector<112x128xf32> to vector<68x128xf32>
    %97 = vector.extract_strided_slice %10 {offsets = [0, 17], sizes = [68, 1], strides = [1, 1]} : vector<68x28xf32> to vector<68x1xf32>
    %98 = vector.broadcast %97 : vector<68x1xf32> to vector<68x128xf32>
    %99 = arith.mulf %96, %98 : vector<68x128xf32>
    %100 = arith.truncf %99 : vector<68x128xf32> to vector<68x128xbf16>
    %101 = vector.extract_strided_slice %9 {offsets = [34, 0], sizes = [68, 128], strides = [1, 1]} : vector<112x128xf32> to vector<68x128xf32>
    %102 = vector.extract_strided_slice %10 {offsets = [0, 18], sizes = [68, 1], strides = [1, 1]} : vector<68x28xf32> to vector<68x1xf32>
    %103 = vector.broadcast %102 : vector<68x1xf32> to vector<68x128xf32>
    %104 = arith.mulf %101, %103 : vector<68x128xf32>
    %105 = arith.truncf %104 : vector<68x128xf32> to vector<68x128xbf16>
    %106 = vector.extract_strided_slice %9 {offsets = [35, 0], sizes = [68, 128], strides = [1, 1]} : vector<112x128xf32> to vector<68x128xf32>
    %107 = vector.extract_strided_slice %10 {offsets = [0, 19], sizes = [68, 1], strides = [1, 1]} : vector<68x28xf32> to vector<68x1xf32>
    %108 = vector.broadcast %107 : vector<68x1xf32> to vector<68x128xf32>
    %109 = arith.mulf %106, %108 : vector<68x128xf32>
    %110 = arith.truncf %109 : vector<68x128xf32> to vector<68x128xbf16>
    %111 = vector.extract_strided_slice %9 {offsets = [36, 0], sizes = [68, 128], strides = [1, 1]} : vector<112x128xf32> to vector<68x128xf32>
    %112 = vector.extract_strided_slice %10 {offsets = [0, 20], sizes = [68, 1], strides = [1, 1]} : vector<68x28xf32> to vector<68x1xf32>
    %113 = vector.broadcast %112 : vector<68x1xf32> to vector<68x128xf32>
    %114 = arith.mulf %111, %113 : vector<68x128xf32>
    %115 = arith.truncf %114 : vector<68x128xf32> to vector<68x128xbf16>
    %116 = vector.extract_strided_slice %9 {offsets = [38, 0], sizes = [68, 128], strides = [1, 1]} : vector<112x128xf32> to vector<68x128xf32>
    %117 = vector.extract_strided_slice %10 {offsets = [0, 21], sizes = [68, 1], strides = [1, 1]} : vector<68x28xf32> to vector<68x1xf32>
    %118 = vector.broadcast %117 : vector<68x1xf32> to vector<68x128xf32>
    %119 = arith.mulf %116, %118 : vector<68x128xf32>
    %120 = arith.truncf %119 : vector<68x128xf32> to vector<68x128xbf16>
    %121 = vector.extract_strided_slice %9 {offsets = [39, 0], sizes = [68, 128], strides = [1, 1]} : vector<112x128xf32> to vector<68x128xf32>
    %122 = vector.extract_strided_slice %10 {offsets = [0, 22], sizes = [68, 1], strides = [1, 1]} : vector<68x28xf32> to vector<68x1xf32>
    %123 = vector.broadcast %122 : vector<68x1xf32> to vector<68x128xf32>
    %124 = arith.mulf %121, %123 : vector<68x128xf32>
    %125 = arith.truncf %124 : vector<68x128xf32> to vector<68x128xbf16>
    %126 = vector.extract_strided_slice %9 {offsets = [40, 0], sizes = [68, 128], strides = [1, 1]} : vector<112x128xf32> to vector<68x128xf32>
    %127 = vector.extract_strided_slice %10 {offsets = [0, 23], sizes = [68, 1], strides = [1, 1]} : vector<68x28xf32> to vector<68x1xf32>
    %128 = vector.broadcast %127 : vector<68x1xf32> to vector<68x128xf32>
    %129 = arith.mulf %126, %128 : vector<68x128xf32>
    %130 = arith.truncf %129 : vector<68x128xf32> to vector<68x128xbf16>
    %131 = vector.extract_strided_slice %9 {offsets = [42, 0], sizes = [68, 128], strides = [1, 1]} : vector<112x128xf32> to vector<68x128xf32>
    %132 = vector.extract_strided_slice %10 {offsets = [0, 24], sizes = [68, 1], strides = [1, 1]} : vector<68x28xf32> to vector<68x1xf32>
    %133 = vector.broadcast %132 : vector<68x1xf32> to vector<68x128xf32>
    %134 = arith.mulf %131, %133 : vector<68x128xf32>
    %135 = arith.truncf %134 : vector<68x128xf32> to vector<68x128xbf16>
    %136 = vector.extract_strided_slice %9 {offsets = [43, 0], sizes = [68, 128], strides = [1, 1]} : vector<112x128xf32> to vector<68x128xf32>
    %137 = vector.extract_strided_slice %10 {offsets = [0, 25], sizes = [68, 1], strides = [1, 1]} : vector<68x28xf32> to vector<68x1xf32>
    %138 = vector.broadcast %137 : vector<68x1xf32> to vector<68x128xf32>
    %139 = arith.mulf %136, %138 : vector<68x128xf32>
    %140 = arith.truncf %139 : vector<68x128xf32> to vector<68x128xbf16>
    %141 = vector.extract_strided_slice %9 {offsets = [44, 0], sizes = [68, 128], strides = [1, 1]} : vector<112x128xf32> to vector<68x128xf32>
    %142 = vector.extract_strided_slice %10 {offsets = [0, 26], sizes = [68, 1], strides = [1, 1]} : vector<68x28xf32> to vector<68x1xf32>
    %143 = vector.broadcast %142 : vector<68x1xf32> to vector<68x128xf32>
    %144 = arith.mulf %141, %143 : vector<68x128xf32>
    %145 = arith.truncf %144 : vector<68x128xf32> to vector<68x128xbf16>
    %146 = tpu.concatenate %15, %20, %25, %30, %35, %40, %45, %50, %55, %60, %65, %70, %75, %80, %85, %90 in 1 : vector<68x128xbf16>, vector<68x128xbf16>, vector<68x128xbf16>, vector<68x128xbf16>, vector<68x128xbf16>, vector<68x128xbf16>, vector<68x128xbf16>, vector<68x128xbf16>, vector<68x128xbf16>, vector<68x128xbf16>, vector<68x128xbf16>, vector<68x128xbf16>, vector<68x128xbf16>, vector<68x128xbf16>, vector<68x128xbf16>, vector<68x128xbf16> -> vector<68x2048xbf16>
    %147 = tpu.concatenate %95, %100, %105, %110, %115, %120, %125, %130, %135, %140, %145 in 1 : vector<68x128xbf16>, vector<68x128xbf16>, vector<68x128xbf16>, vector<68x128xbf16>, vector<68x128xbf16>, vector<68x128xbf16>, vector<68x128xbf16>, vector<68x128xbf16>, vector<68x128xbf16>, vector<68x128xbf16>, vector<68x128xbf16> -> vector<68x1408xbf16>
    %148 = tpu.concatenate %146, %147 in 1 : vector<68x2048xbf16>, vector<68x1408xbf16> -> vector<68x3456xbf16>
    %c0_9 = arith.constant 0 : index
    %c0_10 = arith.constant 0 : index
    %149 = vector.load %arg5[%c0_9, %c0_10] : memref<3456x128xbf16, #tpu.memory_space<vmem>>, vector<3456x128xbf16>
    %cst_11 = arith.constant dense<0.000000e+00> : vector<68x128xf32>
    %150 = tpu.matmul %148, %149, %cst_11 {dimension_numbers = #tpu.dot_dimension_numbers<[1], [0], [0], [1], [0, 0, 1, 1], [], []>} : vector<68x3456xbf16>, vector<3456x128xbf16>, vector<68x128xf32> -> vector<68x128xf32>
    %c0_12 = arith.constant 0 : index
    %c0_13 = arith.constant 0 : index
    %151 = vector.load %arg6[%c0_12, %c0_13] : memref<1x128xf32, #tpu.memory_space<vmem>>, vector<1x128xf32>
    %152 = vector.broadcast %151 : vector<1x128xf32> to vector<68x128xf32>
    %153 = arith.addf %150, %152 : vector<68x128xf32>
    %154 = vector.extract_strided_slice %10 {offsets = [0, 27], sizes = [68, 1], strides = [1, 1]} : vector<68x28xf32> to vector<68x1xf32>
    %155 = vector.broadcast %154 : vector<68x1xf32> to vector<68x128xf32>
    %156 = arith.mulf %153, %155 : vector<68x128xf32>
    %157 = arith.addf %1, %156 : vector<68x128xf32>
    %c0_14 = arith.constant 0 : index
    %c0_15 = arith.constant 0 : index
    %c0_16 = arith.constant 0 : index
    %158 = vector.load %arg7[%c0_14, %c0_15, %c0_16] : memref<1x68x128xf32, #tpu.memory_space<vmem>>, vector<1x68x128xf32>
    %159 = vector.shape_cast %158 : vector<1x68x128xf32> to vector<68x128xf32>
    %160 = vector.shape_cast %157 : vector<68x128xf32> to vector<1x68x128xf32>
    tpu.vector_store %arg7[%c0_14, %c0_15, %c0_16], %160 {strides = array<i32>} : memref<1x68x128xf32, #tpu.memory_space<vmem>>, vector<1x68x128xf32>,
    return
  }
  func.func @transform_0(%arg0: i32) -> (i32, i32, i32) {
    %c0_i32 = arith.constant 0 : i32
    %c0_i32_0 = arith.constant 0 : i32
    %c0_i32_1 = arith.constant 0 : i32
    return %arg0, %c0_i32, %c0_i32_0 : i32, i32, i32
  }
  func.func @transform_1(%arg0: i32) -> (i32, i32) {
    %c0_i32 = arith.constant 0 : i32
    %c0_i32_0 = arith.constant 0 : i32
    %c0_i32_1 = arith.constant 0 : i32
    return %c0_i32, %c0_i32_0 : i32, i32
  }
  func.func @transform_2(%arg0: i32) -> (i32, i32) {
    %c0_i32 = arith.constant 0 : i32
    %c0_i32_0 = arith.constant 0 : i32
    %c0_i32_1 = arith.constant 0 : i32
    return %c0_i32, %c0_i32_0 : i32, i32
  }
  func.func @transform_3(%arg0: i32) -> (i32, i32) {
    %c0_i32 = arith.constant 0 : i32
    %c0_i32_0 = arith.constant 0 : i32
    %c0_i32_1 = arith.constant 0 : i32
    return %c0_i32, %c0_i32_0 : i32, i32
  }
  func.func @transform_4(%arg0: i32) -> (i32, i32) {
    %c0_i32 = arith.constant 0 : i32
    %c0_i32_0 = arith.constant 0 : i32
    %c0_i32_1 = arith.constant 0 : i32
    return %c0_i32, %c0_i32_0 : i32, i32
  }
  func.func @transform_5(%arg0: i32) -> (i32, i32) {
    %c0_i32 = arith.constant 0 : i32
    %c0_i32_0 = arith.constant 0 : i32
    %c0_i32_1 = arith.constant 0 : i32
    return %c0_i32, %c0_i32_0 : i32, i32
  }
  func.func @transform_6(%arg0: i32) -> (i32, i32, i32) {
    %c0_i32 = arith.constant 0 : i32
    %c0_i32_0 = arith.constant 0 : i32
    %c0_i32_1 = arith.constant 0 : i32
    return %arg0, %c0_i32, %c0_i32_0 : i32, i32, i32
  }
}

</mosaic_0001>

<bundles_post_ra>
// kernel: _adapter_forward_impl.1
= control target key start
LH: loop header
LB: loop body
LE: loop exit
PB: predicated region body
PF: predicated region fallthrough
CT: control target
= control target key end

     0   :  { %s7397_s21 = smov 0   ;;  %s10836_s0 = inlined_call_operand.vmem [shape: f32[2,68,128], index: 0, kind: input, shape index: {}]   ;;  %s10837_s1 = inlined_call_operand.vmem [shape: f32[68,28], index: 1, kind: input, shape index: {}]   ;;  %s10838_s2 = inlined_call_operand.vmem [shape: bf16[128,128], index: 2, kind: input, shape index: {}]   ;;  %s10839_s3 = inlined_call_operand.vmem [shape: f32[1,128], index: 3, kind: input, shape index: {}]   ;;  %s10840_s4 = inlined_call_operand.vmem [shape: bf16[3456,128], index: 4, kind: input, shape index: {}]   ;;  %s10841_s5 = inlined_call_operand.vmem [shape: f32[1,128], index: 5, kind: input, shape index: {}]   ;;  %s10842_s6 = inlined_call_operand.vmem [shape: f32[2,68,128], index: 6, kind: output, shape index: {}]  }
   0x1 LB: > { %s5986_s22 = sadd.s32 4294967295, %s7330_s21   ;;  %p5990_p0 = scmp.ge.s32.totalorder %s7330_s21, 1  ;;  %s7330_s21 = sphi %s7397_s21, %s16_s21  }
   0x2   : > { %p212_p1 = scmp.lt.s32.totalorder %s7330_s21, 3 }
   0x4   : > { %p213_p2 = pnand %p5990_p0, %p212_p1 }
   0x6   : > { %216 = sbr.rel (%p213_p2) target bundleno = 973 (0x3cd), region = 44 }
   0xb   : > { %v7408_v0 = vld [vmem:[%s10837_s1 + $0x10] sm:$0xff]  ;;  %v7413_v1 = vld [vmem:[%s10837_s1] sm:$0xff]  ;;  %v7332_v2 = vmov 0   ;;  %v7046_v3 = vld [vmem:[%s10838_s2 + $0x38] sm:$0xff]   ;;  %v10843_v4 = vmov 0.0   ;;  %vm7334_vm0 = vmmov 0  }
   0xc   : > { %6973 = vset.pattern.permute.xlu1 %v7332_v2  ;;  %6972 = vset.pattern.permute.xlu0 %v7332_v2  ;;  %v7424_v5 = vld [vmem:[%s10837_s1 + $0x18] sm:$0xff]  ;;  %v7429_v6 = vld [vmem:[%s10837_s1 + $0x8] sm:$0xff]  ;;  %v7047_v7 = vld [vmem:[%s10838_s2 + $0x30] sm:$0xff]   ;;  %p242_p3 = scmp.lt.s32.totalorder %s5986_s22, 1  ;;  %v7335_v16 = vmov 1   ;;  %v7336_v25 = vmov 2  }
   0xd   : > { %471 = vperm.xlu1 %6973, %v7408_v0   ;;  %461 = vperm.xlu0 %6972, %v7413_v1   ;;  %v7442_v8 = vld [vmem:[%s10837_s1 + $0x28] sm:$0xff]  ;;  %v7447_v9 = vld [vmem:[%s10837_s1 + $0x20] sm:$0xff]  ;;  %v7460_v11 = vld [vmem:[%s10837_s1 + $0x38] sm:$0xff]  ;;  %v7337_v33 = vmov 3   ;;  %v7338_v36 = vmov 4   ;;  %v7339_v45 = vmov 5  }
   0xe   : > { %6845 = vmatprep.subr.bf16.mxu0 %v10843_v4  ;;  %6861 = vmatprep.mubr.msk.bf16.mxu0 %vm7334_vm0, %v10843_v4  ;;  %v7048_v10 = vld [vmem:[%s10838_s2 + $0x28] sm:$0xff]   ;;  %v7465_v12 = vld [vmem:[%s10837_s1 + $0x30] sm:$0xff]  ;;  %v7049_v13 = vld [vmem:[%s10838_s2 + $0x20] sm:$0xff]   ;;  %s10949_s22 = smov (!%p242_p3, %s5986_s22), 1  ;;  %v7340_v63 = vmov 6   ;;  %vm545_vm1 = vcmask 1040384  }
   0xf   : > { %6846 = vmatpush3.bf16.msra.mxu0 %v7046_v3  ;;  %v7474_v14 = vld [vmem:[%s10837_s1 + $0x40] sm:$0xf]  ;;  %v7050_v15 = vld [vmem:[%s10838_s2 + $0x18] sm:$0xff]   ;;  %v7051_v17 = vld [vmem:[%s10838_s2 + $0x10] sm:$0xff]   ;;  %s6933_s7 = smul.u32 72, %s10949_s22  ;;  %vm448_vm2 = vcmask 1041408  }
  0x10   : > { %6847 = vmatprep.subr.bf16.mxu0 %v10843_v4  ;;  %v7052_v18 = vld [vmem:[%s10838_s2 + $0x8] sm:$0xff]   ;;  %v7053_v19 = vld [vmem:[%s10838_s2] sm:$0xff]   ;;  %v7054_v37 = vld [vmem:[%s10840_s4 + $0xf8] sm:$0xff]   ;;  %vm680_vm3 = vcmask 1043456   ;;  %vm748_vm4 = vcmask 1044480   ;;  %vm419_vm5 = vcmask 1045504  }
  0x11   : > { %476 = vperm.xlu1 %6973, %v7424_v5   ;;  %466 = vperm.xlu0 %6972, %v7429_v6   ;;  %s7503_s12 = scalar_lea.vmem %s10836_s0, %s6933_s7  ;;  %v7055_v38 = vld [vmem:[%s10840_s4 + $0xb8] sm:$0xff]   ;;  %v7058_v41 = vld [vmem:[%s10840_s4 + $0xf0] sm:$0xff]   ;;  %v7062_v46 = vld [vmem:[%s10840_s4 + $0xe8] sm:$0xff]   ;;  %vm1411_vm6 = vcmask 1046528   ;;  %vm2245_vm7 = vsmask.f32 7424  ;;  %s10796_s25 = scalar_lea.vmem %s10842_s6, %s6933_s7 }
  0x12   : > { %v253_v20 = vld [vmem:[%s7503_s12] sm:$0xff]  ;;  %v254_v21 = vld [vmem:[%s7503_s12 + $0x8] sm:$0xff]  ;;  %v255_v23 = vld [vmem:[%s7503_s12 + $0x10] sm:$0xff]  ;;  %vm2330_vm8 = vsmask.f32 5376  ;;  %vm1205_vm9 = vcmask 1042432  }
  0x13   : > { %6848 = vmatpush3.bf16.msra.mxu0 %v7047_v7  ;;  %v262_v22 = vpack.c.bf16 %v254_v21, %v253_v20  ;;  %v256_v24 = vld [vmem:[%s7503_s12 + $0x18] sm:$0xff]  ;;  %v257_v27 = vld [vmem:[%s7503_s12 + $0x20] sm:$0xff]  ;;  %v258_v28 = vld [vmem:[%s7503_s12 + $0x28] sm:$0xff]  ;;  %vm2526_vm10 = vsmask.f32 6400 }
  0x14   : > { %6849 = vmatprep.subr.bf16.mxu0 %v10843_v4  ;;  %v263_v26 = vpack.c.bf16 %v256_v24, %v255_v23  ;;  %v264_v29 = vpack.c.bf16 %v258_v28, %v257_v27  ;;  %v259_v30 = vld [vmem:[%s7503_s12 + $0x30] sm:$0xff]  ;;  %v260_v31 = vld [vmem:[%s7503_s12 + $0x38] sm:$0xff]  ;;  %v261_v34 = vld [vmem:[%s7503_s12 + $0x40] sm:$0xf]  ;;  %vm2644_vm11 = vsmask.f32 4352 }
  0x15   : > { %486 = vperm.xlu1 %6973, %v7442_v8   ;;  %481 = vperm.xlu0 %6972, %v7447_v9   ;;  %v265_v32 = vpack.c.bf16 %v260_v31, %v259_v30  ;;  %v266_v35 = vpack.c.bf16 %v261_v34, %v261_v34  ;;  %v7056_v39 = vld [vmem:[%s10840_s4 + $0x78] sm:$0xff]   ;;  %v7059_v42 = vld [vmem:[%s10840_s4 + $0xb0] sm:$0xff]   ;;  %v7063_v47 = vld [vmem:[%s10840_s4 + $0xa8] sm:$0xff]  }
  0x16   : > { %v7057_v40 = vld [vmem:[%s10840_s4 + $0x38] sm:$0xff]   ;;  %6234 = vmatprep.subr.bf16.mxu1 %v7056_v39  ;;  %v7060_v43 = vld [vmem:[%s10840_s4 + $0x70] sm:$0xff]   ;;  %v7064_v48 = vld [vmem:[%s10840_s4 + $0x68] sm:$0xff]  }
  0x17   : > { %6850 = vmatpush3.bf16.msra.mxu0 %v7048_v10  ;;  %6235 = vmatpush3.bf16.msra.mxu1 %v7057_v40  ;;  %v7061_v44 = vld [vmem:[%s10840_s4 + $0x30] sm:$0xff]   ;;  %v7065_v49 = vld [vmem:[%s10840_s4 + $0x28] sm:$0xff]   ;;  %v7066_v50 = vld [vmem:[%s10840_s4 + $0xe0] sm:$0xff]  }
  0x18   : > { %6851 = vmatprep.subr.bf16.mxu0 %v10843_v4  ;;  %6236 = vmatprep.subr.bf16.mxu1 %v7060_v43  ;;  %v7067_v51 = vld [vmem:[%s10840_s4 + $0xa0] sm:$0xff]   ;;  %v7070_v54 = vld [vmem:[%s10840_s4 + $0xd8] sm:$0xff]   ;;  %v7074_v58 = vld [vmem:[%s10840_s4 + $0xd0] sm:$0xff]  }
  0x19   : > { %496 = vperm.xlu1 %6973, %v7460_v11   ;;  %491 = vperm.xlu0 %6972, %v7465_v12   ;;  %v7068_v52 = vld [vmem:[%s10840_s4 + $0x60] sm:$0xff]   ;;  %v7071_v55 = vld [vmem:[%s10840_s4 + $0x98] sm:$0xff]   ;;  %v7075_v59 = vld [vmem:[%s10840_s4 + $0x90] sm:$0xff]  }
  0x1a   : > { %v7069_v53 = vld [vmem:[%s10840_s4 + $0x20] sm:$0xff]   ;;  %v7072_v56 = vld [vmem:[%s10840_s4 + $0x58] sm:$0xff]   ;;  %v7076_v60 = vld [vmem:[%s10840_s4 + $0x50] sm:$0xff]  }
  0x1b   : > { %6852 = vmatpush3.bf16.msra.mxu0 %v7049_v13  ;;  %6237 = vmatpush3.bf16.msra.mxu1 %v7061_v44  ;;  %v7073_v57 = vld [vmem:[%s10840_s4 + $0x18] sm:$0xff]   ;;  %v7077_v61 = vld [vmem:[%s10840_s4 + $0x10] sm:$0xff]   ;;  %v7078_v62 = vld [vmem:[%s10840_s4 + $0xc8] sm:$0xff]  }
  0x1c   : > { %6853 = vmatprep.subr.bf16.mxu0 %v10843_v4  ;;  %6238 = vmatprep.subr.bf16.mxu1 %v7064_v48  ;;  %v7079_v2 = vld [vmem:[%s10840_s4 + $0x88] sm:$0xff]   ;;  %v7082_v7 = vld [vmem:[%s10840_s4 + $0xc0] sm:$0xff]   ;;  %v7089_v20 = vld [vmem:[%s10840_s4 + $0x1f8] sm:$0xff]  }
  0x1d   : > { %6974 = vset.pattern.permute.xlu1 %v7335_v16  ;;  %501 = vperm.xlu0 %6972, %v7474_v14   ;;  %v7080_v3 = vld [vmem:[%s10840_s4 + $0x48] sm:$0xff]   ;;  %v7083_v10 = vld [vmem:[%s10840_s4 + $0x80] sm:$0xff]   ;;  %v7759_v34 = vld [vmem:[%s10837_s1 + $0x30] sm:$0xff] }
  0x1e   : > { %519 = vperm.xlu1 %6974, %v7413_v1   ;;  %v7084_v13 = vld [vmem:[%s10840_s4 + $0x40] sm:$0xff]   ;;  %v7732_v27 = vld [vmem:[%s10837_s1 + $0x8] sm:$0xff] }
  0x1f   : > { %6854 = vmatpush3.bf16.msra.mxu0 %v7050_v15  ;;  %6239 = vmatpush3.bf16.msra.mxu1 %v7065_v49  ;;  %v7341_v15 = vmov 7   ;;  %v7716_v23 = vld [vmem:[%s10837_s1 + $0x40] sm:$0xf] }
  0x20   : > { %6855 = vmatprep.subr.bf16.mxu0 %v10843_v4  ;;  %6240 = vmatprep.subr.bf16.mxu1 %v7068_v52  ;;  %v7738_v28 = vld [vmem:[%s10837_s1] sm:$0xff] }
  0x21   : > { %6975 = vset.pattern.permute.xlu0 %v7335_v16  ;;  %v7748_v31 = vld [vmem:[%s10837_s1 + $0x20] sm:$0xff] }
  0x22   : > { %525 = vperm.xlu1 %6974, %v7408_v0   ;;  %522 = vperm.xlu0 %6975, %v7429_v6  }
  0x23   : > { %6856 = vmatpush3.bf16.msra.mxu0 %v7051_v17  ;;  %6241 = vmatpush3.bf16.msra.mxu1 %v7069_v53 }
  0x24   : > { %6857 = vmatprep.subr.bf16.mxu0 %v10843_v4  ;;  %6242 = vmatprep.subr.bf16.mxu1 %v7072_v56  ;;  %v10846_v56 = vmov 11  }
  0x26   : > { %528 = vperm.xlu1 %6974, %v7424_v5   ;;  %531 = vperm.xlu0 %6975, %v7447_v9  }
  0x27   : > { %6858 = vmatpush3.bf16.msra.mxu0 %v7052_v18  ;;  %6243 = vmatpush3.bf16.msra.mxu1 %v7073_v57 }
  0x28   : > { %6859 = vmatprep.subr.bf16.mxu0 %v10843_v4  ;;  %6244 = vmatprep.subr.bf16.mxu1 %v7076_v60 }
  0x2a   : > { %534 = vperm.xlu1 %6974, %v7442_v8   ;;  %537 = vperm.xlu0 %6975, %v7465_v12  }
  0x2b   : > { %6860 = vmatpush3.bf16.msra.mxu0 %v7053_v19  ;;  %6245 = vmatpush3.bf16.msra.mxu1 %v7077_v61 }
  0x2c   : > { %6280 = vmatprep.subr.bf16.mxu0 %v7054_v37  ;;  %6246 = vmatprep.subr.bf16.mxu1 %v7080_v3 }
  0x2e   : > { %6862 = vmatmul.mubr.bf16.vlgmr.msra.gmra.mxu0 %v262_v22  ;;  %540 = vperm.xlu1 %6974, %v7460_v11  }
  0x2f   : > { %543 = vperm.xlu0 %6975, %v7474_v14   ;;  %6865 = vmatprep.mubr.msk.bf16.mxu0 %vm7334_vm0, %v10843_v4 }
  0x30   : > { %6281 = vmatpush3.bf16.msra.mxu0 %v7055_v38  ;;  %v7343_v38 = vmov 9  }
  0x31   : > { %6282 = vmatprep.subr.bf16.mxu0 %v7058_v41 }
  0x32   : > { %6976 = vset.pattern.permute.xlu1 %v7336_v25 }
  0x33   : > { %6977 = vset.pattern.permute.xlu0 %v7336_v25  ;;  %587 = vperm.xlu1 %6976, %v7413_v1   ;;  %v7342_v25 = vmov 8  }
  0x34   : > { %590 = vperm.xlu0 %6977, %v7429_v6   ;;  %6283 = vmatpush3.bf16.msra.mxu0 %v7059_v42 }
  0x35   : > { %6284 = vmatprep.subr.bf16.mxu0 %v7062_v46 }
  0x36   : > { %6866 = vmatmul.mubr.bf16.gmra.mxu0 %v263_v26 }
  0x37   : > { %593 = vperm.xlu1 %6976, %v7408_v0   ;;  %6869 = vmatprep.mubr.msk.bf16.mxu0 %vm7334_vm0, %v10843_v4 }
  0x38   : > { %599 = vperm.xlu0 %6977, %v7447_v9   ;;  %6285 = vmatpush3.bf16.msra.mxu0 %v7063_v47  ;;  %v7344_v47 = vmov 10  }
  0x39   : > { %6286 = vmatprep.subr.bf16.mxu0 %v7066_v50 }
  0x3b   : > { %596 = vperm.xlu1 %6976, %v7424_v5  }
  0x3c   : > { %605 = vperm.xlu0 %6977, %v7465_v12   ;;  %6287 = vmatpush3.bf16.msra.mxu0 %v7067_v51 }
  0x3d   : > { %6288 = vmatprep.subr.bf16.mxu0 %v7070_v54 }
  0x3e   : > { %6870 = vmatmul.mubr.bf16.gmra.mxu0 %v264_v29 }
  0x3f   : > { %602 = vperm.xlu1 %6976, %v7442_v8   ;;  %6873 = vmatprep.mubr.msk.bf16.mxu0 %vm7334_vm0, %v10843_v4 }
  0x40   : > { %611 = vperm.xlu0 %6977, %v7474_v14   ;;  %6289 = vmatpush3.bf16.msra.mxu0 %v7071_v55 }
  0x41   : > { %6290 = vmatprep.subr.bf16.mxu0 %v7074_v58 }
  0x43   : > { %608 = vperm.xlu1 %6976, %v7460_v11  }
  0x44   : > { %6979 = vset.pattern.permute.xlu0 %v7337_v33  ;;  %6291 = vmatpush3.bf16.msra.mxu0 %v7075_v59 }
  0x45   : > { %657 = vperm.xlu0 %6979, %v7429_v6   ;;  %6292 = vmatprep.subr.bf16.mxu0 %v7078_v62 }
  0x46   : > { %6874 = vmatmul.mubr.bf16.gmra.mxu0 %v265_v32 }
  0x47   : > { %6978 = vset.pattern.permute.xlu1 %v7337_v33  ;;  %6877 = vmatprep.mubr.msk.bf16.mxu0 %vm7334_vm0, %v10843_v4 }
  0x48   : > { %654 = vperm.xlu1 %6978, %v7413_v1   ;;  %6293 = vmatpush3.bf16.msra.mxu0 %v7079_v2 }
  0x49   : > { %666 = vperm.xlu0 %6979, %v7447_v9   ;;  %6294 = vmatprep.subr.bf16.mxu0 %v7082_v7 }
  0x4c   : > { %660 = vperm.xlu1 %6978, %v7408_v0   ;;  %6295 = vmatpush3.bf16.msra.mxu0 %v7083_v10  ;;  %v10845_v10 = vmov 12  }
  0x4d   : > { %672 = vperm.xlu0 %6979, %v7465_v12   ;;  %6372 = vmatprep.subr.bf16.mxu0 %v7089_v20 }
  0x4e   : > { %6878 = vmatmul.mubr.bf16.gmra.mxu0 %v266_v35 }
  0x50   : > { %663 = vperm.xlu1 %6978, %v7424_v5  }
  0x51   : > { %678 = vperm.xlu0 %6979, %v7474_v14  }
  0x54   : > { %669 = vperm.xlu1 %6978, %v7442_v8  }
  0x55   : > { %6981 = vset.pattern.permute.xlu0 %v7338_v36 }
  0x56   : > { %725 = vperm.xlu0 %6981, %v7429_v6  }
  0x58   : > { %675 = vperm.xlu1 %6978, %v7460_v11  }
  0x5a   : > { %734 = vperm.xlu0 %6981, %v7447_v9  }
  0x5c   : > { %6980 = vset.pattern.permute.xlu1 %v7338_v36 }
  0x5d   : > { %722 = vperm.xlu1 %6980, %v7413_v1  }
  0x5e   : > { %740 = vperm.xlu0 %6981, %v7465_v12  }
  0x61   : > { %728 = vperm.xlu1 %6980, %v7408_v0  }
  0x62   : > { %746 = vperm.xlu0 %6981, %v7474_v14  }
  0x65   : > { %731 = vperm.xlu1 %6980, %v7424_v5  }
  0x66   : > { %6983 = vset.pattern.permute.xlu0 %v7339_v45 }
  0x67   : > { %795 = vperm.xlu0 %6983, %v7429_v6  }
  0x69   : > { %737 = vperm.xlu1 %6980, %v7442_v8  }
  0x6b   : > { %804 = vperm.xlu0 %6983, %v7447_v9  }
  0x6d   : > { %743 = vperm.xlu1 %6980, %v7460_v11  }
  0x6f   : > { %810 = vperm.xlu0 %6983, %v7465_v12  }
  0x71   : > { %6982 = vset.pattern.permute.xlu1 %v7339_v45 }
  0x72   : > { %792 = vperm.xlu1 %6982, %v7413_v1  }
  0x73   : > { %816 = vperm.xlu0 %6983, %v7474_v14  }
  0x76   : > { %798 = vperm.xlu1 %6982, %v7408_v0   ;;  %v7081_v0 = vld [vmem:[%s10840_s4 + $0x8] sm:$0xff]  }
  0x77   : > { %6985 = vset.pattern.permute.xlu0 %v7340_v63  ;;  %6247 = vmatpush3.bf16.msra.mxu1 %v7081_v0 }
  0x78   : > { %865 = vperm.xlu0 %6985, %v7429_v6   ;;  %6248 = vmatprep.subr.bf16.mxu1 %v7084_v13 }
  0x7a   : > { %801 = vperm.xlu1 %6982, %v7424_v5   ;;  %v7085_v5 = vld [vmem:[%s10840_s4] sm:$0xff]  }
  0x7b   : > { %6249 = vmatpush3.bf16.msra.mxu1 %v7085_v5 }
  0x7c   : > { %877 = vperm.xlu0 %6985, %v7447_v9  }
  0x7e   : > { %807 = vperm.xlu1 %6982, %v7442_v8   ;;  %v7678_v8 = vld [vmem:[%s10837_s1 + $0x10] sm:$0xff] }
  0x80   : > { %885 = vperm.xlu0 %6985, %v7465_v12  }
  0x82   : > { %813 = vperm.xlu1 %6982, %v7460_v11   ;;  %v7086_v11 = vld [vmem:[%s10840_s4 + $0x178] sm:$0xff]  }
  0x83   : > { %6326 = vmatprep.subr.bf16.mxu1 %v7086_v11 }
  0x84   : > { %893 = vperm.xlu0 %6985, %v7474_v14  }
  0x86   : > { %6984 = vset.pattern.permute.xlu1 %v7340_v63 }
  0x87   : > { %861 = vperm.xlu1 %6984, %v7413_v1  }
  0x88   : > { %6987 = vset.pattern.permute.xlu0 %v7341_v15  ;;  %v7670_v16 = vpop.permute.xlu1 %471  ;;  %v7672_v17 = vpop.permute.xlu0 %461 }
  0x89   : > { %914 = vperm.xlu0 %6987, %v7429_v6   ;;  %v7692_v6 = vld [vmem:[%s10837_s1 + $0x18] sm:$0xff] }
  0x8b   : > { %869 = vperm.xlu1 %6984, %v7678_v8  }
  0x8c   : > { %v7684_v1 = vpop.permute.xlu1 %476  ;;  %v7686_v14 = vpop.permute.xlu0 %466 }
  0x8d   : > { %923 = vperm.xlu0 %6987, %v7447_v9   ;;  %v7706_v9 = vld [vmem:[%s10837_s1 + $0x28] sm:$0xff] }
  0x8f   : > { %873 = vperm.xlu1 %6984, %v7692_v6  }
  0x90   : > { %v7695_v18 = vpop.permute.xlu1 %486  ;;  %v7697_v19 = vpop.permute.xlu0 %481 }
  0x91   : > { %10870 = vst [vmem:[#allocation2_spill] sm:$0xff] %v7695_v18  ;;  %10871 = vst [vmem:[#allocation3_spill] sm:$0xff] %v7697_v19  ;;  %929 = vperm.xlu0 %6987, %v7465_v12   ;;  %v7722_v12 = vld [vmem:[%s10837_s1 + $0x38] sm:$0xff] }
  0x93   : > { %881 = vperm.xlu1 %6984, %v7706_v9  }
  0x94   : > { %v7709_v21 = vpop.permute.xlu1 %496  ;;  %v7711_v22 = vpop.permute.xlu0 %491 }
  0x95   : > { %10872 = vst [vmem:[#allocation4_spill] sm:$0xff] %v7709_v21  ;;  %10873 = vst [vmem:[#allocation5_spill] sm:$0xff] %v7711_v22  ;;  %935 = vperm.xlu0 %6987, %v7716_v23  }
  0x97   : > { %889 = vperm.xlu1 %6984, %v7722_v12  }
  0x98   : > { %v7725_v24 = vpop.permute.xlu0 %501 }
  0x99   : > { %10874 = vst [vmem:[#allocation6_spill] sm:$0xff] %v7725_v24  ;;  %6989 = vset.pattern.permute.xlu0 %v7342_v25  ;;  %v7727_v26 = vpop.permute.xlu1 %519 }
  0x9a   : > { %981 = vperm.xlu0 %6989, %v7732_v27   ;;  %v546_v2 = vrot.slane %v7727_v26, 7 }
  0x9b   : > { %6986 = vset.pattern.permute.xlu1 %v7341_v15 }
  0x9c   : > { %911 = vperm.xlu1 %6986, %v7738_v28   ;;  %v572_v15 = vmul.f32 0.0, %v546_v2 }
  0x9d   : > { %v7741_v29 = vpop.permute.xlu1 %525  ;;  %v7743_v30 = vpop.permute.xlu0 %522 }
  0x9e   : > { %990 = vperm.xlu0 %6989, %v7748_v31   ;;  %v547_v62 = vrot.slane %v7743_v30, 7 }
  0xa0   : > { %917 = vperm.xlu1 %6986, %v7678_v8   ;;  %v548_v0 = vsel %vm545_vm1, %v546_v2, %v547_v62 }
  0xa1   : > { %v7752_v32 = vpop.permute.xlu1 %528  ;;  %v7754_v33 = vpop.permute.xlu0 %531  ;;  %v573_v5 = vmul.f32 0.0, %v548_v0 }
  0xa2   : > { %996 = vperm.xlu0 %6989, %v7759_v34  }
  0xa3   : > { %v581_v30 = vpack.c.bf16 %v573_v5, %v572_v15  ;;  %v551_v15 = vrot.slane %v7752_v32, 7 }
  0xa4   : > { %920 = vperm.xlu1 %6986, %v7692_v6  }
  0xa5   : > { %v7763_v35 = vpop.permute.xlu1 %534  ;;  %v7765_v36 = vpop.permute.xlu0 %537 }
  0xa6   : > { %1002 = vperm.xlu0 %6989, %v7716_v23   ;;  %v557_v21 = vrot.slane %v7765_v36, 7 }
  0xa8   : > { %926 = vperm.xlu1 %6986, %v7706_v9  }
  0xa9   : > { %v7769_v37 = vpop.permute.xlu1 %540 }
  0xaa   : > { %6991 = vset.pattern.permute.xlu0 %v7343_v38  ;;  %v7771_v39 = vpop.permute.xlu0 %543  ;;  %v559_v22 = vrot.slane %v7769_v37, 7 }
  0xab   : > { %1048 = vperm.xlu0 %6991, %v7732_v27   ;;  %v561_v5 = vrot.slane %v7771_v39, 7 }
  0xac   : > { %932 = vperm.xlu1 %6986, %v7722_v12  }
  0xae   : > { %v7775_v40 = vpop.permute.xlu1 %587 }
  0xaf   : > { %1057 = vperm.xlu0 %6991, %v7748_v31   ;;  %v7778_v41 = vpop.permute.xlu0 %590  ;;  %v613_v20 = vrot.slane %v7775_v40, 6  ;;  %v549_v40 = vrot.slane %v7741_v29, 7  ;;  %v553_v29 = vrot.slane %v7754_v33, 7 }
  0xb0   : > { %6988 = vset.pattern.permute.xlu1 %v7342_v25  ;;  %v614_v25 = vrot.slane %v7778_v41, 6 }
  0xb1   : > { %978 = vperm.xlu1 %6988, %v7738_v28   ;;  %v7884_v24 = vsel %vm545_vm1, %v547_v62, %v549_v40  ;;  %v7903_v39 = vsel %vm545_vm1, %v551_v15, %v553_v29 }
  0xb2   : > { %v7781_v42 = vpop.permute.xlu1 %593  ;;  %v615_v41 = vsel %vm448_vm2, %v613_v20, %v614_v25 }
  0xb3   : > { %1063 = vperm.xlu0 %6991, %v7759_v34   ;;  %v7784_v43 = vpop.permute.xlu0 %599  ;;  %v616_v62 = vrot.slane %v7781_v42, 6 }
  0xb5   : > { %984 = vperm.xlu1 %6988, %v7678_v8  }
  0xb6   : > { %v7787_v44 = vpop.permute.xlu1 %596 }
  0xb7   : > { %1069 = vperm.xlu0 %6991, %v7716_v23   ;;  %v7790_v45 = vpop.permute.xlu0 %605 }
  0xb9   : > { %987 = vperm.xlu1 %6988, %v7692_v6  }
  0xba   : > { %v7793_v46 = vpop.permute.xlu1 %602 }
  0xbb   : > { %6993 = vset.pattern.permute.xlu0 %v7344_v47  ;;  %v7795_v48 = vpop.permute.xlu0 %611 }
  0xbc   : > { %1115 = vperm.xlu0 %6993, %v7732_v27  }
  0xbd   : > { %993 = vperm.xlu1 %6988, %v7706_v9  }
  0xbe   : > { %v7799_v49 = vpop.permute.xlu1 %608 }
  0xc0   : > { %1124 = vperm.xlu0 %6993, %v7748_v31   ;;  %v7802_v50 = vpop.permute.xlu0 %657 }
  0xc1   : > { %999 = vperm.xlu1 %6988, %v7722_v12   ;;  %v10877_v32 = vrot.slane %v7802_v50, 4 }
  0xc3   : > { %v7805_v51 = vpop.permute.xlu1 %654 }
  0xc4   : > { %1130 = vperm.xlu0 %6993, %v7759_v34   ;;  %v7808_v52 = vpop.permute.xlu0 %666  ;;  %v681_v0 = vrot.slane %v7805_v51, 4  ;;  %v639_v51 = vmul.f32 0.0, %v613_v20  ;;  %v7896_v20 = vsel %vm545_vm1, %v549_v40, %v551_v15  ;;  %v7911_v40 = vld [vmem:[%s10839_s3] ss:$0 sm:$0xff]  ;;  %v7920_v15 = vsel %vm545_vm1, %v557_v21, %v559_v22 }
  0xc5   : > { %6990 = vset.pattern.permute.xlu1 %v7343_v38  ;;  %v7860_v38 = vmul.f32 0.0, %v7672_v17 }
  0xc6   : > { %1045 = vperm.xlu1 %6990, %v7738_v28   ;;  %v707_v37 = vmul.f32 0.0, %v681_v0 }
  0xc7   : > { %v7811_v53 = vpop.permute.xlu1 %660 }
  0xc8   : > { %1136 = vperm.xlu0 %6993, %v7716_v23   ;;  %v7814_v54 = vpop.permute.xlu0 %672 }
  0xca   : > { %1051 = vperm.xlu1 %6990, %v7678_v8  }
  0xcb   : > { %v7817_v55 = vpop.permute.xlu1 %663 }
  0xcc   : > { %6995 = vset.pattern.permute.xlu0 %v10846_v56  ;;  %v7820_v57 = vpop.permute.xlu0 %678  ;;  %v640_v56 = vmul.f32 0.0, %v615_v41 }
  0xcd   : > { %1182 = vperm.xlu0 %6995, %v7732_v27  }
  0xce   : > { %1054 = vperm.xlu1 %6990, %v7692_v6  }
  0xcf   : > { %v7824_v58 = vpop.permute.xlu1 %669 }
  0xd1   : > { %1191 = vperm.xlu0 %6995, %v7748_v31   ;;  %v7827_v59 = vpop.permute.xlu0 %725 }
  0xd2   : > { %1060 = vperm.xlu1 %6990, %v7706_v9  }
  0xd3   : > { %v7830_v60 = vpop.permute.xlu1 %675 }
  0xd5   : > { %1197 = vperm.xlu0 %6995, %v7759_v34   ;;  %v7833_v61 = vpop.permute.xlu0 %734 }
  0xd6   : > { %1066 = vperm.xlu1 %6990, %v7722_v12  }
  0xd8   : > { %v7837_v63 = vpop.permute.xlu1 %722 }
  0xd9   : > { %1203 = vperm.xlu0 %6995, %v7716_v23   ;;  %v7841_v3 = vpop.permute.xlu0 %740  ;;  %v749_v36 = vrot.slane %v7837_v63, 3  ;;  %v618_v63 = vrot.slane %v7787_v44, 6  ;;  %v617_v44 = vsel %vm448_vm2, %v614_v25, %v616_v62  ;;  %v628_v25 = vrot.slane %v7795_v48, 6 }
  0xda   : > { %6992 = vset.pattern.permute.xlu1 %v7344_v47  ;;  %v7863_v47 = vmul.f32 0.0, %v7686_v14  ;;  %v2249_v14 = vshll.u32 %v581_v30, 16 }
  0xdb   : > { %1112 = vperm.xlu1 %6992, %v7738_v28  }
  0xdc   : > { %v7845_v7 = vpop.permute.xlu1 %728 }
  0xdd   : > { %6997 = vset.pattern.permute.xlu0 %v10845_v10  ;;  %v7848_v13 = vpop.permute.xlu0 %746  ;;  %v555_v10 = vrot.slane %v7763_v35, 7  ;;  %v2251_v35 = vrot.slane %v2249_v14, 1  ;;  %v2247_v14 = vshrl.u32 %v581_v30, 16 }
  0xde   : > { %1250 = vperm.xlu0 %6997, %v7732_v27  }
  0xdf   : > { %1118 = vperm.xlu1 %6992, %v7678_v8   ;;  %v7906_v41 = vsel %vm545_vm1, %v553_v29, %v555_v10  ;;  %v7914_v42 = vsel %vm545_vm1, %v555_v10, %v557_v21  ;;  %v620_v29 = vrot.slane %v7784_v43, 6  ;;  %v7929_v19 = vor.u32 %v2251_v35, %v2247_v14 }
  0xe0   : > { %v7852_v11 = vpop.permute.xlu1 %731  ;;  %v10881_v21 = vrot.slane %v7827_v59, 3  ;;  %v10882_v43 = vmov 11   ;;  %v626_v35 = vrot.slane %v7799_v49, 6 }
  0xe1   : > { %v7952_v48 = vsel %vm448_vm2, %v618_v63, %v620_v29 }
  0xe2   : > { %1259 = vperm.xlu0 %6997, %v7748_v31   ;;  %v7857_v26 = vpop.permute.xlu0 %795 }
  0xe3   : > { %1121 = vperm.xlu1 %6992, %v7692_v6  }
  0xe4   : > { %v7866_v2 = vpop.permute.xlu1 %737 }
  0xe6   : > { %1265 = vperm.xlu0 %6997, %v7759_v34   ;;  %v7873_v17 = vpop.permute.xlu0 %804 }
  0xe7   : > { %10875 = vst [vmem:[#allocation7_spill] sm:$0xff] %v7873_v17  ;;  %1127 = vperm.xlu1 %6992, %v7706_v9   ;;  %v683_v17 = vsel %vm680_vm3, %v681_v0, %v10877_v32  ;;  %v648_v32 = vpack.c.bf16 %v640_v56, %v639_v51  ;;  %v7923_v56 = vsel %vm545_vm1, %v559_v22, %v561_v5  ;;  %v10849_v51 = vmov 13  }
  0xe8   : > { %v7881_v4 = vpop.permute.xlu1 %743  ;;  %10879 = vst [vmem:[#allocation10_spill] sm:$0xff] %v7923_v56  ;;  %v622_v0 = vrot.slane %v7793_v46, 6  ;;  %v619_v46 = vsel %vm448_vm2, %v616_v62, %v618_v63  ;;  %v690_v62 = vrot.slane %v7824_v58, 4  ;;  %v10886_v58 = vrot.slane %v7802_v50, 4 }
  0xe9   : > { %10876 = vst [vmem:[#allocation8_spill] sm:$0xff] %v7881_v4  ;;  %v7939_v5 = vrot.slane %v648_v32, 1  ;;  %v686_v32 = vrot.slane %v7817_v55, 4 }
  0xea   : > { %1271 = vperm.xlu0 %6997, %v7716_v23   ;;  %v7893_v33 = vpop.permute.xlu0 %810 }
  0xeb   : > { %10878 = vst [vmem:[#allocation9_spill] sm:$0xff] %v7893_v33  ;;  %1133 = vperm.xlu1 %6992, %v7722_v12   ;;  %v708_v33 = vmul.f32 0.0, %v683_v17  ;;  %v751_v17 = vsel %vm748_vm4, %v749_v36, %v10881_v21  ;;  %v684_v21 = vrot.slane %v7811_v53, 4 }
  0xec   : > { %v777_v4 = vmul.f32 0.0, %v751_v17 }
  0xed   : > { %v7917_v18 = vpop.permute.xlu1 %792  ;;  %v716_v56 = vpack.c.bf16 %v708_v33, %v707_v37  ;;  %v692_v37 = vrot.slane %v7814_v54, 4  ;;  %v696_v54 = vrot.slane %v7820_v57, 4 }
  0xee   : > { %6999 = vset.pattern.permute.xlu0 %v10849_v51  ;;  %v372_v30 = vpop.f32.mrf.mxu0  ;;  %v7927_v10 = vpop.permute.xlu0 %816  ;;  %v624_v51 = vrot.slane %v7790_v45, 6  ;;  %v776_v45 = vmul.f32 0.0, %v749_v36  ;;  %v7969_v36 = vsel %vm448_vm2, %v626_v35, %v628_v25 }
  0xef   : > { %10880 = vst [vmem:[#allocation11_spill] sm:$0xff] %v7927_v10  ;;  %v373_v22 = vadd.f32 %v7911_v40, %v372_v30  ;;  %1319 = vperm.xlu0 %6999, %v7732_v27   ;;  %6994 = vset.pattern.permute.xlu1 %v10882_v43  ;;  %v688_v43 = vrot.slane %v7808_v52, 4  ;;  %10885 = vst [vmem:[#allocation14_spill] sm:$0xff] %v7969_v36 }
  0xf0   : > { %v6863_v14 = vpop.f32.mrf.mxu0  ;;  %1179 = vperm.xlu1 %6994, %v7738_v28   ;;  %v7963_v52 = vsel %vm448_vm2, %v622_v0, %v624_v51  ;;  %v7966_v55 = vsel %vm448_vm2, %v624_v51, %v626_v35  ;;  %v2316_v51 = vrot.slane %v716_v56, 2  ;;  %v786_v25 = vpack.c.bf16 %v777_v4, %v776_v45 }
  0xf1   : > { %v420_v30 = vrot.slane %v373_v22, 2  ;;  %v7947_v10 = vpop.permute.xlu1 %798  ;;  %v7955_v14 = vsel %vm448_vm2, %v620_v29, %v622_v0  ;;  %v685_v29 = vsel %vm680_vm3, %v10886_v58, %v684_v21  ;;  %v7983_v35 = vsel %vm680_vm3, %v686_v32, %v688_v43 }
  0xf2   : > { %10883 = vst [vmem:[#allocation12_spill] sm:$0xff] %v7947_v10  ;;  %v375_v49 = vpop.f32.mrf.mxu0  ;;  %v7987_v50 = vsel %vm680_vm3, %v688_v43, %v690_v62  ;;  %v694_v58 = vrot.slane %v7830_v60, 4 }
  0xf3   : > { %v376_v53 = vadd.f32 %v7911_v40, %v375_v49  ;;  %1328 = vperm.xlu0 %6999, %v7748_v31   ;;  %v7960_v33 = vpop.permute.xlu0 %865  ;;  %v7977_v17 = vsel %vm419_vm5, 0.0, %v420_v30  ;;  %v687_v49 = vsel %vm680_vm3, %v684_v21, %v686_v32 }
  0xf4   : > { %10884 = vst [vmem:[#allocation13_spill] sm:$0xff] %v7960_v33  ;;  %v6864_v63 = vpop.f32.mrf.mxu0  ;;  %1185 = vperm.xlu1 %6994, %v7678_v8   ;;  %v709_v4 = vmul.f32 %v685_v29, %v7977_v17  ;;  %v641_v43 = vmul.f32 %v617_v44, %v7977_v17  ;;  %v2332_v33 = vshrl.u32 %v786_v25, 16  ;;  %v752_v29 = vrot.slane %v7845_v7, 3 }
  0xf5   : > { %v421_v0 = vrot.slane %v376_v53, 2  ;;  %v7979_v22 = vpop.permute.xlu1 %801  ;;  %v10852_v7 = vrot.slane %v7833_v61, 3 }
  0xf6   : > { %v380_v63 = vpop.f32.mrf.mxu0 }
  0xf7   : > { %v7991_v53 = vsel %vm419_vm5, %v420_v30, %v421_v0  ;;  %v381_v56 = vadd.f32 %v7911_v40, %v380_v63  ;;  %1334 = vperm.xlu0 %6999, %v7759_v34   ;;  %v7995_v21 = vpop.permute.xlu0 %877  ;;  %v8003_v30 = vsel %vm680_vm3, %v690_v62, %v692_v37  ;;  %v2335_v62 = vshll.u32 %v786_v25, 16 }
  0xf8   : > { %10887 = vst [vmem:[#allocation15_spill] sm:$0xff] %v7995_v21  ;;  %v6867_v32 = vpop.f32.mrf.mxu0  ;;  %1188 = vperm.xlu1 %6994, %v7692_v6   ;;  %v710_v57 = vmul.f32 %v687_v49, %v7991_v53  ;;  %v642_v60 = vmul.f32 %v619_v46, %v7991_v53  ;;  %v574_v21 = vmul.f32 %v7884_v24, %v7977_v17 }
  0xf9   : > { %v423_v45 = vrot.slane %v381_v56, 2  ;;  %v8005_v63 = vpop.permute.xlu1 %807  ;;  %v575_v32 = vmul.f32 %v7896_v20, %v7991_v53  ;;  %v8013_v46 = vsel %vm680_vm3, %v692_v37, %v694_v58  ;;  %v754_v20 = vrot.slane %v7852_v11, 3 }
  0xfa   : > { %10888 = vst [vmem:[#allocation16_spill] sm:$0xff] %v8005_v63  ;;  %v383_v49 = vpop.f32.mrf.mxu0  ;;  %v717_v10 = vpack.c.bf16 %v710_v57, %v709_v4  ;;  %v649_v44 = vpack.c.bf16 %v642_v60, %v641_v43  ;;  %v8031_v25 = vsel %vm680_vm3, %v694_v58, %v696_v54  ;;  %v10889_v60 = vrot.slane %v7827_v59, 3 }
  0xfb   : > { %v8016_v56 = vadd.f32 %v7911_v40, %v383_v49  ;;  %1340 = vperm.xlu0 %6999, %v7716_v23   ;;  %v8019_v63 = vpack.c.bf16 %v575_v32, %v574_v21  ;;  %v8021_v24 = vpop.permute.xlu0 %885  ;;  %v8034_v57 = vsel %vm419_vm5, %v421_v0, %v423_v45  ;;  %v8055_v49 = vrot.slane %v2335_v62, 3 }
  0xfc   : > { %v6868_v36 = vpop.f32.mrf.mxu0  ;;  %1194 = vperm.xlu1 %6994, %v7706_v9   ;;  %v8026_v4 = vrot.slane %v717_v10, 2  ;;  %v8028_v37 = vrot.slane %v649_v44, 1  ;;  %v8043_v10 = vrot.slane %v2332_v33, 2  ;;  %v8048_v54 = vsel %vm748_vm4, %v10889_v60, %v752_v29 }
  0xfd   : > { %v425_v21 = vrot.slane %v8016_v56, 2  ;;  %v8037_v43 = vpop.permute.xlu1 %813  ;;  %v2254_v11 = vshll.u32 %v8019_v63, 16  ;;  %v7091_v36 = vld [vmem:[%s10840_s4 + $0x1b8] sm:$0xff]   ;;  %v10851_v59 = vmov 14   ;;  %v10856_v62 = vrot.slane %v7848_v13, 3 }
  0xfe   : > { %v388_v58 = vpop.f32.mrf.mxu0  ;;  %v2318_v0 = vsel %vm419_vm5, %v2316_v51, %v8026_v4  ;;  %v2298_v32 = vsel %vm1411_vm6, %v7939_v5, %v8028_v37  ;;  %v7093_v51 = vld [vmem:[%s10840_s4 + $0x1f0] sm:$0xff]   ;;  %v8070_v5 = vsel %vm748_vm4, %v752_v29, %v754_v20 }
  0xff   : > { %v8058_v44 = vsel %vm419_vm5, %v423_v45, %v425_v21  ;;  %v8061_v33 = vadd.f32 %v7911_v40, %v388_v58  ;;  %7001 = vset.pattern.permute.xlu0 %v10851_v59  ;;  %4964 = vmatprep.mubr.bf16.mxu0 %v2318_v0  ;;  %v2256_v56 = vrot.slane %v2254_v11, 1  ;;  %v8064_v60 = vpop.permute.xlu0 %893  ;;  %v8075_v45 = vsel %vm748_vm4, %v754_v20, %v10852_v7  ;;  %v7087_v0 = vld [vmem:[%s10840_s4 + $0x138] sm:$0xff]  }
 0x100   : > { %10890 = vst [vmem:[#allocation17_spill] sm:$0xff] %v8064_v60  ;;  %1388 = vperm.xlu0 %7001, %v7732_v27   ;;  %v6871_v58 = vpop.f32.mrf.mxu0  ;;  %4965 = vmatmul.mubr.bf16.vlgmr.msra.gmra.mxu0 %v2298_v32  ;;  %v711_v11 = vmul.f32 %v7983_v35, %v8034_v57  ;;  %v712_v59 = vmul.f32 %v7987_v50, %v8058_v44  ;;  %v7088_v35 = vld [vmem:[%s10840_s4 + $0x170] sm:$0xff]  }
 0x101   : > { %v427_v29 = vrot.slane %v8061_v33, 2  ;;  %1200 = vperm.xlu1 %6994, %v7722_v12   ;;  %v2257_v20 = vsel %vm2245_vm7, %v7929_v19, %v2256_v56  ;;  %v644_v32 = vmul.f32 %v7955_v14, %v8058_v44  ;;  %6373 = vmatpush3.bf16.msra.mxu0 %v7091_v36  ;;  %v643_v12 = vmul.f32 %v7952_v48, %v8034_v57  ;;  %v7095_v36 = vld [vmem:[%s10840_s4 + $0x1b0] sm:$0xff]  }
 0x102   : > { %4892 = vmatprep.mubr.bf16.mxu1 %v2257_v20  ;;  %v391_v58 = vpop.f32.mrf.mxu0  ;;  %v8095_v7 = vpop.permute.xlu1 %861  ;;  %v576_v19 = vmul.f32 %v7903_v39, %v8034_v57  ;;  %v577_v50 = vmul.f32 %v7906_v41, %v8058_v44  ;;  %v8105_v14 = vmul.f32 %v7684_v1, %v7991_v53  ;;  %v10891_v48 = vpack.c.bf16 %v7863_v47, %v7860_v38  ;;  %v7097_v1 = vld [vmem:[%s10840_s4 + $0x1e8] sm:$0xff]  }
 0x103   : > { %v8112_v20 = vadd.f32 %v7911_v40, %v391_v58  ;;  %v718_v39 = vpack.c.bf16 %v712_v59, %v711_v11  ;;  %6374 = vmatprep.subr.bf16.mxu0 %v7093_v51  ;;  %v650_v58 = vpack.c.bf16 %v644_v32, %v643_v12  ;;  %v506_v38 = vmul.f32 %v7670_v16, %v7977_v17  ;;  %v7090_v32 = vld [vmem:[%s10840_s4 + $0x130] sm:$0xff]  }
 0x104   : > { %4893 = vmatmul.mubr.bf16.vlgmr.msra.gmra.mxu1 %v10891_v48  ;;  %1397 = vperm.xlu0 %7001, %v7748_v31   ;;  %v6872_v33 = vpop.f32.mrf.mxu0  ;;  %v8124_v60 = vpack.c.bf16 %v577_v50, %v576_v19  ;;  %v8128_v47 = vpop.permute.xlu0 %914  ;;  %v8131_v59 = vsel %vm419_vm5, %v425_v21, %v427_v29  ;;  %v10892_v11 = vmov 12   ;;  %v10893_v16 = vrot.slane %v7866_v2, 3 }
 0x105   : > { %6327 = vmatpush3.bf16.msra.mxu1 %v7087_v0  ;;  %v429_v51 = vrot.slane %v8112_v20, 2  ;;  %6996 = vset.pattern.permute.xlu1 %v10892_v11  ;;  %v8135_v48 = vrot.slane %v718_v39, 2  ;;  %v2258_v33 = vshrl.u32 %v8019_v63, 16  ;;  %v10894_v0 = vrot.slane %v7833_v61, 3  ;;  %v7092_v20 = vld [vmem:[%s10840_s4 + $0x168] sm:$0xff]  }
 0x106   : > { %6328 = vmatprep.subr.bf16.mxu1 %v7088_v35  ;;  %1247 = vperm.xlu1 %6996, %v7738_v28   ;;  %v396_v12 = vpop.f32.mrf.mxu0  ;;  %v8149_v19 = vpop.permute.xlu1 %869  ;;  %v8151_v50 = vrot.slane %v650_v58, 1  ;;  %v2262_v63 = vshll.u32 %v8124_v60, 16  ;;  %v514_v35 = vpack.c.bf16 %v8105_v14, %v506_v38 }
 0x107   : > { %v8146_v21 = vsel %vm748_vm4, %v10894_v0, %v10893_v16  ;;  %6375 = vmatpush3.bf16.msra.mxu0 %v7095_v36  ;;  %v8159_v61 = vsel %vm419_vm5, %v427_v29, %v429_v51  ;;  %v8162_v39 = vadd.f32 %v7911_v40, %v396_v12  ;;  %v2320_v28 = vsel %vm419_vm5, %v8026_v4, %v8135_v48  ;;  %v7096_v0 = vld [vmem:[%s10840_s4 + $0x160] sm:$0xff]  }
 0x108   : > { %v2260_v58 = vor.u32 %v2258_v33, %v2256_v56  ;;  %6376 = vmatprep.subr.bf16.mxu0 %v7097_v1  ;;  %4972 = vmatprep.mubr.bf16.mxu0 %v2320_v28  ;;  %v6875_v14 = vpop.f32.mrf.mxu0  ;;  %v2300_v36 = vsel %vm1411_vm6, %v8028_v37, %v8151_v50  ;;  %v2264_v38 = vrot.slane %v2262_v63, 1  ;;  %v713_v29 = vmul.f32 %v8003_v30, %v8131_v59  ;;  %v8175_v16 = vpop.permute.xlu0 %923  ;;  %v7094_v30 = vld [vmem:[%s10840_s4 + $0x128] sm:$0xff]  }
 0x109   : > { %1403 = vperm.xlu0 %7001, %v7759_v34   ;;  %v714_v11 = vmul.f32 %v8013_v46, %v8159_v61  ;;  %v10853_v4 = vrot.slane %v8162_v39, 2  ;;  %4973 = vmatmul.mubr.bf16.gmra.mxu0 %v2300_v36  ;;  %v645_v34 = vmul.f32 %v7963_v52, %v8131_v59  ;;  %v646_v56 = vmul.f32 %v7966_v55, %v8159_v61  ;;  %v7099_v46 = vld [vmem:[%s10840_s4 + $0x1a8] sm:$0xff]  }
 0x10a   : > { %6329 = vmatpush3.bf16.msra.mxu1 %v7090_v32  ;;  %v579_v37 = vmul.f32 %v7920_v15, %v8159_v61  ;;  %v10854_v1 = vrot.slane %v7857_v26, 2  ;;  %v2265_v33 = vsel %vm2245_vm7, %v2260_v58, %v2264_v38  ;;  %1253 = vperm.xlu1 %6996, %v7678_v8   ;;  %v8193_v52 = vpop.f32.mrf.mxu0  ;;  %v8195_v55 = vpop.permute.xlu1 %873  ;;  %v578_v15 = vmul.f32 %v7914_v42, %v8131_v59 }
 0x10b   : > { %v719_v32 = vpack.c.bf16 %v714_v11, %v713_v29  ;;  %6330 = vmatprep.subr.bf16.mxu1 %v7092_v20  ;;  %v10895_v12 = vrot.slane %v7841_v3, 3  ;;  %v10896_v63 = vrot.slane %v7866_v2, 3  ;;  %v818_v8 = vrot.slane %v7917_v18, 2  ;;  %4900 = vmatprep.mubr.bf16.mxu1 %v2265_v33  ;;  %v10897_v20 = vld [vmem:[#allocation8_spill] sm:$0xff]  ;;  %v7101_v18 = vld [vmem:[%s10840_s4 + $0x1e0] sm:$0xff]  }
 0x10c   : > { %v8213_v58 = vsel %vm419_vm5, %v429_v51, %v10853_v4  ;;  %v651_v42 = vpack.c.bf16 %v646_v56, %v645_v34  ;;  %v762_v14 = vrot.slane %v10897_v20, 3  ;;  %4901 = vmatmul.mubr.bf16.gmra.mxu1 %v514_v35  ;;  %v584_v29 = vpack.c.bf16 %v579_v37, %v578_v15  ;;  %v8219_v11 = vpop.permute.xlu0 %929  ;;  %v6876_v51 = vpop.f32.mrf.mxu0  ;;  %v10898_v34 = vld [vmem:[#allocation3_spill] sm:$0xff]  ;;  %v10899_v35 = vld [vmem:[#allocation2_spill] sm:$0xff]  ;;  %6377 = vmatpush3.bf16.msra.mxu0 %v7099_v46 }
 0x10d   : > { %v8207_v28 = vsel %vm748_vm4, %v10896_v63, %v10895_v12  ;;  %1409 = vperm.xlu0 %7001, %v7716_v23   ;;  %v2321_v36 = vrot.slane %v719_v32, 2  ;;  %v715_v2 = vmul.f32 %v8031_v25, %v8213_v58  ;;  %v508_v56 = vmul.f32 %v10898_v34, %v8034_v57  ;;  %v10900_v37 = vld [vmem:[#allocation10_spill] sm:$0xff]  ;;  %6378 = vmatprep.subr.bf16.mxu0 %v7101_v18  ;;  %v10903_v4 = vld [vmem:[#allocation7_spill] sm:$0xff] }
 0x10e   : > { %v8224_v12 = vrot.slane %v651_v42, 1  ;;  %v509_v23 = vmul.f32 %v10899_v35, %v8058_v44  ;;  %6331 = vmatpush3.bf16.msra.mxu1 %v7094_v30  ;;  %v580_v33 = vmul.f32 %v10900_v37, %v8213_v58  ;;  %1256 = vperm.xlu1 %6996, %v7692_v6   ;;  %v8233_v25 = vpop.permute.xlu1 %881  ;;  %v2266_v15 = vshrl.u32 %v8124_v60, 16  ;;  %v8238_v20 = vpop.f32.mrf.mxu0  ;;  %v10901_v34 = vld [vmem:[#allocation14_spill] sm:$0xff] }
 0x10f   : > { %v2322_v32 = vsel %vm419_vm5, %v8135_v48, %v2321_v36  ;;  %v2270_v63 = vshll.u32 %v584_v29, 16  ;;  %v720_v42 = vpack.c.bf16 %v715_v2, %v715_v2  ;;  %6332 = vmatprep.subr.bf16.mxu1 %v7096_v0  ;;  %v820_v30 = vsel %vm419_vm5, %v818_v8, %v10854_v1  ;;  %v7103_v37 = vld [vmem:[%s10840_s4 + $0x1a0] sm:$0xff]  }
 0x110   : > { %v10857_v46 = vrot.slane %v7979_v22, 2  ;;  %4980 = vmatprep.mubr.bf16.mxu0 %v2322_v32  ;;  %v2302_v6 = vsel %vm1411_vm6, %v8151_v50, %v8224_v12  ;;  %v8247_v51 = vpack.c.bf16 %v580_v33, %v580_v33  ;;  %v10855_v48 = vmov 15   ;;  %v8257_v32 = vpop.permute.xlu0 %935  ;;  %v6879_v50 = vpop.f32.mrf.mxu0  ;;  %v10902_v33 = vld [vmem:[#allocation12_spill] sm:$0xff]  ;;  %v7098_v18 = vld [vmem:[%s10840_s4 + $0x120] sm:$0xff]   ;;  %6379 = vmatpush3.bf16.msra.mxu0 %v7103_v37 }
 0x111   : > { %7003 = vset.pattern.permute.xlu0 %v10855_v48  ;;  %v2268_v60 = vor.u32 %v2266_v15, %v2264_v38  ;;  %v2272_v0 = vrot.slane %v2270_v63, 1  ;;  %v8250_v2 = vrot.slane %v720_v42, 2  ;;  %v647_v35 = vmul.f32 %v10901_v34, %v8213_v58  ;;  %4981 = vmatmul.mubr.bf16.gmra.mxu0 %v2302_v6 }
 0x112   : > { %v821_v41 = vrot.slane %v10902_v33, 2  ;;  %1458 = vperm.xlu0 %7003, %v7732_v27   ;;  %v2274_v38 = vshrl.u32 %v584_v29, 16  ;;  %v2278_v15 = vshll.u32 %v8247_v51, 16  ;;  %v8266_v63 = vmul.f32 0.0, %v818_v8  ;;  %1262 = vperm.xlu1 %6996, %v7706_v9   ;;  %v8270_v50 = vpop.permute.xlu1 %889  ;;  %v407_v27 = vpop.f32.mrf.mxu0  ;;  %v7100_v8 = vld [vmem:[%s10840_s4 + $0x158] sm:$0xff]  }
 0x113   : > { %v2273_v42 = vsel %vm2245_vm7, %v2268_v60, %v2272_v0  ;;  %v515_v34 = vpack.c.bf16 %v509_v23, %v508_v56  ;;  %v2324_v6 = vsel %vm419_vm5, %v2321_v36, %v8250_v2  ;;  %v8274_v29 = vmul.f32 0.0, %v820_v30  ;;  %v7105_v9 = vld [vmem:[%s10840_s4 + $0x1d8] sm:$0xff]   ;;  %6333 = vmatpush3.bf16.msra.mxu1 %v7098_v18 }
 0x114   : > { %4908 = vmatprep.mubr.bf16.mxu1 %v2273_v42  ;;  %4988 = vmatprep.mubr.bf16.mxu0 %v2324_v6  ;;  %v2276_v33 = vor.u32 %v2274_v38, %v2272_v0  ;;  %v2280_v48 = vrot.slane %v2278_v15, 1  ;;  %v652_v1 = vpack.c.bf16 %v647_v35, %v647_v35  ;;  %v10904_v56 = vrot.slane %v7841_v3, 3  ;;  %v10905_v60 = vld [vmem:[#allocation9_spill] sm:$0xff]  ;;  %v6880_v35 = vpop.f32.mrf.mxu0  ;;  %v10907_v42 = vld [vmem:[#allocation16_spill] sm:$0xff] }
 0x115   : > { %v8290_v23 = vsel %vm748_vm4, %v762_v14, %v10856_v62  ;;  %v824_v30 = vsel %vm419_vm5, %v821_v41, %v10857_v46  ;;  %4909 = vmatmul.mubr.bf16.gmra.mxu1 %v515_v34  ;;  %v7107_v3 = vld [vmem:[%s10840_s4 + $0x198] sm:$0xff]   ;;  %v10906_v38 = vrot.slane %v7857_v26, 2  ;;  %v8307_v34 = vpop.permute.xlu0 %981  ;;  %v938_v37 = vrot.slane %v8128_v47, 7  ;;  %v10911_v35 = vld [vmem:[#allocation11_spill] sm:$0xff]  ;;  %6334 = vmatprep.subr.bf16.mxu1 %v7100_v8 }
 0x116   : > { %v8285_v36 = vsel %vm748_vm4, %v10904_v56, %v762_v14  ;;  %v827_v14 = vrot.slane %v10907_v42, 2  ;;  %1467 = vperm.xlu0 %7003, %v7748_v31   ;;  %v2281_v6 = vsel %vm2245_vm7, %v2276_v33, %v2280_v48  ;;  %v8305_v27 = vrot.slane %v652_v1, 1  ;;  %10908 = vst [vmem:[#allocation8_spill] sm:$0xff] %v8307_v34  ;;  %v8313_v26 = vld [vmem:[%s10837_s1 + $0x38] sm:$0xff]  ;;  %v10910_v33 = vld [vmem:[#allocation4_spill] sm:$0xff]  ;;  %6380 = vmatprep.subr.bf16.mxu0 %v7105_v9 }
 0x117   : > { %v822_v15 = vsel %vm419_vm5, %v10906_v38, %v821_v41  ;;  %4916 = vmatprep.mubr.bf16.mxu1 %v2281_v6  ;;  %1268 = vperm.xlu1 %6996, %v8313_v26   ;;  %v10909_v41 = vld [vmem:[#allocation5_spill] sm:$0xff]  ;;  %v511_v18 = vmul.f32 %v10910_v33, %v8159_v61  ;;  %v779_v1 = vmul.f32 %v8070_v5, %v7991_v53  ;;  %v912_v62 = vpop.permute.xlu1 %911  ;;  %v10913_v9 = vrot.slane %v10903_v4, 2 }
 0x118   : > { %v510_v31 = vmul.f32 %v10909_v41, %v8131_v59  ;;  %v8323_v56 = vmul.f32 %v824_v30, %v7991_v53  ;;  %v10912_v42 = vld [vmem:[#allocation13_spill] sm:$0xff]  ;;  %v855_v33 = vpack.c.bf16 %v8274_v29, %v8266_v63  ;;  %v847_v5 = vmul.f32 %v822_v15, %v7977_v17  ;;  %6381 = vmatpush3.bf16.msra.mxu0 %v7107_v3 }
 0x119   : > { %v8328_v6 = vmul.f32 %v10912_v42, %v7977_v17  ;;  %v7102_v41 = vld [vmem:[%s10840_s4 + $0x118] sm:$0xff]   ;;  %v937_v30 = vrot.slane %v912_v62, 7  ;;  %v2304_v38 = vsel %vm1411_vm6, %v8224_v12, %v8305_v27  ;;  %v7104_v42 = vld [vmem:[%s10840_s4 + $0x150] sm:$0xff]   ;;  %v778_v8 = vmul.f32 %v8048_v54, %v7977_v17  ;;  %v10914_v54 = vld [vmem:[#allocation6_spill] sm:$0xff]  ;;  %v8362_v3 = vpop.permute.xlu0 %990 }
 0x11a   : > { %v828_v0 = vsel %vm419_vm5, %v10913_v9, %v827_v14  ;;  %v8349_v63 = vadd.f32 %v7911_v40, %v8193_v52  ;;  %4989 = vmatmul.mubr.bf16.gmra.mxu0 %v2304_v38  ;;  %v8354_v62 = vld [vmem:[%s10837_s1 + $0x30] sm:$0xff]  ;;  %v2282_v12 = vshrl.u32 %v8247_v51, 16  ;;  %v8360_v29 = vmul.f32 %v10914_v54, %v8213_v58  ;;  %10915 = vst [vmem:[#allocation3_spill] sm:$0xff] %v8362_v3  ;;  %v8377_v3 = vld [vmem:[%s10837_s1] sm:$0xff] }
 0x11b   : > { %1473 = vperm.xlu0 %7003, %v8354_v62   ;;  %v939_v52 = vsel %vm545_vm1, %v937_v30, %v938_v37  ;;  %v963_v15 = vmul.f32 0.0, %v937_v30  ;;  %4996 = vmatprep.mubr.bf16.mxu0 %v8250_v2  ;;  %v10916_v38 = vmov 13   ;;  %v516_v9 = vpack.c.bf16 %v511_v18, %v510_v31  ;;  %v7109_v51 = vld [vmem:[%s10840_s4 + $0x1d0] sm:$0xff]   ;;  %v918_v30 = vpop.permute.xlu1 %917 }
 0x11c   : > { %6998 = vset.pattern.permute.xlu1 %v10916_v38  ;;  %v787_v46 = vpack.c.bf16 %v779_v1, %v778_v8  ;;  %v10860_v54 = vrot.slane %v8037_v43, 2  ;;  %v964_v34 = vmul.f32 %v939_v52, %v7977_v17  ;;  %v2284_v2 = vor.u32 %v2282_v12, %v2280_v48  ;;  %6335 = vmatpush3.bf16.msra.mxu1 %v7102_v41  ;;  %v7106_v31 = vld [vmem:[%s10840_s4 + $0x110] sm:$0xff]   ;;  %v7108_v48 = vld [vmem:[%s10840_s4 + $0x148] sm:$0xff]  }
 0x11d   : > { %1316 = vperm.xlu1 %6998, %v8377_v3   ;;  %v856_v18 = vpack.c.bf16 %v8323_v56, %v847_v5  ;;  %v10917_v1 = vrot.slane %v10903_v4, 2  ;;  %v10918_v8 = vrot.slane %v7979_v22, 2  ;;  %4917 = vmatmul.mubr.bf16.gmra.mxu1 %v516_v9  ;;  %v940_v38 = vrot.slane %v918_v30, 7  ;;  %v7111_v12 = vld [vmem:[%s10840_s4 + $0x190] sm:$0xff]  }
 0x11e   : > { %6336 = vmatprep.subr.bf16.mxu1 %v7104_v42  ;;  %v2386_v41 = vrot.slane %v855_v33, 3  ;;  %v781_v56 = vmul.f32 %v8146_v21, %v8058_v44  ;;  %v10919_v4 = vrot.slane %v10905_v60, 2  ;;  %v8401_v5 = vmul.f32 0.0, %v8095_v7  ;;  %4924 = vmatprep.mubr.bf16.mxu1 %v2284_v2  ;;  %v8409_v33 = vld [vmem:[%s10837_s1 + $0x40] sm:$0xf]  ;;  %v8412_v21 = vpop.permute.xlu0 %996  ;;  %v7113_v7 = vld [vmem:[%s10840_s4 + $0x1c8] sm:$0xff]  }
 0x11f   : > { %v826_v52 = vsel %vm419_vm5, %v10918_v8, %v10917_v1  ;;  %v10859_v42 = vrot.slane %v8349_v63, 2  ;;  %v8404_v9 = vpack.c.bf16 %v964_v34, %v963_v15  ;;  %1479 = vperm.xlu0 %7003, %v8409_v33   ;;  %6382 = vmatprep.subr.bf16.mxu0 %v7109_v51  ;;  %v2343_v30 = vshll.u32 %v787_v46, 16  ;;  %v8429_v51 = vld [vmem:[%s10837_s1 + $0x10] sm:$0xff]  ;;  %v7110_v60 = vld [vmem:[%s10840_s4 + $0x108] sm:$0xff]  }
 0x120   : > { %v830_v22 = vsel %vm419_vm5, %v827_v14, %v10919_v4  ;;  %v2340_v14 = vshrl.u32 %v787_v46, 16  ;;  %v850_v34 = vmul.f32 %v828_v0, %v8058_v44  ;;  %v780_v15 = vmul.f32 %v8075_v45, %v8034_v57  ;;  %6337 = vmatpush3.bf16.msra.mxu1 %v7106_v31  ;;  %v921_v46 = vpop.permute.xlu1 %920  ;;  %6383 = vmatpush3.bf16.msra.mxu0 %v7111_v12  ;;  %v7112_v31 = vld [vmem:[%s10840_s4 + $0x140] sm:$0xff]  }
 0x121   : > { %v10920_v2 = vmov %v10919_v4  ;;  %v944_v8 = vrot.slane %v8175_v16, 7  ;;  %1322 = vperm.xlu1 %6998, %v8429_v51   ;;  %v517_v45 = vpack.c.bf16 %v8360_v29, %v8360_v29  ;;  %v8437_v0 = vrot.slane %v856_v18, 3  ;;  %6338 = vmatprep.subr.bf16.mxu1 %v7108_v48 }
 0x122   : > { %v832_v1 = vsel %vm419_vm5, %v10920_v2, %v10860_v54  ;;  %v941_v16 = vsel %vm545_vm1, %v938_v37, %v940_v38  ;;  %v942_v4 = vrot.slane %v921_v46, 7  ;;  %v849_v29 = vmul.f32 %v826_v52, %v8034_v57  ;;  %4997 = vmatmul.mubr.bf16.gmra.mxu0 %v8305_v27  ;;  %v7115_v52 = vld [vmem:[%s10840_s4 + $0x188] sm:$0xff]   ;;  %6384 = vmatprep.subr.bf16.mxu0 %v7113_v7 }
 0x123   : > { %v8446_v2 = vpack.c.bf16 %v781_v56, %v780_v15  ;;  %v10921_v47 = vrot.slane %v8162_v39, 2  ;;  %v2403_v48 = vshll.u32 %v8404_v9, 16  ;;  %v948_v12 = vrot.slane %v8219_v11, 7  ;;  %v8464_v56 = vpop.permute.xlu0 %1002  ;;  %v7116_v11 = vld [vmem:[%s10840_s4 + $0x1c0] sm:$0xff]  }
 0x124   : > { %v10858_v46 = vmov 17   ;;  %10922 = vst [vmem:[#allocation2_spill] sm:$0xff] %v8464_v56  ;;  %v943_v39 = vsel %vm545_vm1, %v940_v38, %v942_v4  ;;  %v2342_v15 = vrot.slane %v2340_v14, 2  ;;  %v857_v27 = vpack.c.bf16 %v850_v34, %v849_v29  ;;  %v8477_v38 = vld [vmem:[%s10837_s1 + $0x18] sm:$0xff]  ;;  %6339 = vmatpush3.bf16.msra.mxu1 %v7110_v60  ;;  %v927_v14 = vpop.permute.xlu1 %926  ;;  %6385 = vmatpush3.bf16.msra.mxu0 %v7115_v52 }
 0x125   : > { %v8455_v37 = vsel %vm419_vm5, %v10921_v47, %v10859_v42  ;;  %7005 = vset.pattern.permute.xlu0 %v10858_v46  ;;  %v2345_v47 = vrot.slane %v2343_v30, 3  ;;  %v965_v46 = vmul.f32 %v941_v16, %v7991_v53  ;;  %v952_v42 = vrot.slane %v8257_v32, 7  ;;  %1325 = vperm.xlu1 %6998, %v8477_v38   ;;  %v7114_v30 = vld [vmem:[%s10840_s4 + $0x100] sm:$0xff]   ;;  %v7118_v60 = vld [vmem:[%s10840_s4 + $0x278] sm:$0xff]  }
 0x126   : > { %1589 = vperm.xlu0 %7005, %v8377_v3   ;;  %v966_v54 = vmul.f32 %v943_v39, %v8034_v57  ;;  %v2388_v7 = vsel %vm748_vm4, %v2386_v41, %v8437_v0  ;;  %v945_v32 = vsel %vm545_vm1, %v942_v4, %v944_v8  ;;  %4925 = vmatmul.mubr.bf16.gmra.mxu1 %v517_v45  ;;  %v946_v34 = vrot.slane %v927_v14, 7  ;;  %v7117_v41 = vld [vmem:[%s10840_s4 + $0x180] sm:$0xff]  }
 0x127   : > { %6340 = vmatprep.subr.bf16.mxu1 %v7112_v31  ;;  %v2349_v16 = vshrl.u32 %v8446_v2, 16  ;;  %v8488_v29 = vmul.f32 %v830_v22, %v8131_v59  ;;  %5036 = vmatprep.mubr.bf16.mxu1 %v2388_v7  ;;  %v2405_v4 = vrot.slane %v2403_v48, 1  ;;  %v2352_v45 = vshll.u32 %v8446_v2, 16  ;;  %v8506_v52 = vpop.permute.xlu0 %1048 }
 0x128   : > { %v973_v39 = vpack.c.bf16 %v966_v54, %v965_v46  ;;  %v8498_v31 = vmul.f32 %v832_v1, %v8159_v61  ;;  %v947_v22 = vsel %vm545_vm1, %v944_v8, %v946_v34  ;;  %v8502_v14 = vor.u32 %v2345_v47, %v2342_v15  ;;  %6386 = vmatprep.subr.bf16.mxu0 %v7116_v11  ;;  %v8516_v8 = vld [vmem:[%s10837_s1 + $0x28] sm:$0xff]  ;;  %v933_v46 = vpop.permute.xlu1 %932 }
 0x129   : > { %v8504_v7 = vrot.slane %v857_v27, 3  ;;  %v783_v54 = vmul.f32 %v8285_v36, %v8159_v61  ;;  %v2401_v48 = vshrl.u32 %v8404_v9, 16  ;;  %v967_v2 = vmul.f32 %v945_v32, %v8058_v44  ;;  %1331 = vperm.xlu1 %6998, %v8516_v8   ;;  %6341 = vmatpush3.bf16.msra.mxu1 %v7114_v30 }
 0x12a   : > { %1598 = vperm.xlu0 %7005, %v8477_v38   ;;  %v968_v1 = vmul.f32 %v947_v22, %v8131_v59  ;;  %v2408_v15 = vshll.u32 %v973_v39, 16  ;;  %v949_v47 = vsel %vm545_vm1, %v946_v34, %v948_v12  ;;  %v950_v11 = vrot.slane %v933_v46, 7  ;;  %6418 = vmatprep.subr.bf16.mxu1 %v7118_v60 }
 0x12b   : > { %v2351_v36 = vrot.slane %v2349_v16, 2  ;;  %v782_v9 = vmul.f32 %v8207_v28, %v8131_v59  ;;  %6387 = vmatpush3.bf16.msra.mxu0 %v7117_v41  ;;  %v2406_v27 = vor.u32 %v2405_v4, %v2401_v48  ;;  %v2354_v18 = vrot.slane %v2352_v45, 3  ;;  %v8529_v34 = vpop.permute.xlu0 %1057  ;;  %v7119_v28 = vld [vmem:[%s10840_s4 + $0x238] sm:$0xff]  }
 0x12c   : > { %v2410_v32 = vrot.slane %v2408_v15, 1  ;;  %v8522_v22 = vpack.c.bf16 %v968_v1, %v967_v2  ;;  %v951_v56 = vsel %vm545_vm1, %v948_v12, %v950_v11  ;;  %v2390_v30 = vsel %vm748_vm4, %v8437_v0, %v8504_v7 }
 0x12d   : > { %v789_v16 = vpack.c.bf16 %v783_v54, %v782_v9  ;;  %v8536_v60 = vadd.f32 %v7911_v40, %v8238_v20  ;;  %v969_v41 = vmul.f32 %v949_v47, %v8159_v61  ;;  %v970_v12 = vmul.f32 %v951_v56, %v8213_v58  ;;  %1337 = vperm.xlu1 %6998, %v8313_v26   ;;  %v7120_v54 = vld [vmem:[%s10840_s4 + $0x270] sm:$0xff]   ;;  %v8551_v20 = vpop.permute.xlu1 %978  ;;  %v7122_v9 = vld [vmem:[%s10840_s4 + $0x268] sm:$0xff]  }
 0x12e   : > { %1604 = vperm.xlu0 %7005, %v8516_v8   ;;  %v10923_v4 = vor.u32 %v8055_v49, %v8043_v10  ;;  %v2411_v45 = vsel %vm2245_vm7, %v2406_v27, %v2410_v32  ;;  %v953_v40 = vsel %vm545_vm1, %v950_v11, %v952_v42  ;;  %v2412_v56 = vshrl.u32 %v973_v39, 16  ;;  %v7134_v49 = vld [vmem:[%s10840_s4 + $0x2f8] sm:$0xff]  }
 0x12f   : > { %5108 = vmatprep.mubr.bf16.mxu0 %v2411_v45  ;;  %v2416_v48 = vshll.u32 %v8522_v22, 16  ;;  %v858_v10 = vpack.c.bf16 %v8498_v31, %v8488_v29  ;;  %v899_v2 = vmul.f32 %v8195_v55, %v8034_v57  ;;  %v10924_v42 = vpack.c.bf16 %v8328_v6, %v8401_v5  ;;  %v7135_v29 = vld [vmem:[%s10840_s4 + $0x2b8] sm:$0xff]   ;;  %v8572_v15 = vpop.permute.xlu0 %1063  ;;  %v7121_v6 = vld [vmem:[%s10840_s4 + $0x230] sm:$0xff]   ;;  %6464 = vmatprep.subr.bf16.mxu0 %v7134_v49 }
 0x130   : > { %v2347_v0 = vsel %vm2330_vm8, %v10923_v4, %v8502_v14  ;;  %v8564_v1 = vor.u32 %v2354_v18, %v2351_v36  ;;  %v8566_v39 = vpack.c.bf16 %v970_v12, %v969_v41  ;;  %v2414_v31 = vor.u32 %v2412_v56, %v2410_v32 }
 0x131   : > { %5037 = vmatmul.mubr.bf16.vlgmr.msra.gmra.mxu1 %v2347_v0  ;;  %5109 = vmatmul.mubr.bf16.vlgmr.msra.gmra.mxu0 %v10924_v42  ;;  %v2418_v46 = vrot.slane %v2416_v48, 1  ;;  %v2358_v55 = vshrl.u32 %v789_v16, 16  ;;  %v2361_v47 = vshll.u32 %v789_v16, 16  ;;  %v898_v5 = vmul.f32 %v8149_v19, %v7991_v53  ;;  %v8594_v16 = vpop.permute.xlu1 %984 }
 0x132   : > { %5044 = vmatprep.mubr.bf16.mxu1 %v2390_v30  ;;  %1610 = vperm.xlu0 %7005, %v8313_v26   ;;  %v971_v18 = vmul.f32 %v953_v40, %v8455_v37  ;;  %v10925_v11 = vmov 14   ;;  %v2424_v36 = vshll.u32 %v8566_v39, 16  ;;  %v10926_v27 = vrot.slane %v7848_v13, 3 }
 0x133   : > { %6419 = vmatpush3.bf16.msra.mxu1 %v7119_v28  ;;  %7000 = vset.pattern.permute.xlu1 %v10925_v11  ;;  %v10927_v30 = vrot.slane %v10911_v35, 2  ;;  %v10928_v28 = vrot.slane %v8037_v43, 2  ;;  %v2419_v41 = vsel %vm2245_vm7, %v2414_v31, %v2418_v46  ;;  %v8597_v12 = vrot.slane %v858_v10, 3  ;;  %v8610_v49 = vpop.permute.xlu0 %1069 }
 0x134   : > { %6420 = vmatprep.subr.bf16.mxu1 %v7120_v54  ;;  %v785_v32 = vmul.f32 %v10926_v27, %v8455_v37  ;;  %1385 = vperm.xlu1 %7000, %v8377_v3   ;;  %v906_v13 = vpack.c.bf16 %v899_v2, %v898_v5  ;;  %v2420_v45 = vshrl.u32 %v8522_v22, 16  ;;  %v2426_v43 = vrot.slane %v2424_v36, 1  ;;  %v7123_v22 = vld [vmem:[%s10840_s4 + $0x228] sm:$0xff]   ;;  %v7137_v5 = vld [vmem:[%s10840_s4 + $0x2b0] sm:$0xff]  }
 0x135   : > { %v834_v19 = vsel %vm419_vm5, %v10928_v28, %v10927_v30  ;;  %v10929_v4 = vmov %v10927_v30  ;;  %5116 = vmatprep.mubr.bf16.mxu0 %v2419_v41  ;;  %v784_v54 = vmul.f32 %v8290_v23, %v8213_v58  ;;  %6465 = vmatpush3.bf16.msra.mxu0 %v7135_v29  ;;  %v7351_v40 = vmov 16   ;;  %v8620_v2 = vld [vmem:[%s10837_s1 + $0x8] sm:$0xff]  ;;  %v7124_v29 = vld [vmem:[%s10840_s4 + $0x260] sm:$0xff]  }
 0x136   : > { %v854_v0 = vmul.f32 %v10929_v4, %v8455_v37  ;;  %7007 = vset.pattern.permute.xlu0 %v7351_v40  ;;  %v2356_v56 = vsel %vm2330_vm8, %v8502_v14, %v8564_v1  ;;  %v2360_v48 = vrot.slane %v2358_v55, 2  ;;  %v2363_v35 = vrot.slane %v2361_v47, 3  ;;  %v8630_v55 = vpop.permute.xlu1 %987  ;;  %v7138_v27 = vld [vmem:[%s10840_s4 + $0x2e8] sm:$0xff]   ;;  %v7126_v4 = vld [vmem:[%s10840_s4 + $0x258] sm:$0xff]  }
 0x137   : > { %v853_v10 = vmul.f32 %v834_v19, %v8213_v58  ;;  %6421 = vmatpush3.bf16.msra.mxu1 %v7121_v6  ;;  %v8615_v23 = vpack.c.bf16 %v971_v18, %v971_v18  ;;  %1525 = vperm.xlu0 %7007, %v8620_v2   ;;  %v2422_v14 = vor.u32 %v2420_v45, %v2418_v46  ;;  %v7136_v46 = vld [vmem:[%s10840_s4 + $0x2f0] sm:$0xff]   ;;  %v10930_v18 = vld [vmem:[#allocation15_spill] sm:$0xff]  ;;  %v8657_v28 = vpop.permute.xlu0 %1115 }
 0x138   : > { %6422 = vmatprep.subr.bf16.mxu1 %v7122_v9  ;;  %v790_v42 = vpack.c.bf16 %v785_v32, %v784_v54  ;;  %v2392_v31 = vsel %vm748_vm4, %v8504_v7, %v8597_v12  ;;  %1391 = vperm.xlu1 %7000, %v8429_v51   ;;  %v900_v7 = vmul.f32 %v10930_v18, %v8058_v44  ;;  %v7125_v9 = vld [vmem:[%s10840_s4 + $0x220] sm:$0xff]   ;;  %v7127_v54 = vld [vmem:[%s10840_s4 + $0x218] sm:$0xff]  }
 0x139   : > { %5045 = vmatmul.mubr.bf16.gmra.mxu1 %v2356_v56  ;;  %v859_v47 = vpack.c.bf16 %v854_v0, %v853_v10  ;;  %5117 = vmatmul.mubr.bf16.gmra.mxu0 %v906_v13  ;;  %v2427_v6 = vsel %vm2245_vm7, %v2422_v14, %v2426_v43  ;;  %v901_v11 = vmul.f32 %v8233_v25, %v8131_v59  ;;  %v8652_v32 = vld [vmem:[%s10837_s1 + $0x20] sm:$0xff]  ;;  %v2428_v25 = vshrl.u32 %v8566_v39, 16 }
 0x13a   : > { %5052 = vmatprep.mubr.bf16.mxu1 %v2392_v31  ;;  %5124 = vmatprep.mubr.bf16.mxu0 %v2427_v6  ;;  %v2364_v36 = vor.u32 %v2363_v35, %v2360_v48  ;;  %v2432_v30 = vshll.u32 %v8615_v23, 16  ;;  %v2367_v19 = vshrl.u32 %v790_v42, 16  ;;  %v2370_v41 = vshll.u32 %v790_v42, 16  ;;  %v8663_v0 = vpop.permute.xlu1 %993  ;;  %v7140_v31 = vld [vmem:[%s10840_s4 + $0x2e0] sm:$0xff]   ;;  %v7130_v6 = vld [vmem:[%s10840_s4 + $0x248] sm:$0xff]  }
 0x13b   : > { %6423 = vmatpush3.bf16.msra.mxu1 %v7123_v22  ;;  %1534 = vperm.xlu0 %7007, %v8652_v32   ;;  %v2393_v13 = vrot.slane %v859_v47, 3  ;;  %v2430_v45 = vor.u32 %v2428_v25, %v2426_v43  ;;  %v907_v39 = vpack.c.bf16 %v901_v11, %v900_v7  ;;  %v8671_v22 = vpop.permute.xlu0 %1124  ;;  %v7128_v43 = vld [vmem:[%s10840_s4 + $0x250] sm:$0xff]   ;;  %v903_v18 = vmul.f32 %v8270_v50, %v8213_v58 }
 0x13c   : > { %6424 = vmatprep.subr.bf16.mxu1 %v7124_v29  ;;  %1394 = vperm.xlu1 %7000, %v8477_v38   ;;  %v2365_v56 = vsel %vm2330_vm8, %v8564_v1, %v2364_v36  ;;  %v2434_v48 = vrot.slane %v2432_v30, 1  ;;  %v2369_v35 = vrot.slane %v2367_v19, 2  ;;  %v2372_v10 = vrot.slane %v2370_v41, 3  ;;  %v7139_v1 = vld [vmem:[%s10840_s4 + $0x2a8] sm:$0xff]   ;;  %v10931_v41 = vld [vmem:[#allocation8_spill] sm:$0xff] }
 0x13d   : > { %6466 = vmatprep.subr.bf16.mxu0 %v7136_v46  ;;  %v2394_v14 = vsel %vm748_vm4, %v8597_v12, %v2393_v13  ;;  %v7129_v12 = vld [vmem:[%s10840_s4 + $0x210] sm:$0xff]   ;;  %v1072_v7 = vrot.slane %v8506_v52, 7  ;;  %v7352_v30 = vmov 18   ;;  %v7131_v52 = vld [vmem:[%s10840_s4 + $0x208] sm:$0xff]  }
 0x13e   : > { %6467 = vmatpush3.bf16.msra.mxu0 %v7137_v5  ;;  %v8679_v42 = vpop.permute.xlu1 %999  ;;  %v2435_v29 = vsel %vm2245_vm7, %v2430_v45, %v2434_v48  ;;  %v8692_v47 = vor.u32 %v2372_v10, %v2369_v35  ;;  %v902_v5 = vmul.f32 %v8021_v24, %v8159_v61  ;;  %v2436_v24 = vshrl.u32 %v8615_v23, 16  ;;  %v7132_v23 = vld [vmem:[%s10840_s4 + $0x240] sm:$0xff]  }
 0x13f   : > { %6425 = vmatpush3.bf16.msra.mxu1 %v7125_v9  ;;  %6468 = vmatprep.subr.bf16.mxu0 %v7138_v27  ;;  %v8694_v46 = vpop.permute.xlu0 %1130  ;;  %v1009_v27 = vrot.slane %v8630_v55, 6  ;;  %v1007_v35 = vrot.slane %v8594_v16, 6 }
 0x140   : > { %1540 = vperm.xlu0 %7007, %v8354_v62   ;;  %6426 = vmatprep.subr.bf16.mxu1 %v7126_v4  ;;  %v2374_v25 = vsel %vm2330_vm8, %v2364_v36, %v8692_v47  ;;  %v908_v19 = vpack.c.bf16 %v903_v18, %v902_v5  ;;  %v1005_v4 = vrot.slane %v10931_v41, 6  ;;  %v10932_v36 = vmov 15  }
 0x141   : > { %5053 = vmatmul.mubr.bf16.gmra.mxu1 %v2365_v56  ;;  %1400 = vperm.xlu1 %7000, %v8516_v8   ;;  %v1004_v56 = vrot.slane %v8551_v20, 6  ;;  %v1010_v16 = vsel %vm448_vm2, %v1007_v35, %v1009_v27 }
 0x142   : > { %5060 = vmatprep.mubr.bf16.mxu1 %v2394_v14  ;;  %5125 = vmatmul.mubr.bf16.gmra.mxu0 %v907_v39  ;;  %v1046_v11 = vpop.permute.xlu1 %1045  ;;  %v2438_v14 = vor.u32 %v2436_v24, %v2434_v48  ;;  %v7133_v48 = vld [vmem:[%s10840_s4 + $0x200] sm:$0xff]   ;;  %v1008_v18 = vsel %vm448_vm2, %v1005_v4, %v1007_v35  ;;  %v7150_v24 = vld [vmem:[%s10840_s4 + $0x378] sm:$0xff]   ;;  %v1013_v35 = vrot.slane %v8663_v0, 6 }
 0x143   : > { %5132 = vmatprep.mubr.bf16.mxu0 %v2435_v29  ;;  %6427 = vmatpush3.bf16.msra.mxu1 %v7127_v54  ;;  %v1071_v9 = vrot.slane %v1046_v11, 7  ;;  %v8710_v50 = vpop.permute.xlu0 %1136  ;;  %v7141_v54 = vld [vmem:[%s10840_s4 + $0x2a0] sm:$0xff]   ;;  %v1006_v5 = vsel %vm448_vm2, %v1004_v56, %v1005_v4  ;;  %v7353_v11 = vmov 19  }
 0x144   : > { %1546 = vperm.xlu0 %7007, %v8409_v33   ;;  %6428 = vmatprep.subr.bf16.mxu1 %v7128_v43 }
 0x145   : > { %1406 = vperm.xlu1 %7000, %v8313_v26   ;;  %6469 = vmatpush3.bf16.msra.mxu0 %v7139_v1  ;;  %v1073_v45 = vsel %vm545_vm1, %v1071_v9, %v1072_v7  ;;  %v1097_v39 = vmul.f32 %v1071_v9, %v7977_v17  ;;  %v7142_v1 = vld [vmem:[%s10840_s4 + $0x2d8] sm:$0xff]  }
 0x146   : > { %6470 = vmatprep.subr.bf16.mxu0 %v7140_v31  ;;  %v1098_v10 = vmul.f32 %v1073_v45, %v7991_v53  ;;  %v1052_v43 = vpop.permute.xlu1 %1051  ;;  %v10933_v31 = vld [vmem:[#allocation17_spill] sm:$0xff] }
 0x147   : > { %6429 = vmatpush3.bf16.msra.mxu1 %v7129_v12  ;;  %v1074_v29 = vrot.slane %v1052_v43, 7  ;;  %v904_v20 = vmul.f32 %v10933_v31, %v8455_v37 }
 0x148   : > { %7011 = vset.pattern.permute.xlu0 %v7352_v30  ;;  %6430 = vmatprep.subr.bf16.mxu1 %v7130_v6  ;;  %v8743_v12 = vpop.permute.xlu0 %1182  ;;  %v7143_v6 = vld [vmem:[%s10840_s4 + $0x298] sm:$0xff]  }
 0x149   : > { %5061 = vmatmul.mubr.bf16.gmra.mxu1 %v2374_v25  ;;  %7002 = vset.pattern.permute.xlu1 %v10932_v36  ;;  %v7144_v25 = vld [vmem:[%s10840_s4 + $0x2d0] sm:$0xff]   ;;  %v1075_v41 = vsel %vm545_vm1, %v1072_v7, %v1074_v29  ;;  %v909_v45 = vpack.c.bf16 %v904_v20, %v904_v20  ;;  %v1082_v20 = vrot.slane %v8572_v15, 7 }
 0x14a   : > { %5068 = vmatprep.mubr.bf16.mxu1 %v2393_v13  ;;  %1662 = vperm.xlu0 %7011, %v8429_v51   ;;  %v8738_v13 = vpack.c.bf16 %v1098_v10, %v1097_v39  ;;  %v1055_v9 = vpop.permute.xlu1 %1054  ;;  %v1030_v39 = vmul.f32 0.0, %v1004_v56  ;;  %v7145_v56 = vld [vmem:[%s10840_s4 + $0x290] sm:$0xff]   ;;  %v10934_v10 = vld [vmem:[#allocation3_spill] sm:$0xff] }
 0x14b   : > { %1455 = vperm.xlu1 %7002, %v8377_v3   ;;  %5133 = vmatmul.mubr.bf16.gmra.mxu0 %v908_v19  ;;  %v1078_v19 = vrot.slane %v8529_v34, 7  ;;  %v1076_v4 = vrot.slane %v1055_v9, 7  ;;  %v1011_v43 = vrot.slane %v10934_v10, 6 }
 0x14c   : > { %5140 = vmatprep.mubr.bf16.mxu0 %v2438_v14  ;;  %6431 = vmatpush3.bf16.msra.mxu1 %v7131_v52  ;;  %v1033_v52 = vmul.f32 %v1010_v16, %v8034_v57  ;;  %v2466_v36 = vshll.u32 %v8738_v13, 16  ;;  %v8768_v7 = vpop.permute.xlu0 %1191  ;;  %v1099_v14 = vmul.f32 %v1075_v41, %v8034_v57  ;;  %v7147_v41 = vld [vmem:[%s10840_s4 + $0x288] sm:$0xff]  }
 0x14d   : > { %6432 = vmatprep.subr.bf16.mxu1 %v7132_v23  ;;  %6471 = vmatpush3.bf16.msra.mxu0 %v7141_v54  ;;  %v1031_v23 = vmul.f32 %v1006_v5, %v7977_v17  ;;  %v1032_v54 = vmul.f32 %v1008_v18, %v7991_v53  ;;  %v1077_v34 = vsel %vm545_vm1, %v1074_v29, %v1076_v4  ;;  %v7146_v29 = vld [vmem:[%s10840_s4 + $0x2c8] sm:$0xff]  }
 0x14e   : > { %7012 = vset.pattern.permute.xlu0 %v7353_v11  ;;  %6472 = vmatprep.subr.bf16.mxu0 %v7142_v1  ;;  %v1100_v1 = vmul.f32 %v1077_v34, %v8058_v44  ;;  %v1061_v31 = vpop.permute.xlu1 %1060  ;;  %v1079_v16 = vsel %vm545_vm1, %v1076_v4, %v1078_v19  ;;  %v2468_v18 = vrot.slane %v2466_v36, 1  ;;  %v2464_v4 = vshrl.u32 %v8738_v13, 16 }
 0x14f   : > { %1461 = vperm.xlu1 %7002, %v8429_v51   ;;  %1726 = vperm.xlu0 %7012, %v8620_v2   ;;  %v1039_v9 = vpack.c.bf16 %v1031_v23, %v1030_v39 }
 0x150   : > { %6433 = vmatpush3.bf16.msra.mxu1 %v7133_v48  ;;  %v1080_v48 = vrot.slane %v1061_v31, 7  ;;  %v1107_v5 = vpack.c.bf16 %v1100_v1, %v1099_v14  ;;  %v2469_v10 = vor.u32 %v2468_v18, %v2464_v4 }
 0x151   : > { %5069 = vmatmul.mubr.bf16.gmra.mxu1 %v8692_v47  ;;  %6473 = vmatpush3.bf16.msra.mxu0 %v7143_v6  ;;  %v1040_v47 = vpack.c.bf16 %v1033_v52, %v1032_v54  ;;  %v435_v6 = vrot.slane %v8536_v60, 2  ;;  %v8789_v52 = vpop.permute.xlu0 %1197  ;;  %v2449_v31 = vrot.slane %v1039_v9, 1  ;;  %v7166_v9 = vld [vmem:[%s10840_s4 + $0x3f8] sm:$0xff]   ;;  %v9223_v60 = vld [vmem:[%s10837_s1 + $0x20] sm:$0xff] }
 0x152   : > { %6474 = vmatprep.subr.bf16.mxu0 %v7144_v25  ;;  %6510 = vmatprep.subr.bf16.mxu1 %v7150_v24  ;;  %v1014_v25 = vsel %vm448_vm2, %v1011_v43, %v1013_v35  ;;  %v1086_v24 = vrot.slane %v8610_v49, 7  ;;  %v1081_v15 = vsel %vm545_vm1, %v1078_v19, %v1080_v48  ;;  %v1067_v36 = vpop.permute.xlu1 %1066  ;;  %v2471_v23 = vshll.u32 %v1107_v5, 16  ;;  %v7148_v49 = vld [vmem:[%s10840_s4 + $0x2c0] sm:$0xff]  }
 0x153   : > { %1464 = vperm.xlu1 %7002, %v8477_v38   ;;  %1735 = vperm.xlu0 %7012, %v8652_v32   ;;  %v1102_v39 = vmul.f32 %v1081_v15, %v8159_v61  ;;  %v1012_v19 = vsel %vm448_vm2, %v1009_v27, %v1011_v43  ;;  %v8803_v54 = vrot.slane %v1040_v47, 1  ;;  %v1083_v34 = vsel %vm545_vm1, %v1080_v48, %v1082_v20  ;;  %v7149_v43 = vld [vmem:[%s10840_s4 + $0x280] sm:$0xff]  }
 0x154   : > { %5141 = vmatmul.mubr.bf16.gmra.mxu0 %v909_v45  ;;  %v1101_v45 = vmul.f32 %v1079_v16, %v8131_v59  ;;  %v1084_v13 = vrot.slane %v1067_v36, 7  ;;  %v2473_v14 = vrot.slane %v2471_v23, 1  ;;  %v1034_v47 = vmul.f32 %v1012_v19, %v8058_v44 }
 0x155   : > { %6475 = vmatpush3.bf16.msra.mxu0 %v7145_v56  ;;  %v1035_v56 = vmul.f32 %v1014_v25, %v8131_v59  ;;  %v8811_v27 = vpop.permute.xlu0 %1203  ;;  %v1103_v16 = vmul.f32 %v1083_v34, %v8213_v58  ;;  %v1015_v25 = vrot.slane %v8412_v21, 6  ;;  %v10935_v15 = vrot.slane %v8349_v63, 2 }
 0x156   : > { %6476 = vmatprep.subr.bf16.mxu0 %v7146_v29  ;;  %v1108_v1 = vpack.c.bf16 %v1102_v39, %v1101_v45  ;;  %v1017_v29 = vrot.slane %v8679_v42, 6  ;;  %v1085_v55 = vsel %vm545_vm1, %v1082_v20, %v1084_v13  ;;  %v2474_v18 = vsel %vm2245_vm7, %v2469_v10, %v2473_v14  ;;  %v7151_v20 = vld [vmem:[%s10840_s4 + $0x338] sm:$0xff]   ;;  %v8836_v4 = vpop.permute.xlu1 %1112 }
 0x157   : > { %1470 = vperm.xlu1 %7002, %v8516_v8   ;;  %1744 = vperm.xlu0 %7012, %v8313_v26   ;;  %v1104_v48 = vmul.f32 %v1085_v55, %v8455_v37  ;;  %v2475_v45 = vshrl.u32 %v1107_v5, 16  ;;  %v1087_v36 = vsel %vm545_vm1, %v1084_v13, %v1086_v24  ;;  %v2451_v21 = vsel %vm1411_vm6, %v2449_v31, %v8803_v54  ;;  %v7152_v5 = vld [vmem:[%s10840_s4 + $0x370] sm:$0xff]  }
 0x158   : > { %v2479_v39 = vshll.u32 %v1108_v1, 16  ;;  %5180 = vmatprep.mubr.bf16.mxu1 %v2474_v18  ;;  %v1041_v23 = vpack.c.bf16 %v1035_v56, %v1034_v47  ;;  %v1018_v63 = vsel %vm448_vm2, %v1015_v25, %v1017_v29  ;;  %v7153_v13 = vld [vmem:[%s10840_s4 + $0x330] sm:$0xff]   ;;  %v1016_v56 = vsel %vm448_vm2, %v1013_v35, %v1015_v25 }
 0x159   : > { %6477 = vmatpush3.bf16.msra.mxu0 %v7147_v41  ;;  %v8832_v41 = vsel %vm419_vm5, %v10935_v15, %v435_v6  ;;  %5181 = vmatmul.mubr.bf16.vlgmr.msra.gmra.mxu1 %v2451_v21  ;;  %v8847_v34 = vpop.permute.xlu0 %1250  ;;  %v1037_v47 = vmul.f32 %v1018_v63, %v8213_v58  ;;  %v2483_v35 = vshrl.u32 %v1108_v1, 16  ;;  %v7156_v1 = vld [vmem:[%s10840_s4 + $0x360] sm:$0xff]  }
 0x15a   : > { %6478 = vmatprep.subr.bf16.mxu0 %v7148_v49  ;;  %v1109_v49 = vpack.c.bf16 %v1104_v48, %v1103_v16  ;;  %v2481_v19 = vrot.slane %v2479_v39, 1  ;;  %6511 = vmatpush3.bf16.msra.mxu1 %v7151_v20  ;;  %v1105_v10 = vmul.f32 %v1087_v36, %v8832_v41  ;;  %v8858_v31 = vpop.permute.xlu1 %1118  ;;  %v2452_v0 = vrot.slane %v1041_v23, 1  ;;  %v10936_v48 = vld [vmem:[#allocation2_spill] sm:$0xff] }
 0x15b   : > { %1476 = vperm.xlu1 %7002, %v8313_v26   ;;  %1747 = vperm.xlu0 %7012, %v8409_v33   ;;  %v2477_v26 = vor.u32 %v2475_v45, %v2473_v14  ;;  %v7354_v14 = vmov 21   ;;  %v1019_v18 = vrot.slane %v10936_v48, 6  ;;  %v1036_v20 = vmul.f32 %v1016_v56, %v8159_v61  ;;  %v7157_v63 = vld [vmem:[%s10840_s4 + $0x320] sm:$0xff]  }
 0x15c   : > { %v2487_v24 = vshll.u32 %v1109_v49, 16  ;;  %6512 = vmatprep.subr.bf16.mxu1 %v7152_v5  ;;  %v8872_v25 = vpack.c.bf16 %v1105_v10, %v1105_v10  ;;  %v2485_v45 = vor.u32 %v2483_v35, %v2481_v19  ;;  %v2453_v39 = vsel %vm1411_vm6, %v8803_v54, %v2452_v0  ;;  %v7158_v54 = vld [vmem:[%s10840_s4 + $0x358] sm:$0xff]   ;;  %v7161_v35 = vld [vmem:[%s10840_s4 + $0x310] sm:$0xff]  }
 0x15d   : > { %6479 = vmatpush3.bf16.msra.mxu0 %v7149_v43  ;;  %v2482_v55 = vsel %vm2245_vm7, %v2477_v26, %v2481_v19  ;;  %v7154_v43 = vld [vmem:[%s10840_s4 + $0x368] sm:$0xff]   ;;  %v1042_v36 = vpack.c.bf16 %v1037_v47, %v1036_v20  ;;  %v1020_v23 = vsel %vm448_vm2, %v1017_v29, %v1019_v18  ;;  %v2491_v19 = vshrl.u32 %v1109_v49, 16  ;;  %v7159_v49 = vld [vmem:[%s10840_s4 + $0x318] sm:$0xff]  }
 0x15e   : > { %6556 = vmatprep.subr.bf16.mxu0 %v7166_v9  ;;  %5188 = vmatprep.mubr.bf16.mxu1 %v2482_v55  ;;  %v2489_v16 = vrot.slane %v2487_v24, 1  ;;  %v7155_v9 = vld [vmem:[%s10840_s4 + $0x328] sm:$0xff]   ;;  %v8874_v15 = vpop.permute.xlu1 %1121  ;;  %v2495_v5 = vshll.u32 %v8872_v25, 16 }
 0x15f   : > { %7004 = vset.pattern.permute.xlu1 %v7351_v40  ;;  %7017 = vset.pattern.permute.xlu0 %v7354_v14  ;;  %v2454_v42 = vrot.slane %v1042_v36, 1 }
 0x160   : > { %1522 = vperm.xlu1 %7004, %v8377_v3   ;;  %1857 = vperm.xlu0 %7017, %v8377_v3   ;;  %v8876_v3 = vpop.permute.xlu0 %1259  ;;  %v2490_v21 = vsel %vm2245_vm7, %v2485_v45, %v2489_v16  ;;  %v2493_v24 = vor.u32 %v2491_v19, %v2489_v16  ;;  %v2497_v10 = vrot.slane %v2495_v5, 1  ;;  %v1207_v16 = vrot.slane %v8743_v12, 5 }
 0x161   : > { %6513 = vmatpush3.bf16.msra.mxu1 %v7153_v13  ;;  %v1038_v13 = vmul.f32 %v1020_v23, %v8455_v37  ;;  %v2455_v55 = vsel %vm1411_vm6, %v2452_v0, %v2454_v42  ;;  %v7355_v0 = vmov 20   ;;  %v1138_v45 = vrot.slane %v8836_v4, 6  ;;  %v7163_v23 = vld [vmem:[%s10840_s4 + $0x308] sm:$0xff]  }
 0x162   : > { %6514 = vmatprep.subr.bf16.mxu1 %v7154_v43  ;;  %5189 = vmatmul.mubr.bf16.gmra.mxu1 %v2453_v39  ;;  %v8892_v26 = vpop.permute.xlu1 %1127  ;;  %v2498_v43 = vsel %vm2245_vm7, %v2493_v24, %v2497_v10  ;;  %v1141_v4 = vrot.slane %v8858_v31, 6  ;;  %v1213_v31 = vrot.slane %v8768_v7, 5  ;;  %v8967_v7 = vld [vmem:[%s10837_s1 + $0x38] sm:$0xff] }
 0x163   : > { %5196 = vmatprep.mubr.bf16.mxu1 %v2490_v21  ;;  %v1043_v47 = vpack.c.bf16 %v1038_v13, %v1038_v13  ;;  %v2499_v21 = vshrl.u32 %v8872_v25, 16 }
 0x164   : > { %1528 = vperm.xlu1 %7004, %v8429_v51   ;;  %1866 = vperm.xlu0 %7017, %v8477_v38   ;;  %v8900_v29 = vpop.permute.xlu0 %1265 }
 0x165   : > { %6515 = vmatpush3.bf16.msra.mxu1 %v7155_v9  ;;  %v8928_v12 = vrot.slane %v1043_v47, 1  ;;  %v1139_v9 = vrot.slane %v8657_v28, 6  ;;  %v7164_v28 = vld [vmem:[%s10840_s4 + $0x340] sm:$0xff]  }
 0x166   : > { %6516 = vmatprep.subr.bf16.mxu1 %v7156_v1  ;;  %v8906_v56 = vpop.permute.xlu1 %1133  ;;  %v1143_v1 = vrot.slane %v8874_v15, 6 }
 0x167   : > { %v2457_v25 = vsel %vm1411_vm6, %v2454_v42, %v8928_v12  ;;  %v1140_v24 = vsel %vm448_vm2, %v1138_v45, %v1139_v9 }
 0x168   : > { %1531 = vperm.xlu1 %7004, %v8477_v38   ;;  %1872 = vperm.xlu0 %7017, %v8516_v8   ;;  %v7160_v38 = vld [vmem:[%s10840_s4 + $0x350] sm:$0xff]   ;;  %v8919_v48 = vpop.permute.xlu0 %1271  ;;  %v1144_v13 = vsel %vm448_vm2, %v1141_v4, %v1143_v1 }
 0x169   : > { %6517 = vmatpush3.bf16.msra.mxu1 %v7157_v63 }
 0x16a   : > { %6518 = vmatprep.subr.bf16.mxu1 %v7158_v54  ;;  %5197 = vmatmul.mubr.bf16.gmra.mxu1 %v2455_v55  ;;  %v2501_v54 = vor.u32 %v2499_v21, %v2497_v10  ;;  %v7182_v10 = vld [vmem:[%s10840_s4 + $0x478] sm:$0xff]   ;;  %v1165_v55 = vmul.f32 %v1140_v24, %v7991_v53 }
 0x16b   : > { %5204 = vmatprep.mubr.bf16.mxu1 %v2498_v43  ;;  %v1180_v18 = vpop.permute.xlu1 %1179  ;;  %v1142_v43 = vsel %vm448_vm2, %v1139_v9, %v1141_v4 }
 0x16c   : > { %1537 = vperm.xlu1 %7004, %v8516_v8   ;;  %1875 = vperm.xlu0 %7017, %v8354_v62   ;;  %v7162_v62 = vld [vmem:[%s10840_s4 + $0x348] sm:$0xff]   ;;  %v10937_v8 = vmov 17   ;;  %v1206_v20 = vrot.slane %v1180_v18, 5  ;;  %v8948_v5 = vpop.permute.xlu0 %1319  ;;  %v1147_v18 = vrot.slane %v8892_v26, 6  ;;  %v9054_v26 = vld [vmem:[%s10837_s1] sm:$0xff] }
 0x16d   : > { %6519 = vmatpush3.bf16.msra.mxu1 %v7159_v49 }
 0x16e   : > { %6520 = vmatprep.subr.bf16.mxu1 %v7160_v38  ;;  %v1208_v39 = vsel %vm1205_vm9, %v1206_v20, %v1207_v16  ;;  %v1232_v36 = vmul.f32 %v1206_v20, %v7977_v17  ;;  %v1164_v38 = vmul.f32 %v1138_v45, %v7977_v17 }
 0x16f   : > { %v1233_v63 = vmul.f32 %v1208_v39, %v7991_v53  ;;  %v1186_v19 = vpop.permute.xlu1 %1185  ;;  %v1166_v39 = vmul.f32 %v1142_v43, %v8034_v57  ;;  %v9004_v43 = vld [vmem:[%s10837_s1 + $0x40] sm:$0xf] }
 0x170   : > { %7006 = vset.pattern.permute.xlu1 %v10937_v8  ;;  %7019 = vset.pattern.permute.xlu0 %v7355_v0  ;;  %v1209_v15 = vrot.slane %v1186_v19, 5  ;;  %v1167_v8 = vmul.f32 %v1144_v13, %v8058_v44  ;;  %v8974_v45 = vpop.permute.xlu0 %1328 }
 0x171   : > { %1592 = vperm.xlu1 %7006, %v8620_v2   ;;  %1793 = vperm.xlu0 %7019, %v8620_v2   ;;  %v1241_v49 = vpack.c.bf16 %v1233_v63, %v1232_v36  ;;  %v1217_v63 = vrot.slane %v8789_v52, 5 }
 0x172   : > { %6521 = vmatpush3.bf16.msra.mxu1 %v7161_v35  ;;  %v1210_v47 = vsel %vm1205_vm9, %v1207_v16, %v1209_v15 }
 0x173   : > { %6522 = vmatprep.subr.bf16.mxu1 %v7162_v62  ;;  %5205 = vmatmul.mubr.bf16.gmra.mxu1 %v2457_v25  ;;  %v1189_v42 = vpop.permute.xlu1 %1188  ;;  %v1145_v62 = vrot.slane %v8671_v22, 6  ;;  %v2528_v20 = vshrl.u32 %v1241_v49, 16  ;;  %v2531_v9 = vshll.u32 %v1241_v49, 16  ;;  %v1234_v36 = vmul.f32 %v1210_v47, %v8034_v57 }
 0x174   : > { %5212 = vmatprep.mubr.bf16.mxu1 %v2501_v54  ;;  %v1211_v35 = vrot.slane %v1189_v42, 5  ;;  %v1173_v22 = vpack.c.bf16 %v1165_v55, %v1164_v38  ;;  %v1174_v54 = vpack.c.bf16 %v1167_v8, %v1166_v39  ;;  %v1151_v39 = vrot.slane %v8906_v56, 6  ;;  %v7167_v56 = vld [vmem:[%s10840_s4 + $0x3b8] sm:$0xff]  }
 0x175   : > { %1595 = vperm.xlu1 %7006, %v8429_v51   ;;  %1802 = vperm.xlu0 %7019, %v8652_v32   ;;  %v7165_v51 = vld [vmem:[%s10840_s4 + $0x300] sm:$0xff]   ;;  %v1146_v25 = vsel %vm448_vm2, %v1143_v1, %v1145_v62  ;;  %v1148_v52 = vsel %vm448_vm2, %v1145_v62, %v1147_v18  ;;  %v2530_v49 = vrot.slane %v2528_v20, 1 }
 0x176   : > { %6523 = vmatpush3.bf16.msra.mxu1 %v7163_v23  ;;  %v1212_v16 = vsel %vm1205_vm9, %v1209_v15, %v1211_v35  ;;  %v1214_v19 = vsel %vm1205_vm9, %v1211_v35, %v1213_v31  ;;  %v1221_v15 = vrot.slane %v8811_v27, 5  ;;  %v1168_v1 = vmul.f32 %v1146_v25, %v8131_v59 }
 0x177   : > { %6524 = vmatprep.subr.bf16.mxu1 %v7164_v28  ;;  %v1235_v21 = vmul.f32 %v1212_v16, %v8058_v44  ;;  %v1195_v23 = vpop.permute.xlu1 %1194  ;;  %v8984_v28 = vld [vmem:[%s10837_s1 + $0x30] sm:$0xff]  ;;  %v1236_v38 = vmul.f32 %v1214_v19, %v8131_v59  ;;  %v1169_v16 = vmul.f32 %v1148_v52, %v8159_v61  ;;  %v1149_v52 = vrot.slane %v8694_v46, 6 }
 0x178   : > { %v1215_v4 = vrot.slane %v1195_v23, 5  ;;  %v7168_v46 = vld [vmem:[%s10840_s4 + $0x3f0] sm:$0xff]  }
 0x179   : > { %1601 = vperm.xlu1 %7006, %v8652_v32   ;;  %1811 = vperm.xlu0 %7019, %v8967_v7   ;;  %v1242_v24 = vpack.c.bf16 %v1235_v21, %v1234_v36 }
 0x17a   : > { %6525 = vmatpush3.bf16.msra.mxu1 %v7165_v51  ;;  %v1216_v13 = vsel %vm1205_vm9, %v1213_v31, %v1215_v4  ;;  %v2533_v51 = vrot.slane %v2531_v9, 2  ;;  %v1218_v55 = vsel %vm1205_vm9, %v1215_v4, %v1217_v63  ;;  %v10866_v31 = vmov 22  }
 0x17b   : > { %6602 = vmatprep.subr.bf16.mxu1 %v7182_v10  ;;  %5213 = vmatmul.mubr.bf16.gmra.mxu1 %v8928_v12  ;;  %v2536_v42 = vshrl.u32 %v1242_v24, 16  ;;  %v2539_v27 = vshll.u32 %v1242_v24, 16  ;;  %v2512_v10 = vrot.slane %v1173_v22, 1  ;;  %v8999_v12 = vpop.permute.xlu0 %1334  ;;  %v9009_v9 = vrot.slane %v1174_v54, 1 }
 0x17c   : > { %v1201_v47 = vpop.permute.xlu1 %1200  ;;  %v2534_v36 = vor.u32 %v2533_v51, %v2530_v49  ;;  %v1238_v4 = vmul.f32 %v1218_v55, %v8213_v58  ;;  %v7169_v55 = vld [vmem:[%s10840_s4 + $0x3b0] sm:$0xff]  }
 0x17d   : > { %1607 = vperm.xlu1 %7006, %v8984_v28   ;;  %1814 = vperm.xlu0 %7019, %v8409_v33   ;;  %v1237_v33 = vmul.f32 %v1216_v13, %v8159_v61  ;;  %v1219_v62 = vrot.slane %v1201_v47, 5  ;;  %v2538_v8 = vrot.slane %v2536_v42, 1  ;;  %v2541_v20 = vrot.slane %v2539_v27, 2 }
 0x17f   : > { %v1243_v35 = vpack.c.bf16 %v1237_v33, %v1236_v38  ;;  %v1220_v21 = vsel %vm1205_vm9, %v1217_v63, %v1219_v62  ;;  %v1222_v23 = vsel %vm1205_vm9, %v1219_v62, %v1221_v15  ;;  %v2542_v22 = vor.u32 %v2541_v20, %v2538_v8  ;;  %v9028_v51 = vpop.permute.xlu0 %1340  ;;  %v7170_v62 = vld [vmem:[%s10840_s4 + $0x3e8] sm:$0xff]  }
 0x180   : > { %v1239_v25 = vmul.f32 %v1220_v21, %v8455_v37  ;;  %v1240_v24 = vmul.f32 %v1222_v23, %v8832_v41  ;;  %v1175_v33 = vpack.c.bf16 %v1169_v16, %v1168_v1  ;;  %v1153_v8 = vrot.slane %v8710_v50, 6 }
 0x181   : > { %1613 = vperm.xlu1 %7006, %v9004_v43   ;;  %7025 = vset.pattern.permute.xlu0 %v10866_v31  ;;  %v2545_v19 = vshrl.u32 %v1243_v35, 16  ;;  %v2548_v54 = vshll.u32 %v1243_v35, 16  ;;  %v9025_v63 = vpop.permute.xlu1 %1247  ;;  %v2543_v15 = vsel %vm2526_vm10, %v2534_v36, %v2542_v22 }
 0x182   : > { %1929 = vperm.xlu0 %7025, %v8620_v2   ;;  %v1244_v49 = vpack.c.bf16 %v1239_v25, %v1238_v4  ;;  %5252 = vmatprep.mubr.bf16.mxu0 %v2543_v15  ;;  %v1245_v42 = vpack.c.bf16 %v1240_v24, %v1240_v24  ;;  %v2515_v16 = vrot.slane %v1175_v33, 1  ;;  %v7171_v25 = vld [vmem:[%s10840_s4 + $0x3a8] sm:$0xff]   ;;  %v10864_v24 = vmov 25   ;;  %v9074_v15 = vld [vmem:[%s10837_s1 + $0x10] sm:$0xff] }
 0x183   : > { %v2547_v13 = vrot.slane %v2545_v19, 1  ;;  %v2550_v38 = vrot.slane %v2548_v54, 2  ;;  %v9059_v4 = vpop.permute.xlu0 %1388 }
 0x184   : > { %v2554_v47 = vshrl.u32 %v1244_v49, 16  ;;  %v2557_v35 = vshll.u32 %v1244_v49, 16  ;;  %v2563_v23 = vshrl.u32 %v1245_v42, 16  ;;  %v2566_v19 = vshll.u32 %v1245_v42, 16 }
 0x185   : > { %7008 = vset.pattern.permute.xlu1 %v7351_v40  ;;  %v2514_v40 = vsel %vm1411_vm6, %v2512_v10, %v9009_v9  ;;  %v2551_v27 = vor.u32 %v2550_v38, %v2547_v13  ;;  %v1150_v10 = vsel %vm448_vm2, %v1147_v18, %v1149_v52  ;;  %v9044_v1 = vpop.permute.xlu1 %1253  ;;  %v2516_v13 = vsel %vm1411_vm6, %v9009_v9, %v2515_v16  ;;  %v7174_v9 = vld [vmem:[%s10840_s4 + $0x3d8] sm:$0xff]  }
 0x186   : > { %1543 = vperm.xlu1 %7008, %v8967_v7   ;;  %1938 = vperm.xlu0 %7025, %v8652_v32   ;;  %v1152_v32 = vsel %vm448_vm2, %v1149_v52, %v1151_v39  ;;  %v2556_v36 = vrot.slane %v2554_v47, 1  ;;  %v2559_v21 = vrot.slane %v2557_v35, 2  ;;  %v1170_v50 = vmul.f32 %v1150_v10, %v8213_v58  ;;  %v9102_v10 = vld [vmem:[%s10837_s1 + $0x28] sm:$0xff] }
 0x187   : > { %5253 = vmatmul.mubr.bf16.vlgmr.msra.gmra.mxu0 %v2514_v40  ;;  %v1171_v20 = vmul.f32 %v1152_v32, %v8455_v37  ;;  %v2552_v18 = vsel %vm2526_vm10, %v2542_v22, %v2551_v27  ;;  %v1154_v52 = vsel %vm448_vm2, %v1151_v39, %v1153_v8  ;;  %v2565_v38 = vrot.slane %v2563_v23, 1  ;;  %v7173_v39 = vld [vmem:[%s10840_s4 + $0x3a0] sm:$0xff]  }
 0x188   : > { %6557 = vmatpush3.bf16.msra.mxu0 %v7167_v56  ;;  %5260 = vmatprep.mubr.bf16.mxu0 %v2552_v18  ;;  %v2560_v54 = vor.u32 %v2559_v21, %v2556_v36  ;;  %v7172_v56 = vld [vmem:[%s10840_s4 + $0x3e0] sm:$0xff]   ;;  %v2568_v33 = vrot.slane %v2566_v19, 2  ;;  %v1172_v42 = vmul.f32 %v1154_v52, %v8832_v41  ;;  %v1274_v35 = vrot.slane %v8847_v34, 3  ;;  %v7175_v18 = vld [vmem:[%s10840_s4 + $0x398] sm:$0xff]   ;;  %v7176_v34 = vld [vmem:[%s10840_s4 + $0x3d0] sm:$0xff]  }
 0x189   : > { %6558 = vmatprep.subr.bf16.mxu0 %v7168_v46  ;;  %v9065_v22 = vpop.permute.xlu1 %1256  ;;  %v1176_v49 = vpack.c.bf16 %v1171_v20, %v1170_v50  ;;  %v1276_v8 = vrot.slane %v9044_v1, 3 }
 0x18a   : > { %7009 = vset.pattern.permute.xlu1 %v7353_v11  ;;  %1947 = vperm.xlu0 %7025, %v8967_v7   ;;  %v2561_v40 = vsel %vm2526_vm10, %v2551_v27, %v2560_v54  ;;  %v1278_v46 = vrot.slane %v9065_v22, 3  ;;  %v9091_v27 = vpop.permute.xlu0 %1397  ;;  %v2569_v20 = vor.u32 %v2568_v33, %v2565_v38  ;;  %v1177_v23 = vpack.c.bf16 %v1172_v42, %v1172_v42 }
 0x18b   : > { %1723 = vperm.xlu1 %7009, %v9054_v26   ;;  %v2517_v47 = vrot.slane %v1176_v49, 1  ;;  %v1277_v50 = vsel %vm748_vm4, %v1274_v35, %v1276_v8  ;;  %v7178_v49 = vld [vmem:[%s10840_s4 + $0x3c8] sm:$0xff]   ;;  %v1343_v42 = vrot.slane %v8948_v5, 2 }
 0x18c   : > { %6559 = vmatpush3.bf16.msra.mxu0 %v7169_v55  ;;  %v9096_v55 = vld [vmem:[%s10837_s1 + $0x18] sm:$0xff]  ;;  %v1279_v36 = vsel %vm748_vm4, %v1276_v8, %v1278_v46  ;;  %v1302_v38 = vmul.f32 %v1277_v50, %v8034_v57  ;;  %v1280_v8 = vrot.slane %v8876_v3, 3  ;;  %v7180_v3 = vld [vmem:[%s10840_s4 + $0x3c0] sm:$0xff]   ;;  %v1284_v50 = vrot.slane %v8900_v29, 3 }
 0x18d   : > { %6560 = vmatprep.subr.bf16.mxu0 %v7170_v62  ;;  %v9085_v32 = vpop.permute.xlu1 %1262  ;;  %v1273_v62 = vrot.slane %v9025_v63, 3  ;;  %v10861_v63 = vmov 24   ;;  %v2518_v1 = vsel %vm1411_vm6, %v2515_v16, %v2517_v47  ;;  %v9132_v16 = vrot.slane %v1177_v23, 1 }
 0x18e   : > { %7029 = vset.pattern.permute.xlu0 %v10864_v24  ;;  %v9127_v52 = vpop.permute.xlu0 %1403  ;;  %v1282_v33 = vrot.slane %v9085_v32, 3  ;;  %v7179_v32 = vld [vmem:[%s10840_s4 + $0x388] sm:$0xff]   ;;  %v1349_v29 = vrot.slane %v8974_v45, 2 }
 0x18f   : > { %1729 = vperm.xlu1 %7009, %v9074_v15   ;;  %2118 = vperm.xlu0 %7029, %v9074_v15   ;;  %v1275_v19 = vsel %vm748_vm4, %v1273_v62, %v1274_v35  ;;  %v10868_v35 = vmov 23  }
 0x190   : > { %5261 = vmatmul.mubr.bf16.gmra.mxu0 %v2516_v13  ;;  %v7177_v13 = vld [vmem:[%s10840_s4 + $0x390] sm:$0xff]   ;;  %v1283_v5 = vsel %vm748_vm4, %v1280_v8, %v1282_v33 }
 0x191   : > { %5268 = vmatprep.mubr.bf16.mxu0 %v2561_v40  ;;  %6561 = vmatpush3.bf16.msra.mxu0 %v7171_v25  ;;  %v2570_v25 = vsel %vm2526_vm10, %v2560_v54, %v2569_v20  ;;  %v1300_v40 = vmul.f32 %v1273_v62, %v7977_v17  ;;  %v1301_v54 = vmul.f32 %v1275_v19, %v7991_v53 }
 0x192   : > { %6562 = vmatprep.subr.bf16.mxu0 %v7172_v56  ;;  %v9114_v21 = vpop.permute.xlu1 %1268  ;;  %v1303_v56 = vmul.f32 %v1279_v36, %v8058_v44  ;;  %v9151_v36 = vpop.permute.xlu0 %1409 }
 0x193   : > { %1732 = vperm.xlu1 %7009, %v9096_v55   ;;  %2127 = vperm.xlu0 %7029, %v9102_v10  }
 0x194   : > { %v1311_v62 = vpack.c.bf16 %v1303_v56, %v1302_v38 }
 0x195   : > { %6563 = vmatpush3.bf16.msra.mxu0 %v7173_v39 }
 0x196   : > { %6564 = vmatprep.subr.bf16.mxu0 %v7174_v9  ;;  %v2585_v56 = vshrl.u32 %v1311_v62, 16 }
 0x197   : > { %1738 = vperm.xlu1 %7009, %v9102_v10   ;;  %7033 = vset.pattern.permute.xlu0 %v10861_v63 }
 0x198   : > { %2048 = vperm.xlu0 %7033, %v8620_v2   ;;  %5269 = vmatmul.mubr.bf16.gmra.mxu0 %v2518_v1  ;;  %v1317_v39 = vpop.permute.xlu1 %1316  ;;  %v2587_v45 = vrot.slane %v2585_v56, 2 }
 0x199   : > { %5276 = vmatprep.mubr.bf16.mxu0 %v2570_v25  ;;  %6565 = vmatpush3.bf16.msra.mxu0 %v7175_v18  ;;  %v1342_v9 = vrot.slane %v1317_v39, 2  ;;  %v1310_v18 = vpack.c.bf16 %v1301_v54, %v1300_v40  ;;  %v1281_v25 = vsel %vm748_vm4, %v1278_v46, %v1280_v8 }
 0x19a   : > { %6566 = vmatprep.subr.bf16.mxu0 %v7176_v34  ;;  %v2520_v34 = vsel %vm1411_vm6, %v2517_v47, %v9132_v16  ;;  %v2588_v47 = vshll.u32 %v1311_v62, 16  ;;  %v1304_v39 = vmul.f32 %v1281_v25, %v8131_v59 }
 0x19b   : > { %7010 = vset.pattern.permute.xlu1 %v7352_v30  ;;  %v1344_v1 = vsel %vm419_vm5, %v1342_v9, %v1343_v42  ;;  %v2577_v40 = vshrl.u32 %v1310_v18, 16  ;;  %v1369_v22 = vmul.f32 %v1342_v9, %v7977_v17  ;;  %v2580_v38 = vshll.u32 %v1310_v18, 16  ;;  %v9180_v9 = vpop.permute.xlu0 %1458 }
 0x19c   : > { %1656 = vperm.xlu1 %7010, %v9054_v26   ;;  %7034 = vset.pattern.permute.xlu0 %v10868_v35  ;;  %v1323_v23 = vpop.permute.xlu1 %1322  ;;  %v1370_v46 = vmul.f32 %v1344_v1, %v7991_v53 }
 0x19d   : > { %1995 = vperm.xlu0 %7034, %v9054_v26   ;;  %6567 = vmatpush3.bf16.msra.mxu0 %v7177_v13  ;;  %v1345_v19 = vrot.slane %v1323_v23, 2  ;;  %v1305_v13 = vmul.f32 %v1283_v5, %v8159_v61  ;;  %v2590_v5 = vrot.slane %v2588_v47, 3  ;;  %v2579_v56 = vrot.slane %v2577_v40, 2 }
 0x19e   : > { %6568 = vmatprep.subr.bf16.mxu0 %v7178_v49  ;;  %v1286_v49 = vrot.slane %v9114_v21, 3 }
 0x19f   : > { %v1346_v8 = vsel %vm419_vm5, %v1343_v42, %v1345_v19  ;;  %v1312_v23 = vpack.c.bf16 %v1305_v13, %v1304_v39  ;;  %v1353_v42 = vrot.slane %v8999_v12, 2 }
 0x1a0   : > { %1659 = vperm.xlu1 %7010, %v8620_v2   ;;  %5277 = vmatmul.mubr.bf16.gmra.mxu0 %v2520_v34  ;;  %v7181_v2 = vld [vmem:[%s10840_s4 + $0x380] sm:$0xff]   ;;  %v1326_v54 = vpop.permute.xlu1 %1325  ;;  %v1287_v18 = vsel %vm748_vm4, %v1284_v50, %v1286_v49  ;;  %v1371_v1 = vmul.f32 %v1346_v8, %v8034_v57 }
 0x1a1   : > { %2007 = vperm.xlu0 %7034, %v9096_v55   ;;  %5284 = vmatprep.mubr.bf16.mxu0 %v2569_v20  ;;  %v7198_v20 = vld [vmem:[%s10840_s4 + $0x4f8] sm:$0xff]   ;;  %v1347_v62 = vrot.slane %v1326_v54, 2  ;;  %v2582_v54 = vrot.slane %v2580_v38, 3 }
 0x1a2   : > { %6569 = vmatpush3.bf16.msra.mxu0 %v7179_v32  ;;  %v1285_v32 = vsel %vm748_vm4, %v1282_v33, %v1284_v50  ;;  %v1307_v50 = vmul.f32 %v1287_v18, %v8455_v37 }
 0x1a3   : > { %6570 = vmatprep.subr.bf16.mxu0 %v7180_v3  ;;  %v1348_v34 = vsel %vm419_vm5, %v1345_v19, %v1347_v62  ;;  %v1379_v3 = vpack.c.bf16 %v1370_v46, %v1369_v22  ;;  %v1350_v47 = vsel %vm419_vm5, %v1347_v62, %v1349_v29  ;;  %v1288_v19 = vrot.slane %v8919_v48, 3 }
 0x1a4   : > { %1665 = vperm.xlu1 %7010, %v9096_v55   ;;  %v1372_v33 = vmul.f32 %v1348_v34, %v8058_v44  ;;  %v1332_v25 = vpop.permute.xlu1 %1331  ;;  %v1306_v12 = vmul.f32 %v1285_v32, %v8213_v58  ;;  %v2591_v22 = vor.u32 %v2590_v5, %v2587_v45  ;;  %v2594_v46 = vshrl.u32 %v1312_v23, 16 }
 0x1a5   : > { %2015 = vperm.xlu0 %7034, %v9102_v10   ;;  %v1351_v13 = vrot.slane %v1332_v25, 2  ;;  %v2630_v39 = vrot.slane %v1379_v3, 3  ;;  %v1357_v62 = vrot.slane %v9028_v51, 2  ;;  %v2583_v34 = vor.u32 %v2582_v54, %v2579_v56  ;;  %v7184_v51 = vld [vmem:[%s10840_s4 + $0x470] sm:$0xff]  }
 0x1a6   : > { %6571 = vmatpush3.bf16.msra.mxu0 %v7181_v2  ;;  %v1380_v2 = vpack.c.bf16 %v1372_v33, %v1371_v1  ;;  %v9211_v45 = vsel %vm448_vm2, %v435_v6, 0.0  ;;  %v1313_v5 = vpack.c.bf16 %v1307_v50, %v1306_v12  ;;  %v2596_v33 = vrot.slane %v2594_v46, 2  ;;  %v7185_v50 = vld [vmem:[%s10840_s4 + $0x430] sm:$0xff]   ;;  %v7186_v46 = vld [vmem:[%s10840_s4 + $0x468] sm:$0xff]  }
 0x1a7   : > { %6648 = vmatprep.subr.bf16.mxu0 %v7198_v20  ;;  %v1352_v40 = vsel %vm419_vm5, %v1349_v29, %v1351_v13  ;;  %v2597_v20 = vshll.u32 %v1312_v23, 16  ;;  %v1354_v32 = vsel %vm419_vm5, %v1351_v13, %v1353_v42  ;;  %v7183_v29 = vld [vmem:[%s10840_s4 + $0x438] sm:$0xff]   ;;  %v2592_v6 = vsel %vm2330_vm8, %v2583_v34, %v2591_v22  ;;  %v7188_v34 = vld [vmem:[%s10840_s4 + $0x460] sm:$0xff]  }
 0x1a8   : > { %7013 = vset.pattern.permute.xlu1 %v7353_v11  ;;  %5285 = vmatmul.mubr.bf16.gmra.mxu0 %v9132_v16  ;;  %v9199_v11 = vpop.permute.xlu0 %1467  ;;  %v1373_v16 = vmul.f32 %v1350_v47, %v8131_v59  ;;  %v1374_v48 = vmul.f32 %v1352_v40, %v8159_v61  ;;  %v1338_v38 = vpop.permute.xlu1 %1337  ;;  %v2631_v8 = vrot.slane %v1380_v2, 3  ;;  %v1289_v56 = vsel %vm748_vm4, %v1286_v49, %v1288_v19 }
 0x1a9   : > { %1741 = vperm.xlu1 %7013, %v8984_v28   ;;  %2023 = vperm.xlu0 %7034, %v8967_v7   ;;  %v1355_v18 = vrot.slane %v1338_v38, 2  ;;  %v2599_v25 = vrot.slane %v2597_v20, 3  ;;  %v1375_v54 = vmul.f32 %v1354_v32, %v8213_v58  ;;  %v1309_v21 = vmul.f32 %v1288_v19, %v9211_v45 }
 0x1aa   : > { %v2632_v23 = vsel %vm748_vm4, %v2630_v39, %v2631_v8  ;;  %v1381_v3 = vpack.c.bf16 %v1374_v48, %v1373_v16  ;;  %v1308_v20 = vmul.f32 %v1289_v56, %v8832_v41  ;;  %v2603_v48 = vshrl.u32 %v1313_v5, 16 }
 0x1ab   : > { %v1356_v1 = vsel %vm419_vm5, %v1353_v42, %v1355_v18  ;;  %5324 = vmatprep.mubr.bf16.mxu1 %v2632_v23  ;;  %v1358_v13 = vsel %vm419_vm5, %v1355_v18, %v1357_v62  ;;  %v2600_v16 = vor.u32 %v2599_v25, %v2596_v33  ;;  %v2606_v38 = vshll.u32 %v1313_v5, 16  ;;  %v7187_v18 = vld [vmem:[%s10840_s4 + $0x428] sm:$0xff]   ;;  %v7190_v33 = vld [vmem:[%s10840_s4 + $0x458] sm:$0xff]  }
 0x1ac   : > { %v1376_v42 = vmul.f32 %v1356_v1, %v8455_v37  ;;  %5325 = vmatmul.mubr.bf16.vlgmr.msra.gmra.mxu1 %v2592_v6  ;;  %v2633_v47 = vrot.slane %v1381_v3, 3  ;;  %v9240_v49 = vpop.permute.xlu0 %1473  ;;  %v1378_v19 = vmul.f32 %v1357_v62, %v9211_v45  ;;  %v1377_v39 = vmul.f32 %v1358_v13, %v8832_v41 }
 0x1ad   : > { %7014 = vset.pattern.permute.xlu1 %v7352_v30  ;;  %7037 = vset.pattern.permute.xlu0 %v10864_v24  ;;  %v2601_v62 = vsel %vm2330_vm8, %v2591_v22, %v2600_v16  ;;  %v2605_v5 = vrot.slane %v2603_v48, 2  ;;  %v2608_v23 = vrot.slane %v2606_v38, 3  ;;  %v7189_v22 = vld [vmem:[%s10840_s4 + $0x420] sm:$0xff]  }
 0x1ae   : > { %1668 = vperm.xlu1 %7014, %v9223_v60   ;;  %2130 = vperm.xlu0 %7037, %v8984_v28   ;;  %v2634_v2 = vsel %vm748_vm4, %v2631_v8, %v2633_v47  ;;  %v1382_v40 = vpack.c.bf16 %v1376_v42, %v1375_v54  ;;  %v1383_v1 = vpack.c.bf16 %v1378_v19, %v1377_v39  ;;  %v1413_v42 = vrot.slane %v9059_v4, 1  ;;  %v7192_v4 = vld [vmem:[%s10840_s4 + $0x450] sm:$0xff]  }
 0x1af   : > { %v9234_v12 = vpop.permute.xlu1 %1385  ;;  %6603 = vmatpush3.bf16.msra.mxu1 %v7183_v29  ;;  %5332 = vmatprep.mubr.bf16.mxu1 %v2634_v2  ;;  %v1314_v29 = vpack.c.bf16 %v1309_v21, %v1308_v20  ;;  %v2609_v25 = vor.u32 %v2608_v23, %v2605_v5  ;;  %v7191_v21 = vld [vmem:[%s10840_s4 + $0x418] sm:$0xff]  }
 0x1b0   : > { %6604 = vmatprep.subr.bf16.mxu1 %v7184_v51  ;;  %v2635_v32 = vrot.slane %v1382_v40, 3  ;;  %v9259_v3 = vpop.permute.xlu0 %1479  ;;  %v2637_v13 = vrot.slane %v1383_v1, 3 }
 0x1b1   : > { %v2612_v56 = vshrl.u32 %v1314_v29, 16  ;;  %v2615_v54 = vshll.u32 %v1314_v29, 16 }
 0x1b2   : > { %1671 = vperm.xlu1 %7014, %v9102_v10   ;;  %2136 = vperm.xlu0 %7037, %v9004_v43   ;;  %v9264_v43 = vld [vmem:[%s10837_s1 + $0x8] sm:$0xff]  ;;  %v2636_v51 = vsel %vm748_vm4, %v2633_v47, %v2635_v32  ;;  %v1412_v47 = vrot.slane %v9234_v12, 1  ;;  %v2610_v12 = vsel %vm2330_vm8, %v2600_v16, %v2609_v25  ;;  %v2638_v19 = vsel %vm748_vm4, %v2635_v32, %v2637_v13 }
 0x1b3   : > { %v1392_v8 = vpop.permute.xlu1 %1391  ;;  %6605 = vmatpush3.bf16.msra.mxu1 %v7185_v50  ;;  %v2617_v20 = vrot.slane %v2615_v54, 3 }
 0x1b4   : > { %6606 = vmatprep.subr.bf16.mxu1 %v7186_v46  ;;  %5333 = vmatmul.mubr.bf16.gmra.mxu1 %v2601_v62  ;;  %v9286_v2 = vpop.permute.xlu0 %1589  ;;  %v2614_v46 = vrot.slane %v2612_v56, 2  ;;  %v1414_v48 = vsel %vm1411_vm6, %v1412_v47, %v1413_v42  ;;  %v1415_v38 = vrot.slane %v1392_v8, 1  ;;  %v7194_v8 = vld [vmem:[%s10840_s4 + $0x448] sm:$0xff]  }
 0x1b5   : > { %5340 = vmatprep.mubr.bf16.mxu1 %v2636_v51  ;;  %v1440_v32 = vmul.f32 %v1414_v48, %v7991_v53  ;;  %v1482_v51 = vrot.slane %v9180_v9, 7  ;;  %v1419_v9 = vrot.slane %v9091_v27, 1 }
 0x1b6   : > { %7015 = vset.pattern.permute.xlu1 %v7354_v14  ;;  %7041 = vset.pattern.permute.xlu0 %v10861_v63  ;;  %v9309_v29 = vor.u32 %v2617_v20, %v2614_v46  ;;  %v1416_v5 = vsel %vm1411_vm6, %v1413_v42, %v1415_v38 }
 0x1b7   : > { %1860 = vperm.xlu1 %7015, %v9264_v43   ;;  %v9268_v6 = vpop.permute.xlu1 %1394  ;;  %6607 = vmatpush3.bf16.msra.mxu1 %v7187_v18  ;;  %v7193_v18 = vld [vmem:[%s10840_s4 + $0x410] sm:$0xff]   ;;  %v1441_v56 = vmul.f32 %v1416_v5, %v8034_v57  ;;  %v7214_v5 = vld [vmem:[%s10840_s4 + $0x578] sm:$0xff]  }
 0x1b8   : > { %6608 = vmatprep.subr.bf16.mxu1 %v7188_v34  ;;  %2066 = vperm.xlu0 %7041, %v8967_v7   ;;  %v1417_v40 = vrot.slane %v9268_v6, 1  ;;  %v1439_v34 = vmul.f32 %v1412_v47, %v7977_v17  ;;  %v9311_v62 = vpop.permute.xlu0 %1598  ;;  %v2619_v42 = vsel %vm2330_vm8, %v2609_v25, %v9309_v29 }
 0x1ba   : > { %v1418_v16 = vsel %vm1411_vm6, %v1415_v38, %v1417_v40 }
 0x1bb   : > { %1863 = vperm.xlu1 %7015, %v9074_v15   ;;  %6609 = vmatpush3.bf16.msra.mxu1 %v7189_v22  ;;  %v1442_v23 = vmul.f32 %v1418_v16, %v8058_v44  ;;  %v7195_v22 = vld [vmem:[%s10840_s4 + $0x408] sm:$0xff]  }
 0x1bc   : > { %v9281_v50 = vpop.permute.xlu1 %1400  ;;  %6610 = vmatprep.subr.bf16.mxu1 %v7190_v33  ;;  %5341 = vmatmul.mubr.bf16.gmra.mxu1 %v2610_v12  ;;  %v1449_v33 = vpack.c.bf16 %v1440_v32, %v1439_v34  ;;  %v9330_v20 = vpop.permute.xlu0 %1604  ;;  %v9345_v34 = vld [vmem:[%s10841_s5] ss:$0 sm:$0xff] }
 0x1bd   : > { %5348 = vmatprep.mubr.bf16.mxu1 %v2638_v19  ;;  %v1421_v1 = vrot.slane %v9281_v50, 1  ;;  %v7197_v19 = vld [vmem:[%s10840_s4 + $0x400] sm:$0xff]  }
 0x1bf   : > { %1869 = vperm.xlu1 %7015, %v9223_v60   ;;  %6611 = vmatpush3.bf16.msra.mxu1 %v7191_v21  ;;  %v1422_v25 = vsel %vm1411_vm6, %v1419_v9, %v1421_v1 }
 0x1c0   : > { %v9296_v39 = vpop.permute.xlu1 %1406  ;;  %6612 = vmatprep.subr.bf16.mxu1 %v7192_v4  ;;  %v6296_v17 = vpop.f32.mrf.mxu0  ;;  %v1450_v4 = vpack.c.bf16 %v1442_v23, %v1441_v56  ;;  %v1427_v23 = vrot.slane %v9151_v36, 1  ;;  %v1488_v56 = vrot.slane %v9199_v11, 7  ;;  %v7201_v36 = vld [vmem:[%s10840_s4 + $0x4b0] sm:$0xff]  }
 0x1c2   : > { %v6297_v21 = vpop.f32.mrf.mxu0 }
 0x1c3   : > { %7016 = vset.pattern.permute.xlu1 %v7355_v0  ;;  %6613 = vmatpush3.bf16.msra.mxu1 %v7193_v18  ;;  %v6298_v46 = vadd.f32 %v6297_v21, %v6296_v17  ;;  %v2646_v18 = vshrl.u32 %v1449_v33, 16  ;;  %v1492_v21 = vrot.slane %v9240_v49, 7 }
 0x1c4   : > { %1790 = vperm.xlu1 %7016, %v9054_v26   ;;  %6614 = vmatprep.subr.bf16.mxu1 %v7194_v8  ;;  %v7196_v26 = vld [vmem:[%s10840_s4 + $0x440] sm:$0xff]   ;;  %v6250_v12 = vpop.f32.mrf.mxu1  ;;  %v6299_v27 = vpop.f32.mrf.mxu0 }
 0x1c5   : > { %5349 = vmatmul.mubr.bf16.gmra.mxu1 %v2619_v42  ;;  %v2657_v42 = vshll.u32 %v1450_v4, 16 }
 0x1c6   : > { %v1456_v54 = vpop.permute.xlu1 %1455  ;;  %5356 = vmatprep.mubr.bf16.mxu1 %v2637_v13  ;;  %v2649_v13 = vshll.u32 %v1449_v33, 16  ;;  %v6251_v32 = vpop.f32.mrf.mxu1 }
 0x1c7   : > { %v1481_v47 = vrot.slane %v1456_v54, 7  ;;  %6615 = vmatpush3.bf16.msra.mxu1 %v7195_v22  ;;  %v6252_v22 = vadd.f32 %v6251_v32, %v6250_v12  ;;  %v6300_v33 = vpop.f32.mrf.mxu0  ;;  %v2654_v54 = vshrl.u32 %v1450_v4, 16  ;;  %v1425_v4 = vrot.slane %v9296_v39, 1 }
 0x1c8   : > { %1796 = vperm.xlu1 %7016, %v9074_v15   ;;  %v1423_v15 = vrot.slane %v9127_v52, 1  ;;  %6616 = vmatprep.subr.bf16.mxu1 %v7196_v26  ;;  %v1420_v52 = vsel %vm1411_vm6, %v1417_v40, %v1419_v9  ;;  %v6253_v26 = vpop.f32.mrf.mxu1  ;;  %v9362_v40 = vrot.slane %v2646_v18, 3  ;;  %v9364_v9 = vrot.slane %v2649_v13, 4  ;;  %v9372_v18 = vpop.permute.xlu0 %1610 }
 0x1c9   : > { %v1483_v48 = vsel %vm545_vm1, %v1481_v47, %v1482_v51  ;;  %v1507_v38 = vmul.f32 %v1481_v47, %v7991_v53  ;;  %v1444_v47 = vmul.f32 %v1422_v25, %v8159_v61  ;;  %v4895_v6 = vadd.f32 %v6252_v22, %v9345_v34 }
 0x1ca   : > { %v1508_v16 = vmul.f32 %v1483_v48, %v8034_v57  ;;  %v1462_v8 = vpop.permute.xlu1 %1461  ;;  %v1496_v48 = vrot.slane %v9259_v3, 7  ;;  %v1443_v11 = vmul.f32 %v1420_v52, %v8131_v59  ;;  %v2656_v13 = vrot.slane %v2654_v54, 3 }
 0x1cb   : > { %v1484_v17 = vrot.slane %v1462_v8, 7  ;;  %6617 = vmatpush3.bf16.msra.mxu1 %v7197_v19  ;;  %v9370_v19 = vadd.f32 %v6298_v46, %v4895_v6  ;;  %v1424_v39 = vsel %vm1411_vm6, %v1421_v1, %v1423_v15  ;;  %v1426_v54 = vsel %vm1411_vm6, %v1423_v15, %v1425_v4 }
 0x1cc   : > { %1799 = vperm.xlu1 %7016, %v9096_v55   ;;  %v9359_v63 = vpack.c.bf16 %v1508_v16, %v1507_v38  ;;  %v6254_v55 = vpop.f32.mrf.mxu1  ;;  %6694 = vmatprep.subr.bf16.mxu1 %v7214_v5  ;;  %v6302_v38 = vpop.f32.mrf.mxu0  ;;  %v2659_v16 = vrot.slane %v2657_v42, 4  ;;  %v9377_v52 = vpack.c.bf16 %v1444_v47, %v1443_v11  ;;  %v6301_v5 = vadd.f32 %v6300_v33, %v6299_v27 }
 0x1cd   : > { %v1485_v25 = vsel %vm545_vm1, %v1482_v51, %v1484_v17  ;;  %v6255_v32 = vadd.f32 %v6254_v55, %v6253_v26  ;;  %5357 = vmatmul.mubr.bf16.gmra.mxu1 %v9309_v29  ;;  %v2652_v27 = vor.u32 %v9364_v9, %v9362_v40  ;;  %v1445_v33 = vmul.f32 %v1424_v39, %v8213_v58  ;;  %v9405_v39 = vpop.permute.xlu0 %1525 }
 0x1ce   : > { %v1465_v12 = vpop.permute.xlu1 %1464  ;;  %v2697_v51 = vshll.u32 %v9359_v63, 16  ;;  %v6256_v22 = vpop.f32.mrf.mxu1  ;;  %v1509_v42 = vmul.f32 %v1485_v25, %v8058_v44  ;;  %v1428_v15 = vsel %vm1411_vm6, %v1425_v4, %v1427_v23  ;;  %v9403_v9 = vor.u32 %v2659_v16, %v2656_v13 }
 0x1cf   : > { %v1486_v8 = vrot.slane %v1465_v12, 7  ;;  %v4898_v46 = vadd.f32 %v6255_v32, %v9345_v34  ;;  %v6303_v26 = vpop.f32.mrf.mxu0 }
 0x1d0   : > { %1805 = vperm.xlu1 %7016, %v9102_v10   ;;  %v6304_v1 = vadd.f32 %v6303_v26, %v6302_v38  ;;  %v6257_v11 = vpop.f32.mrf.mxu1  ;;  %v2699_v40 = vrot.slane %v2697_v51, 1  ;;  %v2663_v26 = vshrl.u32 %v9377_v52, 16  ;;  %v2661_v49 = vsel %vm2644_vm11, %v2652_v27, %v9403_v9 }
 0x1d1   : > { %v1487_v29 = vsel %vm545_vm1, %v1484_v17, %v1486_v8  ;;  %v1489_v6 = vsel %vm545_vm1, %v1486_v8, %v1488_v56  ;;  %v9387_v12 = vpop.f32.mrf.mxu0  ;;  %v9391_v17 = vadd.f32 %v6301_v5, %v4898_v46  ;;  %v6258_v55 = vadd.f32 %v6257_v11, %v6256_v22  ;;  %v9444_v27 = vpop.permute.xlu0 %1534 }
 0x1d2   : > { %v1510_v50 = vmul.f32 %v1487_v29, %v8131_v59  ;;  %v1471_v47 = vpop.permute.xlu1 %1470  ;;  %v1446_v8 = vmul.f32 %v1426_v54, %v8455_v37  ;;  %v6259_v38 = vpop.f32.mrf.mxu1  ;;  %v1511_v4 = vmul.f32 %v1489_v6, %v8159_v61 }
 0x1d3   : > { %v1490_v10 = vrot.slane %v1471_v47, 7  ;;  %v9400_v29 = vpop.f32.mrf.mxu0  ;;  %v4903_v46 = vadd.f32 %v6258_v55, %v9345_v34 }
 0x1d4   : > { %7018 = vset.pattern.permute.xlu1 %v7352_v30  ;;  %v1517_v25 = vpack.c.bf16 %v1510_v50, %v1509_v42  ;;  %v6260_v13 = vpop.f32.mrf.mxu1  ;;  %v2666_v50 = vshll.u32 %v9377_v52, 16  ;;  %v9420_v6 = vpack.c.bf16 %v1446_v8, %v1445_v33 }
 0x1d5   : > { %v1491_v32 = vsel %vm545_vm1, %v1488_v56, %v1490_v10  ;;  %1674 = vperm.xlu1 %7018, %v8984_v28   ;;  %v2695_v56 = vshrl.u32 %v9359_v63, 16  ;;  %v1493_v28 = vsel %vm545_vm1, %v1490_v10, %v1492_v21  ;;  %v6308_v16 = vpop.f32.mrf.mxu0  ;;  %v9418_v47 = vadd.f32 %v6304_v1, %v4903_v46 }
 0x1d6   : > { %v1512_v5 = vmul.f32 %v1491_v32, %v8213_v58  ;;  %v1477_v22 = vpop.permute.xlu1 %1476  ;;  %v2702_v54 = vshll.u32 %v1517_v25, 16  ;;  %v6262_v11 = vpop.f32.mrf.mxu1 }
 0x1d7   : > { %v1494_v51 = vrot.slane %v1477_v22, 7  ;;  %v6309_v55 = vpop.f32.mrf.mxu0  ;;  %v2700_v10 = vor.u32 %v2699_v40, %v2695_v56  ;;  %v10863_v22 = vmov 26   ;;  %v2665_v56 = vrot.slane %v2663_v26, 3 }
 0x1d8   : > { %v9415_v42 = vpack.c.bf16 %v1512_v5, %v1511_v4  ;;  %v2704_v32 = vrot.slane %v2702_v54, 1  ;;  %7043 = vset.pattern.permute.xlu0 %v10863_v22  ;;  %v1513_v4 = vmul.f32 %v1493_v28, %v8455_v37  ;;  %v9429_v1 = vadd.f32 %v6309_v55, %v6308_v16  ;;  %v6263_v33 = vpop.f32.mrf.mxu1  ;;  %v7200_v28 = vld [vmem:[%s10840_s4 + $0x4f0] sm:$0xff]  }
 0x1d9   : > { %v1495_v63 = vsel %vm545_vm1, %v1492_v21, %v1494_v51  ;;  %1677 = vperm.xlu1 %7018, %v8967_v7   ;;  %v7199_v21 = vld [vmem:[%s10840_s4 + $0x4b8] sm:$0xff]   ;;  %2182 = vperm.xlu0 %7043, %v9264_v43   ;;  %v9437_v8 = vpop.f32.mrf.mxu0  ;;  %v2706_v5 = vshrl.u32 %v1517_v25, 16  ;;  %v1497_v16 = vsel %vm545_vm1, %v1494_v51, %v1496_v48  ;;  %v6264_v54 = vadd.f32 %v6263_v33, %v6262_v11 }
 0x1da   : > { %v1514_v52 = vmul.f32 %v1495_v63, %v8832_v41  ;;  %v2705_v40 = vsel %vm2245_vm7, %v2700_v10, %v2704_v32  ;;  %v2710_v46 = vshll.u32 %v9415_v42, 16  ;;  %v2668_v55 = vrot.slane %v2666_v50, 4  ;;  %v6265_v22 = vpop.f32.mrf.mxu1 }
 0x1db   : > { %v9449_v63 = vpop.permute.xlu1 %1522  ;;  %5396 = vmatprep.mubr.bf16.mxu0 %v2705_v40  ;;  %v1448_v25 = vmul.f32 %v1427_v23, %v9211_v45  ;;  %v1447_v26 = vmul.f32 %v1428_v15, %v8832_v41  ;;  %v6312_v24 = vpop.f32.mrf.mxu0  ;;  %v2708_v3 = vor.u32 %v2706_v5, %v2704_v32  ;;  %v6261_v51 = vadd.f32 %v6260_v13, %v6259_v38 }
 0x1dc   : > { %v9451_v10 = vpack.c.bf16 %v1514_v52, %v1513_v4  ;;  %5397 = vmatmul.mubr.bf16.vlgmr.msra.gmra.mxu0 %v2661_v49  ;;  %v2712_v48 = vrot.slane %v2710_v46, 1  ;;  %v1515_v23 = vmul.f32 %v1497_v16, %v9211_v45  ;;  %v6266_v15 = vpop.f32.mrf.mxu1  ;;  %v2672_v52 = vshrl.u32 %v9420_v6, 16 }
 0x1dd   : > { %7020 = vset.pattern.permute.xlu1 %v7354_v14  ;;  %6649 = vmatpush3.bf16.msra.mxu0 %v7199_v21  ;;  %v6314_v11 = vpop.f32.mrf.mxu0  ;;  %v2675_v32 = vshll.u32 %v9420_v6, 16  ;;  %v6267_v38 = vadd.f32 %v6266_v15, %v6265_v22  ;;  %v9472_v49 = vor.u32 %v2668_v55, %v2665_v56  ;;  %v1453_v21 = vpack.c.bf16 %v1448_v25, %v1447_v26  ;;  %v9476_v6 = vpop.permute.xlu0 %1540  ;;  %v9486_v25 = vld [vmem:[%s10837_s1 + $0x30] sm:$0xff] }
 0x1de   : > { %1878 = vperm.xlu1 %7020, %v8967_v7   ;;  %v2718_v50 = vshll.u32 %v9451_v10, 16  ;;  %v2713_v4 = vsel %vm2245_vm7, %v2708_v3, %v2712_v48  ;;  %6650 = vmatprep.subr.bf16.mxu0 %v7200_v28  ;;  %v7202_v7 = vld [vmem:[%s10840_s4 + $0x4e8] sm:$0xff]   ;;  %v6268_v33 = vpop.f32.mrf.mxu1  ;;  %v2714_v5 = vshrl.u32 %v9415_v42, 16  ;;  %v4906_v28 = vadd.f32 %v6261_v51, %v9345_v34 }
 0x1df   : > { %v9470_v13 = vpop.permute.xlu1 %1528  ;;  %5404 = vmatprep.mubr.bf16.mxu0 %v2713_v4  ;;  %2191 = vperm.xlu0 %7043, %v9223_v60   ;;  %v6315_v40 = vpop.f32.mrf.mxu0  ;;  %v4911_v16 = vadd.f32 %v6264_v54, %v9345_v34  ;;  %v9481_v56 = vpack.c.bf16 %v1515_v23, %v1515_v23  ;;  %v2674_v26 = vrot.slane %v2672_v52, 3  ;;  %v2677_v3 = vrot.slane %v2675_v32, 4 }
 0x1e0   : > { %v2720_v46 = vrot.slane %v2718_v50, 1  ;;  %v6316_v22 = vadd.f32 %v6315_v40, %v6314_v11  ;;  %v6269_v55 = vpop.f32.mrf.mxu1  ;;  %v2716_v42 = vor.u32 %v2714_v5, %v2712_v48  ;;  %v6307_v54 = vadd.f32 %v9400_v29, %v9387_v12  ;;  %v7203_v12 = vld [vmem:[%s10840_s4 + $0x4a8] sm:$0xff]  }
 0x1e1   : > { %6651 = vmatpush3.bf16.msra.mxu0 %v7201_v36  ;;  %v6317_v60 = vpop.f32.mrf.mxu0  ;;  %v6270_v51 = vadd.f32 %v6269_v55, %v6268_v33  ;;  %v2670_v36 = vsel %vm2644_vm11, %v9403_v9, %v9472_v49  ;;  %v2681_v11 = vshrl.u32 %v1453_v21, 16  ;;  %v2684_v4 = vshll.u32 %v1453_v21, 16 }
 0x1e2   : > { %7021 = vset.pattern.permute.xlu1 %v7355_v0  ;;  %6652 = vmatprep.subr.bf16.mxu0 %v7202_v7  ;;  %v4914_v0 = vadd.f32 %v6267_v38, %v9345_v34  ;;  %v6271_v23 = vpop.f32.mrf.mxu1  ;;  %v2721_v48 = vsel %vm2245_vm7, %v2716_v42, %v2720_v46  ;;  %v6313_v29 = vadd.f32 %v6312_v24, %v9437_v8  ;;  %v7204_v7 = vld [vmem:[%s10840_s4 + $0x4e0] sm:$0xff]   ;;  %v2722_v33 = vshrl.u32 %v9451_v10, 16  ;;  %v9515_v8 = vpop.permute.xlu0 %1546 }
 0x1e3   : > { %1808 = vperm.xlu1 %7021, %v9486_v25   ;;  %v9492_v50 = vpop.permute.xlu1 %1531  ;;  %2197 = vperm.xlu0 %7043, %v9486_v25   ;;  %v6318_v15 = vpop.f32.mrf.mxu0  ;;  %v4919_v52 = vadd.f32 %v6270_v51, %v9345_v34  ;;  %v9504_v32 = vadd.f32 %v6307_v54, %v4906_v28  ;;  %v9507_v9 = vadd.f32 %v9429_v1, %v4911_v16  ;;  %v2726_v24 = vshll.u32 %v9481_v56, 16  ;;  %v9522_v1 = vld [vmem:[%s10837_s1 + $0x40] sm:$0xf] }
 0x1e4   : > { %5405 = vmatmul.mubr.bf16.gmra.mxu0 %v2670_v36  ;;  %v6272_v38 = vpop.f32.mrf.mxu1  ;;  %v9525_v28 = vor.u32 %v2677_v3, %v2674_v26  ;;  %v9527_v16 = vadd.f32 %v6313_v29, %v4914_v0  ;;  %v2724_v55 = vor.u32 %v2722_v33, %v2720_v46  ;;  %v2683_v36 = vrot.slane %v2681_v11, 3  ;;  %v7205_v26 = vld [vmem:[%s10840_s4 + $0x4a0] sm:$0xff]   ;;  %v7206_v46 = vld [vmem:[%s10840_s4 + $0x4d8] sm:$0xff]  }
 0x1e5   : > { %5412 = vmatprep.mubr.bf16.mxu0 %v2721_v48  ;;  %v6320_v21 = vpop.f32.mrf.mxu0  ;;  %v6273_v40 = vadd.f32 %v6272_v38, %v6271_v23  ;;  %v9529_v42 = vadd.f32 %v6316_v22, %v4919_v52  ;;  %6653 = vmatpush3.bf16.msra.mxu0 %v7203_v12  ;;  %v2686_v23 = vrot.slane %v2684_v4, 4  ;;  %v6319_v3 = vadd.f32 %v6318_v15, %v6317_v60 }
 0x1e6   : > { %6654 = vmatprep.subr.bf16.mxu0 %v7204_v7  ;;  %v2728_v29 = vrot.slane %v2726_v24, 1  ;;  %v1615_v22 = vrot.slane %v9286_v2, 5  ;;  %v2679_v4 = vsel %vm2644_vm11, %v9472_v49, %v9525_v28  ;;  %v1549_v2 = vrot.slane %v9405_v39, 6  ;;  %v7207_v49 = vld [vmem:[%s10840_s4 + $0x498] sm:$0xff]  }
 0x1e7   : > { %7022 = vset.pattern.permute.xlu1 %v7352_v30  ;;  %v9517_v5 = vpop.permute.xlu1 %1537  ;;  %v6274_v30 = vpop.f32.mrf.mxu1  ;;  %2203 = vperm.xlu0 %7043, %v9522_v1   ;;  %v4922_v54 = vadd.f32 %v6273_v40, %v9345_v34  ;;  %v9551_v33 = vor.u32 %v2686_v23, %v2683_v36  ;;  %v1620_v24 = vrot.slane %v9311_v62, 5  ;;  %v1553_v39 = vrot.slane %v9492_v50, 6 }
 0x1e8   : > { %1680 = vperm.xlu1 %7022, %v9522_v1   ;;  %v6321_v10 = vpop.f32.mrf.mxu0  ;;  %v2729_v15 = vsel %vm2245_vm7, %v2724_v55, %v2728_v29  ;;  %v9557_v40 = vpop.permute.xlu0 %1662  ;;  %v1641_v55 = vmul.f32 %v1615_v22, %v7991_v53 }
 0x1e9   : > { %v6322_v51 = vadd.f32 %v6321_v10, %v6320_v21  ;;  %v6275_v0 = vpop.f32.mrf.mxu1  ;;  %v9546_v38 = vadd.f32 %v6319_v3, %v4922_v54  ;;  %v1548_v21 = vrot.slane %v9449_v63, 6  ;;  %6655 = vmatpush3.bf16.msra.mxu0 %v7205_v26  ;;  %v1624_v54 = vrot.slane %v9330_v20, 5 }
 0x1ea   : > { %v6323_v48 = vpop.f32.mrf.mxu0  ;;  %v6276_v12 = vadd.f32 %v6275_v0, %v6274_v30  ;;  %v1551_v30 = vrot.slane %v9470_v13, 6  ;;  %6656 = vmatprep.subr.bf16.mxu0 %v7206_v46  ;;  %v1628_v13 = vrot.slane %v9372_v18, 5  ;;  %v1555_v26 = vrot.slane %v9444_v27, 6 }
 0x1eb   : > { %v6277_v7 = vpop.f32.mrf.mxu1  ;;  %v1550_v46 = vsel %vm448_vm2, %v1548_v21, %v1549_v2 }
 0x1ec   : > { %7023 = vset.pattern.permute.xlu1 %v7354_v14  ;;  %v1593_v11 = vpop.permute.xlu1 %1592  ;;  %v6324_v60 = vpop.f32.mrf.mxu0  ;;  %5413 = vmatmul.mubr.bf16.gmra.mxu0 %v2679_v4  ;;  %v4927_v14 = vadd.f32 %v6276_v12, %v9345_v34  ;;  %v7208_v34 = vld [vmem:[%s10840_s4 + $0x4d0] sm:$0xff]   ;;  %v2730_v4 = vshrl.u32 %v9481_v56, 16  ;;  %v1552_v7 = vsel %vm448_vm2, %v1549_v2, %v1551_v30 }
 0x1ed   : > { %v1616_v52 = vrot.slane %v1593_v11, 5  ;;  %1881 = vperm.xlu1 %7023, %v9522_v1   ;;  %5420 = vmatprep.mubr.bf16.mxu0 %v2729_v15  ;;  %v6278_v10 = vpop.f32.mrf.mxu1  ;;  %v2688_v11 = vsel %vm2644_vm11, %v9525_v28, %v9551_v33 }
 0x1ee   : > { %v9568_v23 = vadd.f32 %v6322_v51, %v4927_v14  ;;  %v9581_v51 = vld [vmem:[%s10837_s1] sm:$0xff]  ;;  %6657 = vmatpush3.bf16.msra.mxu0 %v7207_v49  ;;  %v7209_v14 = vld [vmem:[%s10840_s4 + $0x490] sm:$0xff]  }
 0x1ef   : > { %v1617_v63 = vsel %vm1205_vm9, %v1615_v22, %v1616_v52  ;;  %v9576_v22 = vmul.f32 %v1548_v21, %v7991_v53  ;;  %v1554_v53 = vsel %vm448_vm2, %v1551_v30, %v1553_v39  ;;  %6658 = vmatprep.subr.bf16.mxu0 %v7208_v34  ;;  %v9604_v30 = vpop.permute.xlu0 %1726  ;;  %v9607_v34 = vmul.f32 %v1550_v46, %v8034_v57  ;;  %v9621_v46 = vld [vmem:[%s10837_s1 + $0x10] sm:$0xff] }
 0x1f0   : > { %v1642_v62 = vmul.f32 %v1617_v63, %v8034_v57  ;;  %v1596_v36 = vpop.permute.xlu1 %1595  ;;  %v2732_v63 = vor.u32 %v2730_v4, %v2728_v29  ;;  %v9614_v29 = vmul.f32 %v1554_v53, %v8131_v59 }
 0x1f1   : > { %v1618_v0 = vrot.slane %v1596_v36, 5  ;;  %v6342_v48 = vpop.f32.mrf.mxu1  ;;  %7024 = vset.pattern.permute.xlu1 %v10866_v31  ;;  %v6388_v12 = vpop.f32.mrf.mxu0  ;;  %v1583_v35 = vpack.c.bf16 %v9607_v34, %v9576_v22 }
 0x1f2   : > { %1926 = vperm.xlu1 %7024, %v9581_v51   ;;  %v9597_v28 = vpack.c.bf16 %v1642_v62, %v1641_v55  ;;  %6659 = vmatpush3.bf16.msra.mxu0 %v7209_v14 }
 0x1f3   : > { %v1619_v60 = vsel %vm1205_vm9, %v1616_v52, %v1618_v0  ;;  %v1621_v15 = vsel %vm1205_vm9, %v1618_v0, %v1620_v24  ;;  %v6343_v21 = vpop.f32.mrf.mxu1  ;;  %v6389_v10 = vpop.f32.mrf.mxu0  ;;  %v7210_v52 = vld [vmem:[%s10840_s4 + $0x4c8] sm:$0xff]  }
 0x1f4   : > { %v1643_v56 = vmul.f32 %v1619_v60, %v8058_v44  ;;  %v1644_v2 = vmul.f32 %v1621_v15, %v8131_v59  ;;  %v1602_v49 = vpop.permute.xlu1 %1601  ;;  %v6344_v36 = vadd.f32 %v6343_v21, %v6342_v48  ;;  %5421 = vmatmul.mubr.bf16.gmra.mxu0 %v2688_v11  ;;  %v6390_v62 = vadd.f32 %v6389_v10, %v6388_v12 }
 0x1f5   : > { %v1622_v0 = vrot.slane %v1602_v49, 5  ;;  %v6345_v55 = vpop.f32.mrf.mxu1  ;;  %v9611_v15 = vmul.f32 %v1552_v7, %v8058_v44  ;;  %5428 = vmatprep.mubr.bf16.mxu0 %v2732_v63  ;;  %v6391_v48 = vpop.f32.mrf.mxu0  ;;  %v1557_v12 = vrot.slane %v9517_v5, 6  ;;  %6660 = vmatprep.subr.bf16.mxu0 %v7210_v52 }
 0x1f6   : > { %v9616_v4 = vpack.c.bf16 %v1644_v2, %v1643_v56  ;;  %1932 = vperm.xlu1 %7024, %v9621_v46   ;;  %v5039_v11 = vadd.f32 %v6344_v36, %v9370_v19  ;;  %v7211_v56 = vld [vmem:[%s10840_s4 + $0x488] sm:$0xff]   ;;  %v2741_v2 = vshll.u32 %v9597_v28, 16  ;;  %v7212_v36 = vld [vmem:[%s10840_s4 + $0x4c0] sm:$0xff]  }
 0x1f7   : > { %v1623_v7 = vsel %vm1205_vm9, %v1620_v24, %v1622_v0  ;;  %v1625_v53 = vsel %vm1205_vm9, %v1622_v0, %v1624_v54  ;;  %v6346_v21 = vpop.f32.mrf.mxu1  ;;  %v6392_v24 = vpop.f32.mrf.mxu0  ;;  %v1584_v52 = vpack.c.bf16 %v9614_v29, %v9611_v15  ;;  %v1558_v50 = vsel %vm448_vm2, %v1555_v26, %v1557_v12  ;;  %6661 = vmatpush3.bf16.msra.mxu0 %v7211_v56  ;;  %v7213_v29 = vld [vmem:[%s10840_s4 + $0x480] sm:$0xff]  }
 0x1f8   : > { %v2746_v49 = vshll.u32 %v9616_v4, 16  ;;  %v1645_v63 = vmul.f32 %v1623_v7, %v8159_v61  ;;  %v1646_v19 = vmul.f32 %v1625_v53, %v8213_v58  ;;  %v1608_v10 = vpop.permute.xlu1 %1607  ;;  %v6347_v14 = vadd.f32 %v6346_v21, %v6345_v55  ;;  %v9656_v55 = vld [vmem:[%s10837_s1 + $0x18] sm:$0xff]  ;;  %6662 = vmatprep.subr.bf16.mxu0 %v7212_v36 }
 0x1f9   : > { %v9640_v0 = vadd.f32 %v6390_v62, %v5039_v11  ;;  %v1626_v31 = vrot.slane %v1608_v10, 5  ;;  %v6348_v60 = vpop.f32.mrf.mxu1  ;;  %v6393_v3 = vadd.f32 %v6392_v24, %v6391_v48  ;;  %v1556_v7 = vsel %vm448_vm2, %v1553_v39, %v1555_v26  ;;  %v6394_v62 = vpop.f32.mrf.mxu0 }
 0x1fa   : > { %v9651_v53 = vpack.c.bf16 %v1646_v19, %v1645_v63  ;;  %1935 = vperm.xlu1 %7024, %v9656_v55   ;;  %v5042_v39 = vadd.f32 %v6347_v14, %v9391_v17  ;;  %v2743_v48 = vrot.slane %v2741_v2, 1  ;;  %v2748_v20 = vrot.slane %v2746_v49, 1  ;;  %v9690_v49 = vld [vmem:[%s10837_s1 + $0x28] sm:$0xff] }
 0x1fb   : > { %v1627_v22 = vsel %vm1205_vm9, %v1624_v54, %v1626_v31  ;;  %v1629_v34 = vsel %vm1205_vm9, %v1626_v31, %v1628_v13  ;;  %v6349_v15 = vpop.f32.mrf.mxu1  ;;  %v6395_v11 = vpop.f32.mrf.mxu0  ;;  %v7230_v54 = vld [vmem:[%s10840_s4 + $0x5f8] sm:$0xff]   ;;  %v2739_v2 = vshrl.u32 %v9597_v28, 16  ;;  %v2750_v10 = vshrl.u32 %v9616_v4, 16  ;;  %6663 = vmatpush3.bf16.msra.mxu0 %v7213_v29 }
 0x1fc   : > { %v1647_v27 = vmul.f32 %v1627_v22, %v8455_v37  ;;  %v1648_v26 = vmul.f32 %v1629_v34, %v8832_v41  ;;  %v1614_v17 = vpop.permute.xlu1 %1613  ;;  %v2754_v31 = vshll.u32 %v9651_v53, 16  ;;  %v6350_v21 = vadd.f32 %v6349_v15, %v6348_v60  ;;  %5429 = vmatmul.mubr.bf16.gmra.mxu0 %v9551_v33  ;;  %6740 = vmatprep.subr.bf16.mxu0 %v7230_v54 }
 0x1fd   : > { %v9680_v56 = vadd.f32 %v6393_v3, %v5042_v39  ;;  %v1630_v63 = vrot.slane %v1614_v17, 5  ;;  %v6351_v19 = vpop.f32.mrf.mxu1  ;;  %v6396_v60 = vadd.f32 %v6395_v11, %v6394_v62  ;;  %v6397_v3 = vpop.f32.mrf.mxu0  ;;  %v2971_v36 = vrot.slane %v1583_v35, 1 }
 0x1fe   : > { %v9685_v24 = vpack.c.bf16 %v1648_v26, %v1647_v27  ;;  %1941 = vperm.xlu1 %7024, %v9690_v49   ;;  %v1579_v14 = vmul.f32 %v1558_v50, %v8213_v58  ;;  %v5047_v33 = vadd.f32 %v6350_v21, %v9418_v47  ;;  %v1578_v39 = vmul.f32 %v1556_v7, %v8159_v61 }
 0x1ff   : > { %v1631_v28 = vsel %vm1205_vm9, %v1628_v13, %v1630_v63  ;;  %v6352_v4 = vpop.f32.mrf.mxu1  ;;  %v6398_v34 = vpop.f32.mrf.mxu0  ;;  %v2744_v15 = vor.u32 %v2743_v48, %v2739_v2  ;;  %v2752_v27 = vor.u32 %v2750_v10, %v2748_v20  ;;  %v2756_v18 = vrot.slane %v2754_v31, 1 }
 0x200   : > { %v1649_v22 = vmul.f32 %v1631_v28, %v9211_v45  ;;  %v6353_v62 = vadd.f32 %v6352_v4, %v6351_v19  ;;  %v9700_v35 = vadd.f32 %v6396_v60, %v5047_v33  ;;  %v6399_v47 = vadd.f32 %v6398_v34, %v6397_v3 }
 0x201   : > { %v6354_v50 = vpop.f32.mrf.mxu1  ;;  %v9702_v26 = vpop.permute.xlu1 %1543  ;;  %v9704_v17 = vrot.slane %v1584_v52, 1  ;;  %v2762_v13 = vshll.u32 %v9685_v24, 16  ;;  %v10938_v7 = vmov 23   ;;  %v2749_v48 = vsel %vm2245_vm7, %v2744_v15, %v2748_v20 }
 0x202   : > { %v9707_v29 = vpack.c.bf16 %v1649_v22, %v1649_v22  ;;  %7026 = vset.pattern.permute.xlu1 %v10938_v7  ;;  %v6400_v11 = vpop.f32.mrf.mxu0  ;;  %v2758_v54 = vshrl.u32 %v9651_v53, 16  ;;  %v5050_v21 = vadd.f32 %v6353_v62, %v9504_v32  ;;  %v2757_v31 = vsel %vm2245_vm7, %v2752_v27, %v2756_v18 }
 0x203   : > { %v6355_v63 = vpop.f32.mrf.mxu1  ;;  %1999 = vperm.xlu1 %7026, %v9264_v43   ;;  %v1585_v52 = vpack.c.bf16 %v1579_v14, %v1578_v39  ;;  %v2766_v19 = vshrl.u32 %v9685_v24, 16  ;;  %v1561_v10 = vrot.slane %v9702_v26, 6  ;;  %v2974_v53 = vrot.slane %v2749_v48, 1  ;;  %v7215_v24 = vld [vmem:[%s10840_s4 + $0x538] sm:$0xff]  }
 0x204   : > { %v2770_v2 = vshll.u32 %v9707_v29, 16  ;;  %v6356_v60 = vadd.f32 %v6355_v63, %v6354_v50  ;;  %v6401_v3 = vpop.f32.mrf.mxu0  ;;  %v9718_v33 = vadd.f32 %v6399_v47, %v5050_v21  ;;  %v2975_v28 = vrot.slane %v2757_v31, 1 }
 0x205   : > { %v6357_v20 = vpop.f32.mrf.mxu1  ;;  %v6402_v32 = vadd.f32 %v6401_v3, %v6400_v11  ;;  %v2760_v14 = vor.u32 %v2758_v54, %v2756_v18  ;;  %v2764_v39 = vrot.slane %v2762_v13, 1  ;;  %v2973_v15 = vsel %vm1411_vm6, %v2971_v36, %v9704_v17 }
 0x206   : > { %v9720_v4 = vrot.slane %v2770_v2, 1  ;;  %v5055_v43 = vadd.f32 %v6356_v60, %v9507_v9  ;;  %v1724_v22 = vpop.permute.xlu1 %1723  ;;  %v2976_v34 = vsel %vm1411_vm6, %v2974_v53, %v2975_v28  ;;  %v6403_v50 = vpop.f32.mrf.mxu0  ;;  %v9730_v47 = vrot.slane %v1585_v52, 1  ;;  %v7216_v9 = vld [vmem:[%s10840_s4 + $0x570] sm:$0xff]  }
 0x207   : > { %v1749_v27 = vrot.slane %v1724_v22, 5  ;;  %v6358_v62 = vpop.f32.mrf.mxu1  ;;  %2003 = vperm.xlu1 %7026, %v9621_v46   ;;  %5468 = vmatprep.mubr.bf16.mxu1 %v2976_v34  ;;  %v2765_v11 = vsel %vm2245_vm7, %v2760_v14, %v2764_v39  ;;  %v2768_v48 = vor.u32 %v2766_v19, %v2764_v39  ;;  %v10939_v36 = vrot.slane %v9476_v6, 6 }
 0x208   : > { %v6359_v18 = vadd.f32 %v6358_v62, %v6357_v20  ;;  %v9735_v13 = vadd.f32 %v6402_v32, %v5055_v43  ;;  %5469 = vmatmul.mubr.bf16.vlgmr.msra.gmra.mxu1 %v2973_v15  ;;  %v10940_v21 = vrot.slane %v9604_v30, 5  ;;  %v3006_v2 = vrot.slane %v2765_v11, 1  ;;  %v6404_v60 = vpop.f32.mrf.mxu0  ;;  %v7217_v43 = vld [vmem:[%s10840_s4 + $0x530] sm:$0xff]  }
 0x209   : > { %v1562_v54 = vsel %vm448_vm2, %v10939_v36, %v1561_v10  ;;  %v1775_v31 = vmul.f32 %v1749_v27, %v8034_v57  ;;  %v6360_v52 = vpop.f32.mrf.mxu1  ;;  %v6405_v53 = vadd.f32 %v6404_v60, %v6403_v50  ;;  %v9751_v32 = vsel %vm2245_vm7, %v2768_v48, %v9720_v4  ;;  %6695 = vmatpush3.bf16.msra.mxu1 %v7215_v24  ;;  %v7218_v24 = vld [vmem:[%s10840_s4 + $0x568] sm:$0xff]   ;;  %v1736_v50 = vpop.permute.xlu0 %1735 }
 0x20a   : > { %v1751_v63 = vsel %vm1205_vm9, %v1749_v27, %v10940_v21  ;;  %v5058_v19 = vadd.f32 %v6359_v18, %v9527_v16  ;;  %v1730_v20 = vpop.permute.xlu1 %1729  ;;  %v1563_v22 = vrot.slane %v9515_v8, 6  ;;  %v10941_v14 = vmov %v10939_v36  ;;  %6696 = vmatprep.subr.bf16.mxu1 %v7216_v9 }
 0x20b   : > { %v1776_v3 = vmul.f32 %v1751_v63, %v8058_v44  ;;  %v1560_v39 = vsel %vm448_vm2, %v1557_v12, %v10941_v14  ;;  %v3007_v16 = vsel %vm1411_vm6, %v2975_v28, %v3006_v2  ;;  %v1752_v34 = vrot.slane %v1730_v20, 5  ;;  %v6361_v15 = vpop.f32.mrf.mxu1  ;;  %v6406_v62 = vpop.f32.mrf.mxu0 }
 0x20c   : > { %v10942_v27 = vmov 22   ;;  %v1581_v8 = vmul.f32 %v1562_v54, %v8832_v41  ;;  %5476 = vmatprep.mubr.bf16.mxu1 %v3007_v16  ;;  %v6362_v6 = vadd.f32 %v6361_v15, %v6360_v52  ;;  %v9768_v5 = vadd.f32 %v6405_v53, %v5058_v19 }
 0x20d   : > { %7027 = vset.pattern.permute.xlu1 %v10942_v27  ;;  %v3028_v12 = vrot.slane %v9751_v32, 1  ;;  %v9772_v28 = vpack.c.bf16 %v1776_v3, %v1775_v31  ;;  %v6363_v18 = vpop.f32.mrf.mxu1  ;;  %v6407_v11 = vpop.f32.mrf.mxu0  ;;  %v1756_v9 = vrot.slane %v1736_v50, 5  ;;  %v1580_v48 = vmul.f32 %v1560_v39, %v8455_v37  ;;  %6697 = vmatpush3.bf16.msra.mxu1 %v7217_v43  ;;  %v7225_v32 = vld [vmem:[%s10840_s4 + $0x510] sm:$0xff]  }
 0x20e   : > { %1944 = vperm.xlu1 %7027, %v9486_v25   ;;  %v5063_v36 = vadd.f32 %v6362_v6, %v9529_v42  ;;  %v3005_v54 = vsel %vm1411_vm6, %v9704_v17, %v9730_v47  ;;  %v1733_v21 = vpop.permute.xlu1 %1732  ;;  %v10943_v63 = vrot.slane %v9604_v30, 5  ;;  %v6408_v60 = vadd.f32 %v6407_v11, %v6406_v62  ;;  %6698 = vmatprep.subr.bf16.mxu1 %v7218_v24  ;;  %v7219_v42 = vld [vmem:[%s10840_s4 + $0x528] sm:$0xff]   ;;  %v9809_v50 = vpop.permute.xlu0 %1744  ;;  %v7221_v11 = vld [vmem:[%s10840_s4 + $0x520] sm:$0xff]  }
 0x20f   : > { %v1754_v52 = vrot.slane %v1733_v21, 5  ;;  %v6364_v31 = vpop.f32.mrf.mxu1  ;;  %v6409_v3 = vpop.f32.mrf.mxu0  ;;  %v2774_v19 = vshrl.u32 %v9707_v29, 16  ;;  %v1564_v17 = vsel %vm448_vm2, %v1561_v10, %v1563_v22  ;;  %v3029_v30 = vsel %vm1411_vm6, %v3006_v2, %v3028_v12  ;;  %v7220_v29 = vld [vmem:[%s10840_s4 + $0x560] sm:$0xff]   ;;  %v7222_v21 = vld [vmem:[%s10840_s4 + $0x558] sm:$0xff]  }
 0x210   : > { %v1753_v25 = vsel %vm1205_vm9, %v10943_v63, %v1752_v34  ;;  %v6365_v20 = vadd.f32 %v6364_v31, %v6363_v18  ;;  %v10944_v53 = vmov 25   ;;  %v1586_v43 = vpack.c.bf16 %v1581_v8, %v1580_v48  ;;  %5477 = vmatmul.mubr.bf16.gmra.mxu1 %v3005_v54 }
 0x211   : > { %v2780_v14 = vshll.u32 %v9772_v28, 16  ;;  %v1755_v39 = vsel %vm1205_vm9, %v1752_v34, %v1754_v52  ;;  %v9798_v26 = vadd.f32 %v6408_v60, %v5063_v36  ;;  %v6366_v10 = vpop.f32.mrf.mxu1  ;;  %v6410_v22 = vpop.f32.mrf.mxu0  ;;  %v9802_v2 = vor.u32 %v2774_v19, %v9720_v4  ;;  %5484 = vmatprep.mubr.bf16.mxu1 %v3029_v30  ;;  %6699 = vmatpush3.bf16.msra.mxu1 %v7219_v42  ;;  %v7303_v60 = vld [vmem:[%s10837_s1 + $0x8] sm:$0xff] }
 0x212   : > { %7028 = vset.pattern.permute.xlu1 %v10944_v53  ;;  %v1777_v16 = vmul.f32 %v1753_v25, %v8131_v59  ;;  %v1778_v15 = vmul.f32 %v1755_v39, %v8159_v61  ;;  %v5066_v62 = vadd.f32 %v6365_v20, %v9546_v38  ;;  %v9807_v24 = vpop.permute.xlu1 %1738  ;;  %v1757_v34 = vsel %vm1205_vm9, %v1754_v52, %v1756_v9  ;;  %v7223_v39 = vld [vmem:[%s10840_s4 + $0x518] sm:$0xff]  }
 0x213   : > { %2112 = vperm.xlu1 %7028, %v9581_v51   ;;  %v1758_v8 = vrot.slane %v9807_v24, 5  ;;  %v6367_v6 = vpop.f32.mrf.mxu1  ;;  %v6411_v18 = vadd.f32 %v6410_v22, %v6409_v3  ;;  %v1582_v4 = vmul.f32 %v1564_v17, %v9211_v45  ;;  %v9817_v54 = vrot.slane %v1586_v43, 1  ;;  %6700 = vmatprep.subr.bf16.mxu1 %v7220_v29  ;;  %v7232_v24 = vld [vmem:[%s10840_s4 + $0x5f0] sm:$0xff]  }
 0x214   : > { %v1785_v48 = vpack.c.bf16 %v1778_v15, %v1777_v16  ;;  %v6368_v38 = vadd.f32 %v6367_v6, %v6366_v10  ;;  %v6412_v36 = vpop.f32.mrf.mxu0  ;;  %v2782_v63 = vrot.slane %v2780_v14, 1  ;;  %v3050_v3 = vrot.slane %v9802_v2, 1  ;;  %v1748_v6 = vpop.permute.xlu0 %1747  ;;  %v7229_v2 = vld [vmem:[%s10840_s4 + $0x500] sm:$0xff]  }
 0x215   : > { %v1759_v25 = vsel %vm1205_vm9, %v1756_v9, %v1758_v8  ;;  %v9825_v52 = vadd.f32 %v6411_v18, %v5066_v62  ;;  %v6369_v31 = vpop.f32.mrf.mxu1  ;;  %v1779_v19 = vmul.f32 %v1757_v34, %v8213_v58  ;;  %v1587_v14 = vpack.c.bf16 %v1582_v4, %v1582_v4  ;;  %6701 = vmatpush3.bf16.msra.mxu1 %v7221_v11  ;;  %v7224_v62 = vld [vmem:[%s10840_s4 + $0x550] sm:$0xff]  }
 0x216   : > { %v2785_v42 = vshll.u32 %v1785_v48, 16  ;;  %v1780_v17 = vmul.f32 %v1759_v25, %v8455_v37  ;;  %v5071_v20 = vadd.f32 %v6368_v38, %v9568_v23  ;;  %v6413_v30 = vpop.f32.mrf.mxu0  ;;  %v2778_v10 = vshrl.u32 %v9772_v28, 16  ;;  %6702 = vmatprep.subr.bf16.mxu1 %v7222_v21 }
 0x217   : > { %2115 = vperm.xlu1 %7028, %v7303_v60   ;;  %v6370_v43 = vpop.f32.mrf.mxu1  ;;  %v6414_v9 = vadd.f32 %v6413_v30, %v6412_v36  ;;  %v1657_v29 = vpop.permute.xlu1 %1656  ;;  %v3027_v16 = vsel %vm1411_vm6, %v9730_v47, %v9817_v54  ;;  %v1762_v34 = vrot.slane %v9809_v50, 5  ;;  %v3051_v28 = vsel %vm1411_vm6, %v3028_v12, %v3050_v3 }
 0x218   : > { %v9838_v22 = vpack.c.bf16 %v1780_v17, %v1779_v19  ;;  %v2787_v15 = vrot.slane %v2785_v42, 1  ;;  %v6415_v23 = vpop.f32.mrf.mxu0  ;;  %5485 = vmatmul.mubr.bf16.gmra.mxu1 %v3027_v16  ;;  %v1764_v47 = vrot.slane %v1748_v6, 5  ;;  %v2783_v4 = vor.u32 %v2782_v63, %v2778_v10  ;;  %v9871_v42 = vld [vmem:[%s10837_s1 + $0x20] sm:$0xff]  ;;  %v7227_v16 = vld [vmem:[%s10840_s4 + $0x508] sm:$0xff]  }
 0x219   : > { %v9847_v18 = vadd.f32 %v6414_v9, %v5071_v20  ;;  %v2789_v11 = vshrl.u32 %v1785_v48, 16  ;;  %5492 = vmatprep.mubr.bf16.mxu1 %v3051_v28  ;;  %v1685_v21 = vrot.slane %v9557_v40, 6  ;;  %v1682_v25 = vrot.slane %v1657_v29, 6  ;;  %6703 = vmatpush3.bf16.msra.mxu1 %v7223_v39  ;;  %v7226_v40 = vld [vmem:[%s10840_s4 + $0x548] sm:$0xff]   ;;  %v6434_v17 = vpop.f32.mrf.mxu1  ;;  %v7228_v28 = vld [vmem:[%s10840_s4 + $0x540] sm:$0xff]  }
 0x21a   : > { %v2793_v38 = vshll.u32 %v9838_v22, 16  ;;  %v6416_v36 = vpop.f32.mrf.mxu0  ;;  %v9857_v60 = vrot.slane %v1587_v14, 1  ;;  %v2788_v19 = vsel %vm2245_vm7, %v2783_v4, %v2787_v15  ;;  %6704 = vmatprep.subr.bf16.mxu1 %v7224_v62  ;;  %v1765_v20 = vsel %vm1205_vm9, %v1762_v34, %v1764_v47 }
 0x21b   : > { %2121 = vperm.xlu1 %7028, %v9656_v55   ;;  %v1660_v31 = vpop.permute.xlu1 %1659  ;;  %v2791_v63 = vor.u32 %v2789_v11, %v2787_v15  ;;  %v6435_v14 = vpop.f32.mrf.mxu1  ;;  %v2980_v39 = vrot.slane %v2788_v19, 1  ;;  %v1783_v47 = vmul.f32 0.0, %v1765_v20  ;;  %v1708_v4 = vmul.f32 %v1682_v25, %v8034_v57 }
 0x21c   : > { %v1683_v12 = vrot.slane %v1660_v31, 6  ;;  %v9863_v48 = vrot.slane %v2793_v38, 1  ;;  %v3049_v23 = vsel %vm1411_vm6, %v9817_v54, %v9857_v60  ;;  %v6436_v6 = vadd.f32 %v6435_v14, %v6434_v17 }
 0x21d   : > { %6705 = vmatpush3.bf16.msra.mxu1 %v7225_v32  ;;  %v6437_v11 = vpop.f32.mrf.mxu1 }
 0x21e   : > { %v1684_v30 = vsel %vm448_vm2, %v1682_v25, %v1683_v12  ;;  %v9880_v43 = vsel %vm2245_vm7, %v2791_v63, %v9863_v48  ;;  %v1686_v15 = vsel %vm448_vm2, %v1683_v12, %v1685_v21  ;;  %6706 = vmatprep.subr.bf16.mxu1 %v7226_v40  ;;  %v9908_v36 = vadd.f32 %v6436_v6, %v9640_v0  ;;  %v7246_v0 = vld [vmem:[%s10840_s4 + $0x678] sm:$0xff]  }
 0x21f   : > { %2124 = vperm.xlu1 %7028, %v9871_v42   ;;  %v1709_v9 = vmul.f32 %v1684_v30, %v8058_v44  ;;  %v9883_v29 = vpop.permute.xlu1 %1665  ;;  %v2981_v10 = vrot.slane %v9880_v43, 1  ;;  %v1710_v25 = vmul.f32 %v1686_v15, %v8131_v59  ;;  %v6438_v12 = vpop.f32.mrf.mxu1 }
 0x220   : > { %v1687_v62 = vrot.slane %v9883_v29, 6  ;;  %5493 = vmatmul.mubr.bf16.gmra.mxu1 %v3049_v23  ;;  %v6439_v19 = vadd.f32 %v6438_v12, %v6437_v11  ;;  %v9925_v30 = vpop.permute.xlu0 %1857 }
 0x221   : > { %v2982_v38 = vsel %vm1411_vm6, %v2980_v39, %v2981_v10  ;;  %5500 = vmatprep.mubr.bf16.mxu1 %v3050_v3  ;;  %v1717_v31 = vpack.c.bf16 %v1709_v9, %v1708_v4  ;;  %6707 = vmatpush3.bf16.msra.mxu1 %v7227_v16 }
 0x222   : > { %v1688_v54 = vsel %vm448_vm2, %v1685_v21, %v1687_v62  ;;  %5540 = vmatprep.mubr.bf16.mxu0 %v2982_v38  ;;  %6708 = vmatprep.subr.bf16.mxu1 %v7228_v28  ;;  %v9919_v21 = vpack.c.bf16 %v1783_v47, %v1783_v47  ;;  %v6440_v17 = vpop.f32.mrf.mxu1  ;;  %v9922_v20 = vadd.f32 %v6439_v19, %v9680_v56  ;;  %v7231_v56 = vld [vmem:[%s10840_s4 + $0x5b8] sm:$0xff]   ;;  %v2797_v38 = vshrl.u32 %v9838_v22, 16  ;;  %v7234_v19 = vld [vmem:[%s10840_s4 + $0x5e8] sm:$0xff]  }
 0x223   : > { %7030 = vset.pattern.permute.xlu1 %v10938_v7  ;;  %v1711_v32 = vmul.f32 %v1688_v54, %v8159_v61  ;;  %v2977_v9 = vrot.slane %v1717_v31, 1  ;;  %v10945_v54 = vmov 24  }
 0x224   : > { %2011 = vperm.xlu1 %7030, %v9871_v42   ;;  %v1742_v3 = vpop.permute.xlu1 %1741  ;;  %v6441_v15 = vpop.f32.mrf.mxu1  ;;  %v2809_v50 = vshll.u32 %v9919_v21, 16  ;;  %v2799_v22 = vor.u32 %v2797_v38, %v9863_v48  ;;  %v7235_v48 = vld [vmem:[%s10840_s4 + $0x5a8] sm:$0xff]  }
 0x225   : > { %v1718_v63 = vpack.c.bf16 %v1711_v32, %v1710_v25  ;;  %v1760_v40 = vrot.slane %v1742_v3, 5  ;;  %6709 = vmatpush3.bf16.msra.mxu1 %v7229_v2  ;;  %v6442_v6 = vadd.f32 %v6441_v15, %v6440_v17  ;;  %v9951_v11 = vpop.permute.xlu0 %1866 }
 0x226   : > { %6786 = vmatprep.subr.bf16.mxu1 %v7246_v0 }
 0x227   : > { %v9927_v14 = vrot.slane %v1718_v63, 1  ;;  %v1761_v39 = vsel %vm1205_vm9, %v1758_v8, %v1760_v40  ;;  %v1763_v16 = vsel %vm1205_vm9, %v1760_v40, %v1762_v34  ;;  %v6443_v8 = vpop.f32.mrf.mxu1  ;;  %v9949_v47 = vadd.f32 %v6442_v6, %v9700_v35 }
 0x228   : > { %7031 = vset.pattern.permute.xlu1 %v10942_v27  ;;  %v1781_v27 = vmul.f32 %v1761_v39, %v8832_v41  ;;  %v1782_v23 = vmul.f32 %v1763_v16, %v9211_v45  ;;  %5501 = vmatmul.mubr.bf16.gmra.mxu1 %v9857_v60  ;;  %v7233_v60 = vld [vmem:[%s10840_s4 + $0x5b0] sm:$0xff]   ;;  %v9959_v35 = vrot.slane %v2809_v50, 1  ;;  %v1883_v50 = vrot.slane %v9925_v30, 2 }
 0x229   : > { %1950 = vperm.xlu1 %7031, %v9522_v1   ;;  %v1669_v1 = vpop.permute.xlu1 %1668  ;;  %v2979_v34 = vsel %vm1411_vm6, %v2977_v9, %v9927_v14  ;;  %v6444_v25 = vpop.f32.mrf.mxu1  ;;  %v1888_v30 = vrot.slane %v9951_v11, 2 }
 0x22a   : > { %v1787_v28 = vpack.c.bf16 %v1782_v23, %v1781_v27  ;;  %v1689_v4 = vrot.slane %v1669_v1, 6  ;;  %5541 = vmatmul.mubr.bf16.vlgmr.msra.gmra.mxu0 %v2979_v34  ;;  %v6445_v32 = vadd.f32 %v6444_v25, %v6443_v8  ;;  %v7236_v23 = vld [vmem:[%s10840_s4 + $0x5e0] sm:$0xff]  }
 0x22b   : > { %6741 = vmatpush3.bf16.msra.mxu0 %v7231_v56  ;;  %v6446_v3 = vpop.f32.mrf.mxu1 }
 0x22c   : > { %v2801_v31 = vshll.u32 %v1787_v28, 16  ;;  %6742 = vmatprep.subr.bf16.mxu0 %v7232_v24  ;;  %v2805_v12 = vshrl.u32 %v1787_v28, 16  ;;  %v1690_v63 = vsel %vm448_vm2, %v1687_v62, %v1689_v4 }
 0x22d   : > { %7032 = vset.pattern.permute.xlu1 %v10945_v54  ;;  %v9961_v2 = vpop.permute.xlu1 %1671  ;;  %v6447_v17 = vpop.f32.mrf.mxu1  ;;  %v1712_v16 = vmul.f32 %v1690_v63, %v8213_v58 }
 0x22e   : > { %2045 = vperm.xlu1 %7032, %v9581_v51   ;;  %v2803_v0 = vrot.slane %v2801_v31, 1  ;;  %v9971_v51 = vadd.f32 %v6445_v32, %v9718_v33  ;;  %v1691_v40 = vrot.slane %v9961_v2, 6  ;;  %v6448_v29 = vadd.f32 %v6447_v17, %v6446_v3  ;;  %v9982_v33 = vpop.permute.xlu0 %1872  ;;  %v7239_v3 = vld [vmem:[%s10840_s4 + $0x598] sm:$0xff]  }
 0x22f   : > { %6743 = vmatpush3.bf16.msra.mxu0 %v7233_v60  ;;  %v6449_v56 = vpop.f32.mrf.mxu1  ;;  %v7247_v2 = vld [vmem:[%s10840_s4 + $0x638] sm:$0xff]  }
 0x230   : > { %v1692_v9 = vsel %vm448_vm2, %v1689_v4, %v1691_v40  ;;  %v2804_v62 = vsel %vm2245_vm7, %v2799_v22, %v2803_v0  ;;  %v2807_v39 = vor.u32 %v2805_v12, %v2803_v0  ;;  %6744 = vmatprep.subr.bf16.mxu0 %v7234_v19  ;;  %v9990_v6 = vadd.f32 %v6448_v29, %v9735_v13  ;;  %v7237_v13 = vld [vmem:[%s10840_s4 + $0x5a0] sm:$0xff]   ;;  %v7240_v0 = vld [vmem:[%s10840_s4 + $0x5d0] sm:$0xff]  }
 0x231   : > { %v1713_v15 = vmul.f32 %v1692_v9, %v8455_v37  ;;  %v3010_v27 = vrot.slane %v2804_v62, 1  ;;  %v6450_v8 = vpop.f32.mrf.mxu1 }
 0x232   : > { %2051 = vperm.xlu1 %7032, %v9621_v46   ;;  %v1861_v46 = vpop.permute.xlu1 %1860  ;;  %v9994_v24 = vsel %vm2245_vm7, %v2807_v39, %v9959_v35  ;;  %v6451_v4 = vadd.f32 %v6450_v8, %v6449_v56  ;;  %v10015_v32 = vpop.permute.xlu0 %1875 }
 0x233   : > { %v1884_v1 = vrot.slane %v1861_v46, 2  ;;  %v3011_v34 = vsel %vm1411_vm6, %v2981_v10, %v3010_v27  ;;  %v1719_v28 = vpack.c.bf16 %v1713_v15, %v1712_v16  ;;  %6745 = vmatpush3.bf16.msra.mxu0 %v7235_v48  ;;  %v3032_v38 = vrot.slane %v9994_v24, 1  ;;  %v6452_v31 = vpop.f32.mrf.mxu1  ;;  %v10036_v48 = vld [vmem:[%s10837_s1 + $0x38] sm:$0xff] }
 0x234   : > { %5548 = vmatprep.mubr.bf16.mxu0 %v3011_v34  ;;  %6746 = vmatprep.subr.bf16.mxu0 %v7236_v23  ;;  %v10010_v43 = vadd.f32 %v6451_v4, %v9768_v5  ;;  %v1892_v16 = vrot.slane %v9982_v33, 2  ;;  %v10184_v33 = vld [vmem:[%s10837_s1] sm:$0xff] }
 0x235   : > { %v1885_v25 = vsel %vm419_vm5, %v1883_v50, %v1884_v1  ;;  %v10007_v60 = vrot.slane %v1719_v28, 1  ;;  %v6453_v22 = vpop.f32.mrf.mxu1  ;;  %v3033_v19 = vsel %vm1411_vm6, %v3010_v27, %v3032_v38  ;;  %v7241_v27 = vld [vmem:[%s10840_s4 + $0x590] sm:$0xff]  }
 0x236   : > { %2054 = vperm.xlu1 %7032, %v9656_v55   ;;  %v1864_v10 = vpop.permute.xlu1 %1863  ;;  %v7238_v55 = vld [vmem:[%s10840_s4 + $0x5d8] sm:$0xff]   ;;  %v1911_v5 = vmul.f32 %v1885_v25, %v8058_v44  ;;  %v6454_v17 = vadd.f32 %v6453_v22, %v6452_v31  ;;  %v1794_v8 = vpop.permute.xlu0 %1793  ;;  %v7244_v22 = vld [vmem:[%s10840_s4 + $0x5c0] sm:$0xff]  }
 0x237   : > { %v1886_v12 = vrot.slane %v1864_v10, 2  ;;  %v3009_v11 = vsel %vm1411_vm6, %v9927_v14, %v10007_v60  ;;  %6747 = vmatpush3.bf16.msra.mxu0 %v7237_v13  ;;  %v6455_v39 = vpop.f32.mrf.mxu1  ;;  %v10062_v10 = vld [vmem:[%s10837_s1 + $0x30] sm:$0xff] }
 0x238   : > { %5549 = vmatmul.mubr.bf16.gmra.mxu0 %v3009_v11  ;;  %6748 = vmatprep.subr.bf16.mxu0 %v7238_v55  ;;  %v10044_v15 = vadd.f32 %v6454_v17, %v9798_v26 }
 0x239   : > { %v1887_v14 = vsel %vm419_vm5, %v1884_v1, %v1886_v12  ;;  %v1889_v63 = vsel %vm419_vm5, %v1886_v12, %v1888_v30  ;;  %5556 = vmatprep.mubr.bf16.mxu0 %v3033_v19  ;;  %v7242_v1 = vld [vmem:[%s10840_s4 + $0x5c8] sm:$0xff]  }
 0x23a   : > { %7035 = vset.pattern.permute.xlu1 %v10944_v53  ;;  %v1910_v53 = vmul.f32 %v1883_v50, %v8034_v57  ;;  %v1912_v9 = vmul.f32 %v1887_v14, %v8131_v59  ;;  %v1913_v29 = vmul.f32 %v1889_v63, %v8159_v61  ;;  %v1870_v62 = vpop.permute.xlu1 %1869  ;;  %v6456_v50 = vpop.f32.mrf.mxu1  ;;  %v7243_v12 = vld [vmem:[%s10840_s4 + $0x588] sm:$0xff]  }
 0x23b   : > { %2133 = vperm.xlu1 %7035, %v10036_v48   ;;  %v1890_v56 = vrot.slane %v1870_v62, 2  ;;  %6749 = vmatpush3.bf16.msra.mxu0 %v7239_v3  ;;  %v6457_v28 = vadd.f32 %v6456_v50, %v6455_v39  ;;  %v7245_v62 = vld [vmem:[%s10840_s4 + $0x580] sm:$0xff]  }
 0x23c   : > { %v1920_v23 = vpack.c.bf16 %v1911_v5, %v1910_v53  ;;  %v1921_v46 = vpack.c.bf16 %v1913_v29, %v1912_v9  ;;  %6750 = vmatprep.subr.bf16.mxu0 %v7240_v0  ;;  %v1817_v0 = vrot.slane %v1794_v8, 4  ;;  %v1803_v53 = vpop.permute.xlu0 %1802 }
 0x23d   : > { %v1891_v34 = vsel %vm419_vm5, %v1888_v30, %v1890_v56  ;;  %v1893_v26 = vsel %vm419_vm5, %v1890_v56, %v1892_v16  ;;  %v6458_v30 = vpop.f32.mrf.mxu1  ;;  %v10066_v31 = vadd.f32 %v6457_v28, %v9825_v52  ;;  %v10946_v28 = vmov 0.0  }
 0x23e   : > { %v2836_v13 = vrot.slane %v1921_v46, 2  ;;  %v1914_v4 = vmul.f32 %v1891_v34, %v8213_v58  ;;  %v1915_v25 = vmul.f32 %v1893_v26, %v8455_v37  ;;  %v2835_v11 = vrot.slane %v1920_v23, 2 }
 0x23f   : > { %7036 = vset.pattern.permute.xlu1 %v10938_v7  ;;  %v1791_v55 = vpop.permute.xlu1 %1790  ;;  %6751 = vmatpush3.bf16.msra.mxu0 %v7241_v27  ;;  %v6459_v5 = vpop.f32.mrf.mxu1 }
 0x240   : > { %2019 = vperm.xlu1 %7036, %v10062_v10   ;;  %v1922_v3 = vpack.c.bf16 %v1915_v25, %v1914_v4  ;;  %6752 = vmatprep.subr.bf16.mxu0 %v7242_v1  ;;  %v6460_v19 = vadd.f32 %v6459_v5, %v6458_v30  ;;  %v1816_v52 = vrot.slane %v1791_v55, 4  ;;  %v2837_v17 = vsel %vm419_vm5, %v2835_v11, %v2836_v13 }
 0x241   : > { %v6461_v63 = vpop.f32.mrf.mxu1  ;;  %v2986_v23 = vrot.slane %v2837_v17, 1  ;;  %v1823_v1 = vrot.slane %v1803_v53, 4 }
 0x242   : > { %v10074_v14 = vrot.slane %v1922_v3, 2  ;;  %v10079_v9 = vadd.f32 %v6460_v19, %v9847_v18  ;;  %v1818_v18 = vsel %vm680_vm3, %v1816_v52, %v1817_v0  ;;  %v1842_v4 = vmul.f32 %v1816_v52, %v8034_v57  ;;  %v10112_v19 = vld [vmem:[%s10837_s1 + $0x40] sm:$0xf] }
 0x243   : > { %v1797_v29 = vpop.permute.xlu1 %1796  ;;  %6753 = vmatpush3.bf16.msra.mxu0 %v7243_v12  ;;  %v6462_v56 = vpop.f32.mrf.mxu1 }
 0x244   : > { %7038 = vset.pattern.permute.xlu1 %v10945_v54  ;;  %v1819_v39 = vrot.slane %v1797_v29, 4  ;;  %v10087_v27 = vsel %vm419_vm5, %v2836_v13, %v10074_v14  ;;  %6754 = vmatprep.subr.bf16.mxu0 %v7244_v22  ;;  %v10097_v13 = vpop.permute.xlu0 %1811 }
 0x245   : > { %2057 = vperm.xlu1 %7038, %v9871_v42   ;;  %v2987_v46 = vrot.slane %v10087_v27, 1 }
 0x246   : > { %v1820_v8 = vsel %vm680_vm3, %v1817_v0, %v1819_v39 }
 0x247   : > { %v1800_v42 = vpop.permute.xlu1 %1799  ;;  %v2988_v50 = vsel %vm1411_vm6, %v2986_v23, %v2987_v46  ;;  %6755 = vmatpush3.bf16.msra.mxu0 %v7245_v62  ;;  %v6480_v26 = vpop.f32.mrf.mxu0  ;;  %v1844_v55 = vmul.f32 %v1820_v8, %v8131_v59 }
 0x248   : > { %v1821_v34 = vrot.slane %v1800_v42, 4  ;;  %5612 = vmatprep.mubr.bf16.mxu1 %v2988_v50  ;;  %6881 = vmatprep.subr.bf16.mxu0 %v10946_v28  ;;  %v10121_v29 = vpop.permute.xlu0 %1814 }
 0x249   : > { %2060 = vperm.xlu1 %7038, %v9690_v49   ;;  %v1843_v49 = vmul.f32 %v1818_v18, %v8058_v44  ;;  %v6481_v30 = vpop.f32.mrf.mxu0 }
 0x24a   : > { %v1822_v25 = vsel %vm680_vm3, %v1819_v39, %v1821_v34  ;;  %v6482_v3 = vadd.f32 %v6481_v30, %v6480_v26  ;;  %v1824_v5 = vsel %vm680_vm3, %v1821_v34, %v1823_v1  ;;  %v2813_v26 = vshrl.u32 %v9919_v21, 16 }
 0x24b   : > { %v1845_v12 = vmul.f32 %v1822_v25, %v8159_v61  ;;  %v10105_v11 = vpop.permute.xlu1 %1805  ;;  %v6483_v0 = vpop.f32.mrf.mxu0  ;;  %v1851_v52 = vpack.c.bf16 %v1843_v49, %v1842_v4  ;;  %v1846_v62 = vmul.f32 %v1824_v5, %v8213_v58 }
 0x24c   : > { %v1825_v22 = vrot.slane %v10105_v11, 4  ;;  %v10116_v17 = vadd.f32 %v6482_v3, %v9908_v36 }
 0x24d   : > { %7039 = vset.pattern.permute.xlu1 %v10938_v7  ;;  %v1852_v63 = vpack.c.bf16 %v1845_v12, %v1844_v55  ;;  %v6484_v53 = vpop.f32.mrf.mxu0  ;;  %v2821_v50 = vrot.slane %v1851_v52, 1  ;;  %v10137_v12 = vpop.permute.xlu0 %1929 }
 0x24e   : > { %2027 = vperm.xlu1 %7039, %v10112_v19   ;;  %v1826_v7 = vsel %vm680_vm3, %v1823_v1, %v1825_v22  ;;  %v6485_v23 = vadd.f32 %v6484_v53, %v6483_v0 }
 0x24f   : > { %v2822_v39 = vrot.slane %v1852_v63, 1  ;;  %v1847_v56 = vmul.f32 %v1826_v7, %v8455_v37  ;;  %v10159_v63 = vor.u32 %v2813_v26, %v9959_v35  ;;  %v7248_v7 = vld [vmem:[%s10840_s4 + $0x670] sm:$0xff]  }
 0x250   : > { %v1675_v18 = vpop.permute.xlu1 %1674  ;;  %v6486_v42 = vpop.f32.mrf.mxu0  ;;  %v10127_v34 = vadd.f32 %v6485_v23, %v9922_v20 }
 0x251   : > { %v1853_v36 = vpack.c.bf16 %v1847_v56, %v1846_v62  ;;  %v1693_v8 = vrot.slane %v1675_v18, 6  ;;  %v2823_v25 = vsel %vm1411_vm6, %v2821_v50, %v2822_v39  ;;  %v10947_v18 = vmov 26   ;;  %v10190_v26 = vpop.permute.xlu0 %1938 }
 0x252   : > { %7040 = vset.pattern.permute.xlu1 %v10945_v54  ;;  %v6487_v1 = vpop.f32.mrf.mxu0  ;;  %v1894_v54 = vrot.slane %v10015_v32, 2  ;;  %v2983_v0 = vrot.slane %v2823_v25, 1  ;;  %v1829_v50 = vrot.slane %v10097_v13, 4 }
 0x253   : > { %2063 = vperm.xlu1 %7040, %v10062_v10   ;;  %v10131_v4 = vrot.slane %v1853_v36, 1  ;;  %v6488_v49 = vadd.f32 %v6487_v1, %v6486_v42  ;;  %v1694_v20 = vsel %vm448_vm2, %v1691_v40, %v1693_v8  ;;  %v1831_v36 = vrot.slane %v10121_v29, 4  ;;  %v7249_v1 = vld [vmem:[%s10840_s4 + $0x630] sm:$0xff]  }
 0x254   : > { %v10135_v30 = vpop.permute.xlu1 %1677  ;;  %v6489_v55 = vpop.f32.mrf.mxu0  ;;  %v1714_v53 = vmul.f32 %v1694_v20, %v8832_v41  ;;  %v1895_v23 = vsel %vm419_vm5, %v1892_v16, %v1894_v54  ;;  %v3054_v29 = vrot.slane %v10159_v63, 1 }
 0x255   : > { %v1695_v3 = vrot.slane %v10135_v30, 6  ;;  %v10144_v21 = vadd.f32 %v6488_v49, %v9949_v47  ;;  %v10149_v5 = vsel %vm1411_vm6, %v2822_v39, %v10131_v4  ;;  %v7250_v49 = vld [vmem:[%s10840_s4 + $0x668] sm:$0xff]   ;;  %v7255_v30 = vld [vmem:[%s10840_s4 + $0x618] sm:$0xff]  }
 0x256   : > { %v6490_v32 = vpop.f32.mrf.mxu0  ;;  %v2984_v52 = vrot.slane %v10149_v5, 1  ;;  %v1953_v5 = vrot.slane %v10137_v12, 1 }
 0x257   : > { %2069 = vperm.xlu1 %7040, %v10112_v19   ;;  %v1696_v40 = vsel %vm448_vm2, %v1693_v8, %v1695_v3  ;;  %v6491_v47 = vadd.f32 %v6490_v32, %v6489_v55  ;;  %v1916_v32 = vmul.f32 %v1895_v23, %v8832_v41  ;;  %v3055_v23 = vsel %vm1411_vm6, %v3032_v38, %v3054_v29 }
 0x258   : > { %v1715_v62 = vmul.f32 %v1696_v40, %v9211_v45  ;;  %v2985_v39 = vsel %vm1411_vm6, %v2983_v0, %v2984_v52  ;;  %v6492_v56 = vpop.f32.mrf.mxu0  ;;  %v1832_v40 = vsel %vm680_vm3, %v1829_v50, %v1831_v36  ;;  %v10227_v36 = vpop.permute.xlu0 %1947 }
 0x259   : > { %v10173_v35 = vadd.f32 %v6491_v47, %v9971_v51  ;;  %v10176_v42 = vpop.permute.xlu1 %1878  ;;  %5613 = vmatmul.mubr.bf16.vlgmr.msra.gmra.mxu1 %v2985_v39  ;;  %v10210_v47 = vld [vmem:[%s10837_s1 + $0x10] sm:$0xff]  ;;  %v1850_v38 = vmul.f32 0.0, %v1832_v40 }
 0x25a   : > { %v1896_v8 = vrot.slane %v10176_v42, 2  ;;  %v6493_v51 = vpop.f32.mrf.mxu0  ;;  %v1720_v16 = vpack.c.bf16 %v1715_v62, %v1714_v53  ;;  %6787 = vmatpush3.bf16.msra.mxu1 %v7247_v2 }
 0x25b   : > { %7042 = vset.pattern.permute.xlu1 %v10947_v18  ;;  %v6494_v13 = vadd.f32 %v6493_v51, %v6492_v56  ;;  %6788 = vmatprep.subr.bf16.mxu1 %v7248_v7 }
 0x25c   : > { %2179 = vperm.xlu1 %7042, %v10184_v33   ;;  %v1897_v25 = vsel %vm419_vm5, %v1894_v54, %v1896_v8  ;;  %v6495_v55 = vpop.f32.mrf.mxu0  ;;  %v10199_v20 = vrot.slane %v1720_v16, 1 }
 0x25d   : > { %v1917_v0 = vmul.f32 %v1897_v25, %v9211_v45  ;;  %v10204_v2 = vadd.f32 %v6494_v13, %v9990_v6  ;;  %v7251_v6 = vld [vmem:[%s10840_s4 + $0x628] sm:$0xff]   ;;  %v10243_v25 = vld [vmem:[%s10837_s1 + $0x18] sm:$0xff] }
 0x25e   : > { %v1809_v54 = vpop.permute.xlu1 %1808  ;;  %v3031_v7 = vsel %vm1411_vm6, %v10007_v60, %v10199_v20  ;;  %v6496_v53 = vpop.f32.mrf.mxu0  ;;  %6789 = vmatpush3.bf16.msra.mxu1 %v7249_v1  ;;  %v7252_v60 = vld [vmem:[%s10840_s4 + $0x660] sm:$0xff]  }
 0x25f   : > { %v1923_v62 = vpack.c.bf16 %v1917_v0, %v1916_v32  ;;  %v1827_v39 = vrot.slane %v1809_v54, 4  ;;  %5557 = vmatmul.mubr.bf16.gmra.mxu0 %v3031_v7  ;;  %v6497_v56 = vadd.f32 %v6496_v53, %v6495_v55  ;;  %6790 = vmatprep.subr.bf16.mxu1 %v7250_v49  ;;  %v7254_v32 = vld [vmem:[%s10840_s4 + $0x658] sm:$0xff]  }
 0x260   : > { %2185 = vperm.xlu1 %7042, %v10210_v47   ;;  %5564 = vmatprep.mubr.bf16.mxu0 %v3055_v23  ;;  %v6498_v18 = vpop.f32.mrf.mxu0 }
 0x261   : > { %v10229_v51 = vrot.slane %v1923_v62, 2  ;;  %v1828_v16 = vsel %vm680_vm3, %v1825_v22, %v1827_v39  ;;  %v1830_v1 = vsel %vm680_vm3, %v1827_v39, %v1829_v50  ;;  %v10236_v24 = vadd.f32 %v6497_v56, %v10010_v43  ;;  %v7253_v22 = vld [vmem:[%s10840_s4 + $0x620] sm:$0xff]   ;;  %v10267_v39 = vld [vmem:[%s10837_s1 + $0x28] sm:$0xff] }
 0x262   : > { %v1848_v13 = vmul.f32 %v1828_v16, %v8832_v41  ;;  %v1849_v49 = vmul.f32 %v1830_v1, %v9211_v45  ;;  %v6499_v11 = vpop.f32.mrf.mxu0  ;;  %6791 = vmatpush3.bf16.msra.mxu1 %v7251_v6  ;;  %v1855_v6 = vpack.c.bf16 %v1850_v38, %v1850_v38 }
 0x263   : > { %v1681_v43 = vpop.permute.xlu1 %1680  ;;  %v6500_v50 = vadd.f32 %v6499_v11, %v6498_v18  ;;  %v10252_v55 = vsel %vm419_vm5, %v10074_v14, %v10229_v51  ;;  %6792 = vmatprep.subr.bf16.mxu1 %v7252_v60  ;;  %v7256_v18 = vld [vmem:[%s10840_s4 + $0x650] sm:$0xff]  }
 0x264   : > { %2188 = vperm.xlu1 %7042, %v10243_v25   ;;  %v1854_v0 = vpack.c.bf16 %v1849_v49, %v1848_v13  ;;  %v1697_v40 = vrot.slane %v1681_v43, 6  ;;  %v6501_v54 = vpop.f32.mrf.mxu0  ;;  %v3014_v7 = vrot.slane %v10252_v55, 1  ;;  %v10288_v11 = vrot.slane %v1855_v6, 1  ;;  %v7257_v43 = vld [vmem:[%s10840_s4 + $0x610] sm:$0xff]  }
 0x265   : > { %v10259_v53 = vadd.f32 %v6500_v50, %v10044_v15 }
 0x266   : > { %v2826_v62 = vrot.slane %v1854_v0, 1  ;;  %v1698_v14 = vsel %vm448_vm2, %v1695_v3, %v1697_v40  ;;  %v3015_v15 = vsel %vm1411_vm6, %v2987_v46, %v3014_v7  ;;  %v6502_v56 = vpop.f32.mrf.mxu0  ;;  %6793 = vmatpush3.bf16.msra.mxu1 %v7253_v22  ;;  %v10278_v3 = vpop.permute.xlu0 %2118 }
 0x267   : > { %v1716_v23 = vmul.f32 0.0, %v1698_v14  ;;  %5620 = vmatprep.mubr.bf16.mxu1 %v3015_v15  ;;  %v6503_v60 = vadd.f32 %v6502_v56, %v6501_v54  ;;  %6794 = vmatprep.subr.bf16.mxu1 %v7254_v32 }
 0x268   : > { %2194 = vperm.xlu1 %7042, %v10267_v39   ;;  %v1882_v16 = vpop.permute.xlu1 %1881  ;;  %v6504_v27 = vpop.f32.mrf.mxu0  ;;  %v2827_v46 = vsel %vm1411_vm6, %v10131_v4, %v2826_v62 }
 0x269   : > { %v1721_v1 = vpack.c.bf16 %v1716_v23, %v1716_v23  ;;  %v1898_v38 = vrot.slane %v1882_v16, 2  ;;  %v10286_v13 = vadd.f32 %v6503_v60, %v10066_v31  ;;  %v3012_v49 = vrot.slane %v2827_v46, 1  ;;  %v7258_v31 = vld [vmem:[%s10840_s4 + $0x648] sm:$0xff]  }
 0x26a   : > { %v6505_v22 = vpop.f32.mrf.mxu0  ;;  %6795 = vmatpush3.bf16.msra.mxu1 %v7255_v30  ;;  %v10308_v14 = vpop.permute.xlu0 %2127  ;;  %v10312_v30 = vsel %vm1411_vm6, %v2826_v62, %v10288_v11 }
 0x26b   : > { %v3052_v50 = vrot.slane %v1721_v1, 1  ;;  %v1899_v4 = vsel %vm419_vm5, %v1896_v8, %v1898_v38  ;;  %v1919_v32 = vmul.f32 0.0, %v1898_v38  ;;  %v6506_v0 = vadd.f32 %v6505_v22, %v6504_v27  ;;  %6796 = vmatprep.subr.bf16.mxu1 %v7256_v18 }
 0x26c   : > { %2200 = vperm.xlu1 %7042, %v10036_v48   ;;  %v1918_v40 = vmul.f32 0.0, %v1899_v4  ;;  %v3013_v48 = vsel %vm1411_vm6, %v2984_v52, %v3012_v49  ;;  %v6507_v54 = vpop.f32.mrf.mxu0  ;;  %v6526_v23 = vpop.f32.mrf.mxu1  ;;  %v3034_v16 = vrot.slane %v10312_v30, 1  ;;  %v7261_v4 = vld [vmem:[%s10840_s4 + $0x600] sm:$0xff]  }
 0x26d   : > { %v10304_v6 = vadd.f32 %v6506_v0, %v10079_v9  ;;  %5621 = vmatmul.mubr.bf16.gmra.mxu1 %v3013_v48  ;;  %v1927_v42 = vpop.permute.xlu1 %1926  ;;  %v3053_v8 = vsel %vm1411_vm6, %v10199_v20, %v3052_v50  ;;  %v7259_v9 = vld [vmem:[%s10840_s4 + $0x608] sm:$0xff]   ;;  %v7260_v20 = vld [vmem:[%s10840_s4 + $0x640] sm:$0xff]  }
 0x26e   : > { %v1924_v15 = vpack.c.bf16 %v1919_v32, %v1918_v40  ;;  %5565 = vmatmul.mubr.bf16.gmra.mxu0 %v3053_v8  ;;  %v6508_v56 = vpop.f32.mrf.mxu0  ;;  %6797 = vmatpush3.bf16.msra.mxu1 %v7257_v43  ;;  %v1952_v52 = vrot.slane %v1927_v42, 1  ;;  %v6527_v18 = vpop.f32.mrf.mxu1  ;;  %v1959_v32 = vrot.slane %v10190_v26, 1  ;;  %v3035_v48 = vsel %vm1411_vm6, %v3012_v49, %v3034_v16 }
 0x26f   : > { %5572 = vmatprep.mubr.bf16.mxu0 %v3054_v29  ;;  %6798 = vmatprep.subr.bf16.mxu1 %v7258_v31  ;;  %v6528_v46 = vadd.f32 %v6527_v18, %v6526_v23  ;;  %v10331_v22 = vpop.permute.xlu0 %2048 }
 0x270   : > { %v10323_v60 = vrot.slane %v1924_v15, 2  ;;  %v1954_v63 = vsel %vm1411_vm6, %v1952_v52, %v1953_v5  ;;  %v6529_v29 = vpop.f32.mrf.mxu1 }
 0x271   : > { %v1933_v62 = vpop.permute.xlu1 %1932  ;;  %v10334_v43 = vadd.f32 %v6528_v46, %v10116_v17  ;;  %v1980_v54 = vmul.f32 %v1954_v63, %v8058_v44 }
 0x272   : > { %v1955_v27 = vrot.slane %v1933_v62, 1  ;;  %v2843_v12 = vsel %vm419_vm5, %v10229_v51, %v10323_v60  ;;  %6799 = vmatpush3.bf16.msra.mxu1 %v7259_v9  ;;  %v3058_v38 = vrot.slane %v10323_v60, 1  ;;  %v1979_v51 = vmul.f32 %v1952_v52, %v8034_v57  ;;  %v6530_v31 = vpop.f32.mrf.mxu1 }
 0x273   : > { %v3036_v1 = vrot.slane %v2843_v12, 1  ;;  %6800 = vmatprep.subr.bf16.mxu1 %v7260_v20  ;;  %v6531_v8 = vadd.f32 %v6530_v31, %v6529_v29  ;;  %v1996_v9 = vpop.permute.xlu0 %1995 }
 0x274   : > { %v1956_v17 = vsel %vm1411_vm6, %v1953_v5, %v1955_v27  ;;  %v6532_v26 = vpop.f32.mrf.mxu1  ;;  %v1989_v5 = vpack.c.bf16 %v1980_v54, %v1979_v51  ;;  %v2030_v31 = vmul.f32 %v1996_v9, %v8058_v44 }
 0x275   : > { %v1936_v0 = vpop.permute.xlu1 %1935  ;;  %v3037_v40 = vsel %vm1411_vm6, %v3014_v7, %v3036_v1  ;;  %v3059_v57 = vsel %vm1411_vm6, %v3036_v1, %v3058_v38  ;;  %v10350_v55 = vadd.f32 %v6531_v8, %v10127_v34  ;;  %v1981_v7 = vmul.f32 %v1956_v17, %v8131_v59 }
 0x276   : > { %v1957_v42 = vrot.slane %v1936_v0, 1  ;;  %5573 = vmatmul.mubr.bf16.gmra.mxu0 %v3052_v50  ;;  %5628 = vmatprep.mubr.bf16.mxu1 %v3037_v40  ;;  %v6533_v30 = vpop.f32.mrf.mxu1  ;;  %v3056_v50 = vrot.slane %v10288_v11, 1  ;;  %v2845_v29 = vshrl.u32 %v1989_v5, 16  ;;  %v2848_v1 = vshll.u32 %v1989_v5, 16 }
 0x277   : > { %5629 = vmatmul.mubr.bf16.gmra.mxu1 %v3035_v48  ;;  %v6534_v23 = vadd.f32 %v6533_v30, %v6532_v26  ;;  %v2008_v48 = vpop.permute.xlu0 %2007 }
 0x278   : > { %v1958_v15 = vsel %vm1411_vm6, %v1955_v27, %v1957_v42  ;;  %5636 = vmatprep.mubr.bf16.mxu1 %v3059_v57  ;;  %6801 = vmatpush3.bf16.msra.mxu1 %v7261_v4  ;;  %v1960_v52 = vsel %vm1411_vm6, %v1957_v42, %v1959_v32  ;;  %v6535_v60 = vpop.f32.mrf.mxu1  ;;  %v3057_v0 = vsel %vm1411_vm6, %v3034_v16, %v3056_v50  ;;  %v2850_v16 = vrot.slane %v2848_v1, 3 }
 0x279   : > { %v1982_v49 = vmul.f32 %v1958_v15, %v8159_v61  ;;  %v10354_v56 = vpop.permute.xlu1 %1941  ;;  %6917 = vmatprep.subr.bf16.mxu1 %v10946_v28  ;;  %v10362_v18 = vadd.f32 %v6534_v23, %v10144_v21  ;;  %v1983_v27 = vmul.f32 %v1960_v52, %v8213_v58  ;;  %v2033_v30 = vmul.f32 %v2008_v48, %v8213_v58 }
 0x27a   : > { %v1961_v34 = vrot.slane %v10354_v56, 1  ;;  %v6536_v63 = vpop.f32.mrf.mxu1 }
 0x27b   : > { %v1990_v20 = vpack.c.bf16 %v1982_v49, %v1981_v7  ;;  %v6537_v51 = vadd.f32 %v6536_v63, %v6535_v60  ;;  %v2847_v7 = vrot.slane %v2845_v29, 2 }
 0x27c   : > { %v1962_v62 = vsel %vm1411_vm6, %v1959_v32, %v1961_v34  ;;  %v6538_v21 = vpop.f32.mrf.mxu1 }
 0x27d   : > { %v2853_v46 = vshrl.u32 %v1990_v20, 16  ;;  %v2856_v11 = vshll.u32 %v1990_v20, 16  ;;  %v1984_v12 = vmul.f32 %v1962_v62, %v8455_v37  ;;  %v10370_v42 = vadd.f32 %v6537_v51, %v10173_v35 }
 0x27e   : > { %v2000_v4 = vpop.permute.xlu1 %1999  ;;  %v6539_v15 = vpop.f32.mrf.mxu1 }
 0x27f   : > { %v1991_v40 = vpack.c.bf16 %v1984_v12, %v1983_v27  ;;  %v2031_v32 = vmul.f32 %v2000_v4, %v8131_v59  ;;  %5637 = vmatmul.mubr.bf16.gmra.mxu1 %v3057_v0  ;;  %v2855_v54 = vrot.slane %v2853_v46, 2  ;;  %v2858_v17 = vrot.slane %v2856_v11, 3 }
 0x280   : > { %5644 = vmatprep.mubr.bf16.mxu1 %v3058_v38  ;;  %v6540_v56 = vadd.f32 %v6539_v15, %v6538_v21  ;;  %v6541_v23 = vpop.f32.mrf.mxu1  ;;  %v1965_v46 = vrot.slane %v10227_v36, 1  ;;  %v2851_v11 = vor.u32 %v2850_v16, %v2847_v7  ;;  %v10532_v36 = vld [vmem:[%s10840_s4 + $0x680] sm:$0xff]  }
 0x281   : > { %v2862_v8 = vshrl.u32 %v1991_v40, 16  ;;  %v2865_v26 = vshll.u32 %v1991_v40, 16  ;;  %v2039_v57 = vpack.c.bf16 %v2031_v32, %v2030_v31  ;;  %v2859_v20 = vor.u32 %v2858_v17, %v2855_v54 }
 0x282   : > { %v2004_v49 = vpop.permute.xlu1 %2003  ;;  %v10375_v35 = vadd.f32 %v6540_v56, %v10204_v2  ;;  %v6542_v27 = vpop.f32.mrf.mxu1 }
 0x283   : > { %v2864_v9 = vrot.slane %v2862_v8, 2  ;;  %v2867_v5 = vrot.slane %v2865_v26, 3  ;;  %v2032_v52 = vmul.f32 %v2004_v49, %v8159_v61  ;;  %v2894_v60 = vrot.slane %v2039_v57, 7  ;;  %v10403_v26 = vld [vmem:[%s10840_s4 + $0x6b8] sm:$0xff]  }
 0x284   : > { %v6543_v12 = vadd.f32 %v6542_v27, %v6541_v23  ;;  %v2860_v0 = vsel %vm2330_vm8, %v2851_v11, %v2859_v20 }
 0x285   : > { %v10377_v38 = vor.u32 %v2867_v5, %v2864_v9  ;;  %v2040_v62 = vpack.c.bf16 %v2033_v30, %v2032_v52  ;;  %v6544_v1 = vpop.f32.mrf.mxu1  ;;  %v2992_v31 = vrot.slane %v2894_v60, 1  ;;  %v2989_v8 = vrot.slane %v2860_v0, 1 }
 0x286   : > { %v10387_v2 = vadd.f32 %v6543_v12, %v10236_v24 }
 0x287   : > { %v10380_v63 = vrot.slane %v2040_v62, 7  ;;  %5645 = vmatmul.mubr.bf16.gmra.mxu1 %v3056_v50  ;;  %v10384_v4 = vsel %vm2330_vm8, %v2859_v20, %v10377_v38  ;;  %v6545_v40 = vpop.f32.mrf.mxu1  ;;  %v2141_v20 = vrot.slane %v10278_v3, 5 }
 0x288   : > { %v2990_v21 = vrot.slane %v10384_v4, 1  ;;  %v6546_v54 = vadd.f32 %v6545_v40, %v6544_v1  ;;  %v10432_v1 = vld [vmem:[%s10840_s4 + $0x6a8] sm:$0xff]  }
 0x289   : > { %v1945_v29 = vpop.permute.xlu1 %1944  ;;  %v10392_v32 = vsel %vm545_vm1, %v2894_v60, %v10380_v63  ;;  %v6547_v17 = vpop.f32.mrf.mxu1 }
 0x28a   : > { %v1963_v51 = vrot.slane %v1945_v29, 1  ;;  %v2993_v24 = vrot.slane %v10392_v32, 1  ;;  %v10406_v57 = vadd.f32 %v6546_v54, %v10259_v53  ;;  %v2991_v56 = vsel %vm1411_vm6, %v2989_v8, %v2990_v21  ;;  %v10420_v53 = vld [vmem:[%s10840_s4 + $0x6b0] sm:$0xff]  }
 0x28b   : > { %v6548_v49 = vpop.f32.mrf.mxu1 }
 0x28c   : > { %v1964_v50 = vsel %vm1411_vm6, %v1961_v34, %v1963_v51  ;;  %v1966_v48 = vsel %vm1411_vm6, %v1963_v51, %v1965_v46  ;;  %v2994_v34 = vsel %vm1411_vm6, %v2992_v31, %v2993_v24  ;;  %v6549_v30 = vadd.f32 %v6548_v49, %v6547_v17 }
 0x28d   : > { %v1985_v7 = vmul.f32 %v1964_v50, %v8832_v41  ;;  %v1986_v16 = vmul.f32 %v1966_v48, %v9211_v45  ;;  %5684 = vmatprep.mubr.bf16.mxu0 %v2994_v34  ;;  %v6550_v9 = vpop.f32.mrf.mxu1  ;;  %v2147_v49 = vrot.slane %v10308_v14, 5 }
 0x28e   : > { %v2113_v15 = vpop.permute.xlu1 %2112  ;;  %5685 = vmatmul.mubr.bf16.vlgmr.msra.gmra.mxu0 %v2991_v56  ;;  %v10423_v52 = vadd.f32 %v6549_v30, %v10286_v13 }
 0x28f   : > { %6882 = vmatpush3.bf16.msra.mxu0 %v10403_v26  ;;  %v2138_v5 = vrot.slane %v2113_v15, 5  ;;  %v1992_v60 = vpack.c.bf16 %v1986_v16, %v1985_v7  ;;  %v6551_v27 = vpop.f32.mrf.mxu1  ;;  %v10446_v15 = vld [vmem:[%s10840_s4 + $0x6a0] sm:$0xff]  }
 0x290   : > { %6883 = vmatprep.subr.bf16.mxu0 %v10946_v28  ;;  %v6552_v11 = vadd.f32 %v6551_v27, %v6550_v9  ;;  %v10460_v27 = vld [vmem:[%s10840_s4 + $0x698] sm:$0xff]  }
 0x291   : > { %v6553_v29 = vpop.f32.mrf.mxu1  ;;  %v2164_v13 = vmul.f32 %v2138_v5, %v8058_v44  ;;  %v2871_v31 = vshrl.u32 %v1992_v60, 16  ;;  %v2874_v40 = vshll.u32 %v1992_v60, 16 }
 0x292   : > { %v2116_v23 = vpop.permute.xlu1 %2115  ;;  %v10437_v3 = vadd.f32 %v6552_v11, %v10304_v6 }
 0x293   : > { %v2139_v62 = vrot.slane %v2116_v23, 5  ;;  %6884 = vmatpush3.bf16.msra.mxu0 %v10420_v53  ;;  %v6554_v54 = vpop.f32.mrf.mxu1  ;;  %v2873_v56 = vrot.slane %v2871_v31, 2  ;;  %v2876_v30 = vrot.slane %v2874_v40, 3  ;;  %v2016_v23 = vpop.permute.xlu0 %2015 }
 0x294   : > { %6885 = vmatprep.subr.bf16.mxu0 %v10946_v28  ;;  %v2035_v40 = vmul.f32 %v2016_v23, %v8832_v41 }
 0x295   : > { %v2140_v12 = vsel %vm1205_vm9, %v2138_v5, %v2139_v62  ;;  %v2142_v50 = vsel %vm1205_vm9, %v2139_v62, %v2141_v20 }
 0x296   : > { %v2165_v51 = vmul.f32 %v2140_v12, %v8131_v59  ;;  %v2122_v0 = vpop.permute.xlu1 %2121  ;;  %v2166_v6 = vmul.f32 %v2142_v50, %v8159_v61 }
 0x297   : > { %v2143_v48 = vrot.slane %v2122_v0, 5  ;;  %6886 = vmatpush3.bf16.msra.mxu0 %v10432_v1 }
 0x298   : > { %v2173_v17 = vpack.c.bf16 %v2165_v51, %v2164_v13  ;;  %6887 = vmatprep.subr.bf16.mxu0 %v10946_v28  ;;  %v10465_v13 = vor.u32 %v2876_v30, %v2873_v56 }
 0x299   : > { %v2144_v8 = vsel %vm1205_vm9, %v2141_v20, %v2143_v48 }
 0x29a   : > { %v2906_v34 = vshll.u32 %v2173_v17, 16  ;;  %v2167_v7 = vmul.f32 %v2144_v8, %v8213_v58  ;;  %v2125_v16 = vpop.permute.xlu1 %2124  ;;  %v2904_v51 = vshrl.u32 %v2173_v17, 16  ;;  %v10483_v23 = vsel %vm2330_vm8, %v10377_v38, %v10465_v13 }
 0x29b   : > { %v2145_v9 = vrot.slane %v2125_v16, 5  ;;  %6888 = vmatpush3.bf16.msra.mxu0 %v10446_v15 }
 0x29c   : > { %v2174_v5 = vpack.c.bf16 %v2167_v7, %v2166_v6  ;;  %v2908_v20 = vrot.slane %v2906_v34, 1  ;;  %6889 = vmatprep.subr.bf16.mxu0 %v10946_v28  ;;  %v6572_v0 = vpop.f32.mrf.mxu0  ;;  %v10475_v34 = vld [vmem:[%s10840_s4 + $0x690] sm:$0xff]  }
 0x29d   : > { %v2146_v60 = vsel %vm1205_vm9, %v2143_v48, %v2145_v9  ;;  %v2148_v62 = vsel %vm1205_vm9, %v2145_v9, %v2147_v49 }
 0x29e   : > { %v2911_v11 = vshll.u32 %v2174_v5, 16  ;;  %v2168_v12 = vmul.f32 %v2146_v60, %v8455_v37  ;;  %v2169_v29 = vmul.f32 %v2148_v62, %v8832_v41  ;;  %v6573_v8 = vpop.f32.mrf.mxu0  ;;  %v2909_v6 = vor.u32 %v2908_v20, %v2904_v51  ;;  %v10496_v51 = vld [vmem:[%s10840_s4 + $0x688] sm:$0xff]  }
 0x29f   : > { %v2012_v31 = vpop.permute.xlu1 %2011  ;;  %6890 = vmatpush3.bf16.msra.mxu0 %v10460_v27  ;;  %v2915_v7 = vshrl.u32 %v2174_v5, 16  ;;  %v6574_v56 = vadd.f32 %v6573_v8, %v6572_v0 }
 0x2a0   : > { %v2913_v50 = vrot.slane %v2911_v11, 1  ;;  %v10468_v48 = vpack.c.bf16 %v2169_v29, %v2168_v12  ;;  %v2034_v54 = vmul.f32 %v2012_v31, %v8455_v37  ;;  %6891 = vmatprep.subr.bf16.mxu0 %v10946_v28  ;;  %v6575_v30 = vpop.f32.mrf.mxu0  ;;  %v3016_v31 = vrot.slane %v10483_v23, 1 }
 0x2a1   : > { %v10490_v5 = vadd.f32 %v6574_v56, %v10334_v43 }
 0x2a2   : > { %v2919_v17 = vshll.u32 %v10468_v48, 16  ;;  %v2041_v16 = vpack.c.bf16 %v2035_v40, %v2034_v54  ;;  %v2914_v9 = vsel %vm2245_vm7, %v2909_v6, %v2913_v50  ;;  %v2917_v11 = vor.u32 %v2915_v7, %v2913_v50  ;;  %v6576_v29 = vpop.f32.mrf.mxu0  ;;  %v10511_v6 = vpop.permute.xlu0 %2023 }
 0x2a3   : > { %6892 = vmatpush3.bf16.msra.mxu0 %v10475_v34  ;;  %v6577_v38 = vadd.f32 %v6576_v29, %v6575_v30  ;;  %v2998_v54 = vrot.slane %v2914_v9, 1  ;;  %v7361_v29 = vmov 27  }
 0x2a4   : > { %v10485_v20 = vrot.slane %v2919_v17, 1  ;;  %v10487_v60 = vrot.slane %v2041_v16, 7  ;;  %v1951_v62 = vpop.permute.xlu1 %1950  ;;  %6893 = vmatprep.subr.bf16.mxu0 %v10946_v28  ;;  %v6578_v40 = vpop.f32.mrf.mxu0  ;;  %7044 = vset.pattern.permute.xlu1 %v7361_v29 }
 0x2a5   : > { %v1967_v12 = vrot.slane %v1951_v62, 1  ;;  %v10514_v7 = vadd.f32 %v6577_v38, %v10350_v55  ;;  %7045 = vset.pattern.permute.xlu0 %v7361_v29  ;;  %5869 = vperm.xlu1 %7044, %v10184_v33  }
 0x2a6   : > { %v10501_v0 = vsel %vm545_vm1, %v10380_v63, %v10487_v60  ;;  %v10505_v43 = vsel %vm2245_vm7, %v2917_v11, %v10485_v20  ;;  %v2072_v63 = vrot.slane %v10331_v22, 6  ;;  %v6579_v16 = vpop.f32.mrf.mxu0  ;;  %v2131_v4 = vpop.permute.xlu0 %2130 }
 0x2a7   : > { %v3018_v50 = vrot.slane %v10501_v0, 1  ;;  %v2999_v8 = vrot.slane %v10505_v43, 1  ;;  %v1968_v17 = vsel %vm1411_vm6, %v1965_v46, %v1967_v12  ;;  %6894 = vmatpush3.bf16.msra.mxu0 %v10496_v51  ;;  %v6580_v22 = vadd.f32 %v6579_v16, %v6578_v40 }
 0x2a8   : > { %v3017_v46 = vsel %vm1411_vm6, %v2990_v21, %v3016_v31  ;;  %v6581_v32 = vpop.f32.mrf.mxu0  ;;  %6895 = vmatprep.subr.bf16.mxu0 %v10946_v28  ;;  %v1988_v62 = vmul.f32 0.0, %v1967_v12  ;;  %v7312_v12 = vld [vmem:[%s10837_s1 + $0x8] sm:$0xff] }
 0x2a9   : > { %v2046_v56 = vpop.permute.xlu1 %2045  ;;  %v3019_v30 = vsel %vm1411_vm6, %v2993_v24, %v3018_v50  ;;  %v3000_v9 = vsel %vm1411_vm6, %v2998_v54, %v2999_v8  ;;  %v1987_v24 = vmul.f32 0.0, %v1968_v17  ;;  %v10541_v11 = vadd.f32 %v6580_v22, %v10362_v18  ;;  %5873 = vperm.xlu0 %7045, %v7312_v12   ;;  %5877 = vperm.xlu1 %7044, %v10210_v47  }
 0x2aa   : > { %v2071_v55 = vrot.slane %v2046_v56, 6  ;;  %5692 = vmatprep.mubr.bf16.mxu0 %v3019_v30  ;;  %5756 = vmatprep.mubr.bf16.mxu1 %v3000_v9  ;;  %v6582_v38 = vpop.f32.mrf.mxu0 }
 0x2ab   : > { %5693 = vmatmul.mubr.bf16.gmra.mxu0 %v3017_v46  ;;  %v6583_v54 = vadd.f32 %v6582_v38, %v6581_v32  ;;  %v1993_v17 = vpack.c.bf16 %v1988_v62, %v1987_v24  ;;  %v2137_v38 = vpop.permute.xlu0 %2136  ;;  %v2149_v24 = vrot.slane %v2131_v4, 5 }
 0x2ac   : > { %6896 = vmatpush3.bf16.msra.mxu0 %v10532_v36  ;;  %v2073_v21 = vsel %vm448_vm2, %v2071_v55, %v2072_v63  ;;  %v6584_v18 = vpop.f32.mrf.mxu0  ;;  %v2097_v30 = vmul.f32 %v2071_v55, %v8058_v44 }
 0x2ad   : > { %v2052_v40 = vpop.permute.xlu1 %2051  ;;  %v10550_v56 = vadd.f32 %v6583_v54, %v10370_v42  ;;  %v2098_v9 = vmul.f32 %v2073_v21, %v8131_v59  ;;  %v7313_v42 = vld [vmem:[%s10837_s1 + $0x20] sm:$0xff]  ;;  %v2880_v62 = vshrl.u32 %v1993_v17, 16  ;;  %5881 = vperm.xlu1 %7044, %v10243_v25  }
 0x2ae   : > { %v2074_v16 = vrot.slane %v2052_v40, 6  ;;  %v6585_v33 = vpop.f32.mrf.mxu0  ;;  %5885 = vperm.xlu0 %7045, %v7313_v42   ;;  %v2883_v40 = vshll.u32 %v1993_v17, 16 }
 0x2af   : > { %v6586_v32 = vadd.f32 %v6585_v33, %v6584_v18  ;;  %v2153_v33 = vrot.slane %v2137_v38, 5 }
 0x2b0   : > { %v2075_v46 = vsel %vm448_vm2, %v2072_v63, %v2074_v16  ;;  %v6587_v55 = vpop.f32.mrf.mxu0  ;;  %v2106_v63 = vpack.c.bf16 %v2098_v9, %v2097_v30  ;;  %v2882_v30 = vrot.slane %v2880_v62, 2  ;;  %v2885_v9 = vrot.slane %v2883_v40, 3 }
 0x2b1   : > { %v10554_v22 = vpop.permute.xlu1 %2054  ;;  %v10563_v21 = vadd.f32 %v6586_v32, %v10375_v35  ;;  %v2099_v54 = vmul.f32 %v2075_v46, %v8159_v61  ;;  %v2150_v35 = vsel %vm1205_vm9, %v2147_v49, %v2149_v24  ;;  %5889 = vperm.xlu1 %7044, %v10267_v39  }
 0x2b2   : > { %v2076_v29 = vrot.slane %v10554_v22, 6  ;;  %v6588_v18 = vpop.f32.mrf.mxu0  ;;  %5893 = vperm.xlu0 %7045, %v10062_v10   ;;  %v2170_v14 = vmul.f32 %v2150_v35, %v9211_v45 }
 0x2b3   : > { %v6589_v4 = vadd.f32 %v6588_v18, %v6587_v55 }
 0x2b4   : > { %v2077_v47 = vsel %vm448_vm2, %v2074_v16, %v2076_v29  ;;  %v6590_v16 = vpop.f32.mrf.mxu0 }
 0x2b5   : > { %v2100_v12 = vmul.f32 %v2077_v47, %v8213_v58  ;;  %v10576_v46 = vadd.f32 %v6589_v4, %v10387_v2  ;;  %v2995_v47 = vrot.slane %v2106_v63, 1  ;;  %v10587_v63 = vor.u32 %v2885_v9, %v2882_v30 }
 0x2b6   : > { %v2134_v42 = vpop.permute.xlu1 %2133  ;;  %v6591_v10 = vpop.f32.mrf.mxu0  ;;  %5901 = vperm.xlu0 %7045, %v10112_v19   ;;  %v7314_v19 = vld [vmem:[%s10837_s1 + $0x38] sm:$0xff] }
 0x2b7   : > { %v2107_v17 = vpack.c.bf16 %v2100_v12, %v2099_v54  ;;  %v2151_v32 = vrot.slane %v2134_v42, 5  ;;  %v6592_v12 = vadd.f32 %v6591_v10, %v6590_v16  ;;  %5897 = vperm.xlu1 %7044, %v7314_v19   ;;  %v2923_v42 = vshrl.u32 %v10468_v48, 16 }
 0x2b8   : > { %v6593_v62 = vpop.f32.mrf.mxu0 }
 0x2b9   : > { %v10578_v38 = vrot.slane %v2107_v17, 1  ;;  %v2152_v25 = vsel %vm1205_vm9, %v2149_v24, %v2151_v32  ;;  %v2154_v55 = vsel %vm1205_vm9, %v2151_v32, %v2153_v33  ;;  %v10590_v18 = vadd.f32 %v6592_v12, %v10406_v57 }
 0x2ba   : > { %v2171_v49 = vmul.f32 0.0, %v2152_v25  ;;  %v2172_v54 = vmul.f32 0.0, %v2154_v55  ;;  %v2037_v33 = vmul.f32 0.0, %v10511_v6  ;;  %v6594_v4 = vpop.f32.mrf.mxu0  ;;  %v2925_v9 = vor.u32 %v2923_v42, %v10485_v20  ;;  %v2067_v42 = vpop.permute.xlu0 %2066 }
 0x2bb   : > { %v2020_v2 = vpop.permute.xlu1 %2019  ;;  %v2997_v40 = vsel %vm1411_vm6, %v2995_v47, %v10578_v38  ;;  %v6595_v32 = vadd.f32 %v6594_v4, %v6593_v62 }
 0x2bc   : > { %v2176_v24 = vpack.c.bf16 %v2171_v49, %v2170_v14  ;;  %v2036_v39 = vmul.f32 %v2020_v2, %v9211_v45  ;;  %5757 = vmatmul.mubr.bf16.vlgmr.msra.gmra.mxu1 %v2997_v40  ;;  %v10599_v17 = vpack.c.bf16 %v2172_v54, %v2172_v54  ;;  %v6596_v16 = vpop.f32.mrf.mxu0 }
 0x2bd   : > { %6925 = vmatpush3.bf16.msra.mxu1 %v10403_v26  ;;  %v10606_v26 = vsel %vm2330_vm8, %v10465_v13, %v10587_v63  ;;  %v10609_v48 = vadd.f32 %v6595_v32, %v10423_v52 }
 0x2be   : > { %v2927_v35 = vshll.u32 %v2176_v24, 16  ;;  %6918 = vmatprep.subr.bf16.mxu1 %v10946_v28  ;;  %v2042_v57 = vpack.c.bf16 %v2037_v33, %v2036_v39  ;;  %v6597_v55 = vpop.f32.mrf.mxu0  ;;  %v2931_v10 = vshrl.u32 %v2176_v24, 16  ;;  %v2935_v14 = vshll.u32 %v10599_v17, 16 }
 0x2bf   : > { %v6598_v49 = vadd.f32 %v6597_v55, %v6596_v16  ;;  %v3038_v52 = vrot.slane %v10606_v26, 1  ;;  %v2084_v16 = vrot.slane %v2067_v42, 6 }
 0x2c0   : > { %v2929_v30 = vrot.slane %v2927_v35, 1  ;;  %v2058_v6 = vpop.permute.xlu1 %2057  ;;  %v2899_v47 = vrot.slane %v2042_v57, 7  ;;  %v6599_v20 = vpop.f32.mrf.mxu0  ;;  %v2937_v4 = vrot.slane %v2935_v14, 1 }
 0x2c1   : > { %v2078_v25 = vrot.slane %v2058_v6, 6  ;;  %6926 = vmatpush3.bf16.msra.mxu1 %v10420_v53  ;;  %v10621_v62 = vadd.f32 %v6598_v49, %v10437_v3  ;;  %v3039_v43 = vsel %vm1411_vm6, %v3016_v31, %v3038_v52 }
 0x2c2   : > { %v2930_v54 = vsel %vm2245_vm7, %v2925_v9, %v2929_v30  ;;  %6919 = vmatprep.subr.bf16.mxu1 %v10946_v28  ;;  %v10617_v13 = vsel %vm545_vm1, %v10487_v60, %v2899_v47  ;;  %v2933_v40 = vor.u32 %v2931_v10, %v2929_v30  ;;  %v6600_v33 = vpop.f32.mrf.mxu0 }
 0x2c3   : > { %v3022_v12 = vrot.slane %v2930_v54, 1  ;;  %v3040_v2 = vrot.slane %v10617_v13, 1  ;;  %v2079_v24 = vsel %vm448_vm2, %v2076_v29, %v2078_v25 }
 0x2c4   : > { %v2061_v53 = vpop.permute.xlu1 %2060  ;;  %v10644_v0 = vsel %vm2245_vm7, %v2933_v40, %v2937_v4 }
 0x2c5   : > { %v2080_v39 = vrot.slane %v2061_v53, 6  ;;  %v3023_v60 = vsel %vm1411_vm6, %v2999_v8, %v3022_v12  ;;  %6927 = vmatpush3.bf16.msra.mxu1 %v10432_v1  ;;  %v3041_v3 = vsel %vm1411_vm6, %v3018_v50, %v3040_v2  ;;  %v2101_v8 = vmul.f32 %v2079_v24, %v8455_v37 }
 0x2c6   : > { %5764 = vmatprep.mubr.bf16.mxu1 %v3023_v60  ;;  %6920 = vmatprep.subr.bf16.mxu1 %v10946_v28  ;;  %v3044_v23 = vrot.slane %v10644_v0, 1 }
 0x2c7   : > { %v2081_v22 = vsel %vm448_vm2, %v2078_v25, %v2080_v39  ;;  %5700 = vmatprep.mubr.bf16.mxu0 %v3041_v3  ;;  %v2939_v25 = vshrl.u32 %v10599_v17, 16 }
 0x2c8   : > { %v2102_v1 = vmul.f32 %v2081_v22, %v8832_v41  ;;  %5701 = vmatmul.mubr.bf16.gmra.mxu0 %v3039_v43  ;;  %v6618_v35 = vpop.f32.mrf.mxu1  ;;  %v3045_v14 = vsel %vm1411_vm6, %v3022_v12, %v3044_v23 }
 0x2c9   : > { %v2028_v50 = vpop.permute.xlu1 %2027  ;;  %6928 = vmatpush3.bf16.msra.mxu1 %v10446_v15  ;;  %v10662_v17 = vor.u32 %v2939_v25, %v2937_v4 }
 0x2ca   : > { %v2108_v29 = vpack.c.bf16 %v2102_v1, %v2101_v8  ;;  %v2038_v19 = vmul.f32 0.0, %v2028_v50  ;;  %6921 = vmatprep.subr.bf16.mxu1 %v10946_v28  ;;  %v6619_v32 = vpop.f32.mrf.mxu1 }
 0x2cb   : > { %v6620_v6 = vadd.f32 %v6619_v32, %v6618_v35  ;;  %v3066_v43 = vrot.slane %v10662_v17, 1 }
 0x2cc   : > { %v2043_v31 = vpack.c.bf16 %v2038_v19, %v2038_v19  ;;  %v3020_v57 = vrot.slane %v2108_v29, 1  ;;  %v6621_v55 = vpop.f32.mrf.mxu1 }
 0x2cd   : > { %6929 = vmatpush3.bf16.msra.mxu1 %v10460_v27  ;;  %v10657_v54 = vadd.f32 %v6620_v6, %v10490_v5  ;;  %v3060_v27 = vrot.slane %v10587_v63, 1  ;;  %v2183_v5 = vpop.permute.xlu0 %2182  ;;  %v3067_v42 = vsel %vm1411_vm6, %v3044_v23, %v3066_v43 }
 0x2ce   : > { %v2901_v30 = vrot.slane %v2043_v31, 7  ;;  %v2064_v9 = vpop.permute.xlu1 %2063  ;;  %v3021_v15 = vsel %vm1411_vm6, %v10578_v38, %v3020_v57  ;;  %6922 = vmatprep.subr.bf16.mxu1 %v10946_v28  ;;  %v6622_v20 = vpop.f32.mrf.mxu1 }
 0x2cf   : > { %v2082_v10 = vrot.slane %v2064_v9, 6  ;;  %5765 = vmatmul.mubr.bf16.gmra.mxu1 %v3021_v15  ;;  %v6623_v40 = vadd.f32 %v6622_v20, %v6621_v55 }
 0x2d0   : > { %v2902_v49 = vsel %vm545_vm1, %v2899_v47, %v2901_v30  ;;  %5772 = vmatprep.mubr.bf16.mxu1 %v3045_v14  ;;  %v6624_v33 = vpop.f32.mrf.mxu1 }
 0x2d1   : > { %v2083_v38 = vsel %vm448_vm2, %v2080_v39, %v2082_v10  ;;  %v2085_v13 = vsel %vm448_vm2, %v2082_v10, %v2084_v16  ;;  %v3062_v53 = vrot.slane %v2902_v49, 1  ;;  %6930 = vmatpush3.bf16.msra.mxu1 %v10475_v34  ;;  %v10669_v39 = vadd.f32 %v6623_v40, %v10514_v7  ;;  %v2192_v50 = vpop.permute.xlu0 %2191 }
 0x2d2   : > { %v2103_v12 = vmul.f32 %v2083_v38, %v9211_v45  ;;  %v2104_v47 = vmul.f32 0.0, %v2085_v13  ;;  %v2070_v24 = vpop.permute.xlu1 %2069  ;;  %6923 = vmatprep.subr.bf16.mxu1 %v10946_v28  ;;  %v3061_v34 = vsel %vm1411_vm6, %v3038_v52, %v3060_v27  ;;  %v6625_v4 = vpop.f32.mrf.mxu1  ;;  %v2212_v23 = vrot.slane %v2192_v50, 4 }
 0x2d3   : > { %v2086_v63 = vrot.slane %v2070_v24, 6  ;;  %v3063_v60 = vsel %vm1411_vm6, %v3040_v2, %v3062_v53  ;;  %v6626_v1 = vadd.f32 %v6625_v4, %v6624_v33 }
 0x2d4   : > { %v2109_v3 = vpack.c.bf16 %v2104_v47, %v2103_v12  ;;  %5708 = vmatprep.mubr.bf16.mxu0 %v3063_v60  ;;  %v6627_v7 = vpop.f32.mrf.mxu1 }
 0x2d5   : > { %v2087_v22 = vsel %vm448_vm2, %v2084_v16, %v2086_v63  ;;  %5709 = vmatmul.mubr.bf16.gmra.mxu0 %v3061_v34  ;;  %6931 = vmatpush3.bf16.msra.mxu1 %v10496_v51  ;;  %v10679_v26 = vadd.f32 %v6626_v1, %v10541_v11  ;;  %v2206_v51 = vrot.slane %v2183_v5, 4  ;;  %v2198_v25 = vpop.permute.xlu0 %2197 }
 0x2d6   : > { %v3042_v8 = vrot.slane %v2109_v3, 1  ;;  %v2105_v2 = vmul.f32 0.0, %v2087_v22  ;;  %5716 = vmatprep.mubr.bf16.mxu0 %v3062_v53  ;;  %6924 = vmatprep.subr.bf16.mxu1 %v10946_v28  ;;  %v6628_v19 = vpop.f32.mrf.mxu1 }
 0x2d7   : > { %v2180_v0 = vpop.permute.xlu1 %2179  ;;  %v6629_v35 = vadd.f32 %v6628_v19, %v6627_v7 }
 0x2d8   : > { %v2110_v52 = vpack.c.bf16 %v2105_v2, %v2105_v2  ;;  %v3043_v29 = vsel %vm1411_vm6, %v3020_v57, %v3042_v8  ;;  %v2205_v31 = vrot.slane %v2180_v0, 4  ;;  %v6630_v32 = vpop.f32.mrf.mxu1 }
 0x2d9   : > { %5773 = vmatmul.mubr.bf16.gmra.mxu1 %v3043_v29  ;;  %v10685_v11 = vadd.f32 %v6629_v35, %v10550_v56  ;;  %v2204_v63 = vpop.permute.xlu0 %2203 }
 0x2da   : > { %5780 = vmatprep.mubr.bf16.mxu1 %v3067_v42  ;;  %6932 = vmatpush3.bf16.msra.mxu1 %v10532_v36  ;;  %v3064_v30 = vrot.slane %v2110_v52, 1  ;;  %v6631_v9 = vpop.f32.mrf.mxu1  ;;  %v2207_v57 = vsel %vm680_vm3, %v2205_v31, %v2206_v51 }
 0x2db   : > { %v2186_v16 = vpop.permute.xlu1 %2185  ;;  %v6632_v15 = vadd.f32 %v6631_v9, %v6630_v32  ;;  %v2232_v20 = vmul.f32 %v2207_v57, %v8131_v59  ;;  %v2216_v59 = vrot.slane %v2198_v25, 4 }
 0x2dc   : > { %v2208_v6 = vrot.slane %v2186_v16, 4  ;;  %v6633_v55 = vpop.f32.mrf.mxu1  ;;  %v3065_v49 = vsel %vm1411_vm6, %v3042_v8, %v3064_v30  ;;  %v2220_v8 = vrot.slane %v2204_v63, 4 }
 0x2dd   : > { %5717 = vmatmul.mubr.bf16.gmra.mxu0 %v3060_v27  ;;  %v10691_v36 = vadd.f32 %v6632_v15, %v10563_v21  ;;  %v2231_v27 = vmul.f32 %v2205_v31, %v8058_v44 }
 0x2de   : > { %6897 = vmatprep.mubr.msk.bf16.mxu0 %vm7334_vm0, %v10946_v28  ;;  %v2209_v14 = vsel %vm680_vm3, %v2206_v51, %v2208_v6  ;;  %v6634_v38 = vpop.f32.mrf.mxu1 }
 0x2df   : > { %v2189_v10 = vpop.permute.xlu1 %2188  ;;  %v6635_v13 = vadd.f32 %v6634_v38, %v6633_v55  ;;  %v2233_v17 = vmul.f32 %v2209_v14, %v8159_v61  ;;  %v2240_v5 = vpack.c.bf16 %v2232_v20, %v2231_v27 }
 0x2e0   : > { %v2210_v56 = vrot.slane %v2189_v10, 4  ;;  %v6636_v40 = vpop.f32.mrf.mxu1 }
 0x2e1   : > { %5781 = vmatmul.mubr.bf16.gmra.mxu1 %v3065_v49  ;;  %v10701_v47 = vadd.f32 %v6635_v13, %v10576_v46  ;;  %v2947_v7 = vrot.slane %v2240_v5, 1 }
 0x2e2   : > { %v2211_v53 = vsel %vm680_vm3, %v2208_v6, %v2210_v56  ;;  %5788 = vmatprep.mubr.bf16.mxu1 %v3066_v43  ;;  %v2213_v24 = vsel %vm680_vm3, %v2210_v56, %v2212_v23  ;;  %v6637_v60 = vpop.f32.mrf.mxu1 }
 0x2e3   : > { %v2234_v21 = vmul.f32 %v2211_v53, %v8213_v58  ;;  %v2195_v12 = vpop.permute.xlu1 %2194  ;;  %v6638_v3 = vadd.f32 %v6637_v60, %v6636_v40  ;;  %v2235_v61 = vmul.f32 %v2213_v24, %v8455_v37 }
 0x2e4   : > { %v2214_v44 = vrot.slane %v2195_v12, 4  ;;  %v6639_v46 = vpop.f32.mrf.mxu1 }
 0x2e5   : > { %v2241_v33 = vpack.c.bf16 %v2234_v21, %v2233_v17  ;;  %v10709_v1 = vadd.f32 %v6638_v3, %v10590_v18 }
 0x2e6   : > { %v2215_v34 = vsel %vm680_vm3, %v2212_v23, %v2214_v44  ;;  %v2217_v58 = vsel %vm680_vm3, %v2214_v44, %v2216_v59  ;;  %v6640_v52 = vpop.f32.mrf.mxu1 }
 0x2e7   : > { %v2948_v4 = vrot.slane %v2241_v33, 1  ;;  %v2236_v22 = vmul.f32 %v2215_v34, %v8832_v41  ;;  %v2201_v43 = vpop.permute.xlu1 %2200  ;;  %v2237_v50 = vmul.f32 %v2217_v58, %v9211_v45  ;;  %v6641_v29 = vadd.f32 %v6640_v52, %v6639_v46 }
 0x2e8   : > { %v2218_v2 = vrot.slane %v2201_v43, 4  ;;  %v6642_v35 = vpop.f32.mrf.mxu1 }
 0x2e9   : > { %v2242_v0 = vpack.c.bf16 %v2236_v22, %v2235_v61  ;;  %5789 = vmatmul.mubr.bf16.gmra.mxu1 %v3064_v30  ;;  %v2949_v41 = vsel %vm1411_vm6, %v2947_v7, %v2948_v4  ;;  %v10718_v31 = vadd.f32 %v6641_v29, %v10609_v48 }
 0x2ea   : > { %v2219_v37 = vsel %vm680_vm3, %v2216_v59, %v2218_v2  ;;  %v2221_v19 = vsel %vm680_vm3, %v2218_v2, %v2220_v8  ;;  %6909 = vmatprep.mubr.msk.bf16.mxu1 %vm7334_vm0, %v10946_v28  ;;  %v6664_v32 = vpop.f32.mrf.mxu0  ;;  %v6643_v6 = vpop.f32.mrf.mxu1  ;;  %v3001_v15 = vrot.slane %v2949_v41, 1 }
 0x2eb   : > { %v2950_v42 = vrot.slane %v2242_v0, 1  ;;  %v2238_v18 = vmul.f32 0.0, %v2219_v37  ;;  %v2239_v51 = vmul.f32 0.0, %v2221_v19  ;;  %v6644_v9 = vadd.f32 %v6643_v6, %v6642_v35 }
 0x2ec   : > { %v6665_v57 = vpop.f32.mrf.mxu0  ;;  %v6645_v10 = vpop.f32.mrf.mxu1 }
 0x2ed   : > { %v2951_v45 = vsel %vm1411_vm6, %v2948_v4, %v2950_v42  ;;  %v2243_v16 = vpack.c.bf16 %v2238_v18, %v2237_v50  ;;  %v2244_v30 = vpack.c.bf16 %v2239_v51, %v2239_v51  ;;  %v6666_v14 = vadd.f32 %v6665_v57, %v6664_v32 }
 0x2ee   : > { %v3002_v25 = vrot.slane %v2951_v45, 1  ;;  %v10722_v56 = vadd.f32 %v6644_v9, %v10621_v62  ;;  %v6667_v49 = vpop.f32.mrf.mxu0  ;;  %v6646_v38 = vpop.f32.mrf.mxu1 }
 0x2ef   : > { %v2952_v23 = vrot.slane %v2243_v16, 1  ;;  %v2954_v55 = vrot.slane %v2244_v30, 1  ;;  %v5543_v13 = vadd.f32 %v6666_v14, %v10657_v54 }
 0x2f0   : > { %v3003_v48 = vsel %vm1411_vm6, %v3001_v15, %v3002_v25  ;;  %v6668_v21 = vpop.f32.mrf.mxu0 }
 0x2f1   : > { %v2955_v27 = vsel %vm1411_vm6, %v2952_v23, %v2954_v55  ;;  %v3068_v20 = vrot.slane %v2954_v55, 1  ;;  %6898 = vmatmul.mubr.bf16.vlgmr.msra.gmra.mxu0 %v3003_v48  ;;  %v2953_v53 = vsel %vm1411_vm6, %v2950_v42, %v2952_v23  ;;  %v6669_v40 = vadd.f32 %v6668_v21, %v6667_v49 }
 0x2f2   : > { %v3046_v17 = vrot.slane %v2955_v27, 1  ;;  %6901 = vmatprep.mubr.msk.bf16.mxu0 %vm7334_vm0, %v10946_v28  ;;  %v3024_v12 = vrot.slane %v2953_v53, 1 }
 0x2f3   : > { %v5546_v24 = vadd.f32 %v6669_v40, %v10669_v39 }
 0x2f4   : > { %v3069_v62 = vsel %vm1411_vm6, %v3046_v17, %v3068_v20  ;;  %v3025_v54 = vsel %vm1411_vm6, %v3002_v25, %v3024_v12  ;;  %v3047_v39 = vsel %vm1411_vm6, %v3024_v12, %v3046_v17 }
 0x2f5   : > { %6910 = vmatmul.mubr.bf16.vlgmr.msra.gmra.mxu1 %v3069_v62 }
 0x2f6   : > { %6913 = vmatprep.mubr.msk.bf16.mxu1 %vm7334_vm0, %v10946_v28 }
 0x2f8   : > { %v6670_v44 = vpop.f32.mrf.mxu0 }
 0x2f9   : > { %6902 = vmatmul.mubr.bf16.gmra.mxu0 %v3025_v54 }
 0x2fa   : > { %6905 = vmatprep.mubr.msk.bf16.mxu0 %vm7334_vm0, %v10946_v28  ;;  %v6671_v5 = vpop.f32.mrf.mxu0 }
 0x2fb   : > { %v6672_v59 = vadd.f32 %v6671_v5, %v6670_v44 }
 0x2fc   : > { %v6673_v33 = vpop.f32.mrf.mxu0 }
 0x2fd   : > { %6914 = vmatmul.mubr.bf16.gmra.mxu1 %v3068_v20  ;;  %v5551_v63 = vadd.f32 %v6672_v59, %v10679_v26 }
 0x2fe   : > { %v6674_v60 = vpop.f32.mrf.mxu0 }
 0x2ff   : > { %v6675_v3 = vadd.f32 %v6674_v60, %v6673_v33 }
 0x301   : > { %6906 = vmatmul.mubr.bf16.gmra.mxu0 %v3047_v39  ;;  %v5554_v34 = vadd.f32 %v6675_v3, %v10685_v11 }
 0x319   : > { %v6710_v61 = vpop.f32.mrf.mxu1 }
 0x31b   : > { %v6711_v4 = vpop.f32.mrf.mxu1 }
 0x31c   : > { %v6712_v58 = vadd.f32 %v6711_v4, %v6710_v61 }
 0x31d   : > { %v6713_v22 = vpop.f32.mrf.mxu1 }
 0x31e   : > { %v10740_v46 = vadd.f32 %v6712_v58, %v5543_v13 }
 0x31f   : > { %v6676_v28 = vpop.f32.mrf.mxu0  ;;  %v6714_v43 = vpop.f32.mrf.mxu1 }
 0x320   : > { %v6715_v8 = vadd.f32 %v6714_v43, %v6713_v22 }
 0x321   : > { %v6677_v2 = vpop.f32.mrf.mxu0 }
 0x322   : > { %v10742_v7 = vadd.f32 %v6715_v8, %v5546_v24  ;;  %v6678_v26 = vadd.f32 %v6677_v2, %v6676_v28 }
 0x323   : > { %v6679_v0 = vpop.f32.mrf.mxu0 }
 0x324   : > { %v5559_v52 = vadd.f32 %v6678_v26, %v10691_v36 }
 0x325   : > { %v6680_v50 = vpop.f32.mrf.mxu0 }
 0x326   : > { %v6681_v29 = vadd.f32 %v6680_v50, %v6679_v0 }
 0x328   : > { %v5562_v11 = vadd.f32 %v6681_v29, %v10701_v47 }
 0x32d   : > { %v6716_v37 = vpop.f32.mrf.mxu1 }
 0x32e   : > { %v6682_v19 = vpop.f32.mrf.mxu0 }
 0x32f   : > { %v6717_v41 = vpop.f32.mrf.mxu1 }
 0x330   : > { %v6718_v42 = vadd.f32 %v6717_v41, %v6716_v37  ;;  %v6683_v18 = vpop.f32.mrf.mxu0 }
 0x331   : > { %v6684_v51 = vadd.f32 %v6683_v18, %v6682_v19  ;;  %v6719_v35 = vpop.f32.mrf.mxu1 }
 0x332   : > { %v10746_v32 = vadd.f32 %v6718_v42, %v5551_v63  ;;  %v6685_v45 = vpop.f32.mrf.mxu0 }
 0x333   : > { %v5567_v16 = vadd.f32 %v6684_v51, %v10709_v1  ;;  %v6720_v30 = vpop.f32.mrf.mxu1 }
 0x334   : > { %v6721_v6 = vadd.f32 %v6720_v30, %v6719_v35  ;;  %v6686_v9 = vpop.f32.mrf.mxu0 }
 0x335   : > { %v6687_v36 = vadd.f32 %v6686_v9, %v6685_v45 }
 0x336   : > { %v10749_v57 = vadd.f32 %v6721_v6, %v5554_v34  ;;  %v6688_v15 = vpop.f32.mrf.mxu0 }
 0x337   : > { %v5570_v47 = vadd.f32 %v6687_v36, %v10718_v31  ;;  %v6722_v25 = vpop.f32.mrf.mxu1 }
 0x338   : > { %v6689_v23 = vpop.f32.mrf.mxu0 }
 0x339   : > { %v6690_v55 = vadd.f32 %v6689_v23, %v6688_v15  ;;  %v6723_v10 = vpop.f32.mrf.mxu1 }
 0x33a   : > { %v6724_v14 = vadd.f32 %v6723_v10, %v6722_v25  ;;  %v6691_v49 = vpop.f32.mrf.mxu0 }
 0x33b   : > { %v5575_v48 = vadd.f32 %v6690_v55, %v10722_v56  ;;  %v6725_v27 = vpop.f32.mrf.mxu1  ;;  %v5874_v49 = vpop.permute.xlu0 %5873 }
 0x33c   : > { %v10753_v20 = vadd.f32 %v6724_v14, %v5559_v52  ;;  %v6692_v1 = vpop.f32.mrf.mxu0 }
 0x33d   : > { %v6726_v38 = vpop.f32.mrf.mxu1 }
 0x33e   : > { %v6727_v13 = vadd.f32 %v6726_v38, %v6725_v27 }
 0x33f   : > { %v6728_v53 = vpop.f32.mrf.mxu1 }
 0x340   : > { %v10755_v17 = vadd.f32 %v6727_v13, %v5562_v11 }
 0x341   : > { %v6729_v21 = vpop.f32.mrf.mxu1 }
 0x342   : > { %v6730_v40 = vadd.f32 %v6729_v21, %v6728_v53 }
 0x343   : > { %v6731_v31 = vpop.f32.mrf.mxu1 }
 0x344   : > { %v10757_v62 = vadd.f32 %v6730_v40, %v5567_v16 }
 0x345   : > { %v6732_v12 = vpop.f32.mrf.mxu1 }
 0x346   : > { %v6733_v24 = vadd.f32 %v6732_v12, %v6731_v31  ;;  %v10784_v12 = vpop.permute.xlu0 %5885 }
 0x347   : > { %v6734_v54 = vpop.f32.mrf.mxu1 }
 0x348   : > { %v10759_v44 = vadd.f32 %v6733_v24, %v5570_v47  ;;  %v5870_v47 = vpop.permute.xlu1 %5869 }
 0x349   : > { %v6735_v56 = vpop.f32.mrf.mxu1 }
 0x34a   : > { %v6736_v5 = vadd.f32 %v6735_v56, %v6734_v54 }
 0x34b   : > { %v6737_v59 = vpop.f32.mrf.mxu1 }
 0x34c   : > { %v10761_v33 = vadd.f32 %v6736_v5, %v5575_v48  ;;  %v10779_v14 = vpop.permute.xlu1 %5877 }
 0x34d   : > { %v6738_v63 = vpop.f32.mrf.mxu1 }
 0x34e   : > { %v6756_v60 = vpop.f32.mrf.mxu0 }
 0x350   : > { %v6757_v39 = vpop.f32.mrf.mxu0  ;;  %v10782_v31 = vpop.permute.xlu1 %5881 }
 0x351   : > { %v6758_v27 = vadd.f32 %v6757_v39, %v6756_v60 }
 0x352   : > { %v6759_v3 = vpop.f32.mrf.mxu0 }
 0x353   : > { %v5687_v53 = vadd.f32 %v6758_v27, %v10740_v46 }
 0x354   : > { %v6760_v34 = vpop.f32.mrf.mxu0 }
 0x355   : > { %v6761_v21 = vadd.f32 %v6760_v34, %v6759_v3 }
 0x357   : > { %v5690_v60 = vadd.f32 %v6761_v21, %v10742_v7  ;;  %v7317_v21 = vld [vmem:[%s7503_s12 + $0x30] sm:$0xff] }
 0x36b   : > { %v6762_v61 = vpop.f32.mrf.mxu0 }
 0x36d   : > { %v6763_v4 = vpop.f32.mrf.mxu0 }
 0x36e   : > { %v6764_v59 = vadd.f32 %v6763_v4, %v6762_v61 }
 0x36f   : > { %v6765_v22 = vpop.f32.mrf.mxu0 }
 0x370   : > { %v5695_v61 = vadd.f32 %v6764_v59, %v10746_v32 }
 0x371   : > { %v6766_v43 = vpop.f32.mrf.mxu0 }
 0x372   : > { %v6767_v4 = vadd.f32 %v6766_v43, %v6765_v22 }
 0x37c   : > { %v6802_v58 = vpop.f32.mrf.mxu1 }
 0x37e   : > { %v6803_v28 = vpop.f32.mrf.mxu1 }
 0x37f   : > { %v6804_v38 = vadd.f32 %v6803_v28, %v6802_v58 }
 0x380   : > { %v6805_v2 = vpop.f32.mrf.mxu1 }
 0x381   : > { %v5759_v5 = vadd.f32 %v6804_v38, %v5687_v53 }
 0x382   : > { %v6806_v0 = vpop.f32.mrf.mxu1 }
 0x383   : > { %v6807_v54 = vadd.f32 %v6806_v0, %v6805_v2  ;;  %v5894_v0 = vpop.permute.xlu0 %5893 }
 0x388   : > { %v10763_v8 = vpop.f32.mrf.mxu0 }
 0x38a   : > { %v10765_v26 = vpop.f32.mrf.mxu0 }
 0x38c   : > { %v10767_v52 = vpop.f32.mrf.mxu0 }
 0x38e   : > { %v10769_v11 = vpop.f32.mrf.mxu0 }
 0x38f   : > { %v6808_v50 = vpop.f32.mrf.mxu1 }
 0x391   : > { %v6809_v29 = vpop.f32.mrf.mxu1 }
 0x392   : > { %v6810_v46 = vadd.f32 %v6809_v29, %v6808_v50  ;;  %v7315_v29 = vld [vmem:[%s7503_s12] sm:$0xff] }
 0x393   : > { %v6811_v37 = vpop.f32.mrf.mxu1 }
 0x394   : > { %v5767_v43 = vadd.f32 %v6810_v46, %v5695_v61 }
 0x395   : > { %v6774_v19 = vpop.f32.mrf.mxu0  ;;  %v6812_v41 = vpop.f32.mrf.mxu1 }
 0x397   : > { %v6775_v42 = vpop.f32.mrf.mxu0 }
 0x398   : > { %v6776_v40 = vadd.f32 %v6775_v42, %v6774_v19  ;;  %v10788_v42 = vpop.permute.xlu1 %5889 }
 0x399   : > { %v6777_v18 = vpop.f32.mrf.mxu0  ;;  %v10771_v51 = vpop.f32.mrf.mxu1 }
 0x39a   : > { %v5711_v39 = vadd.f32 %v6776_v40, %v10757_v62 }
 0x39b   : > { %v6778_v35 = vpop.f32.mrf.mxu0  ;;  %v10773_v45 = vpop.f32.mrf.mxu1 }
 0x39c   : > { %v6779_v58 = vadd.f32 %v6778_v35, %v6777_v18  ;;  %v5898_v53 = vpop.permute.xlu1 %5897 }
 0x39d   : > { %v6780_v16 = vpop.f32.mrf.mxu0  ;;  %v10775_v30 = vpop.f32.mrf.mxu1 }
 0x39e   : > { %v5714_v50 = vadd.f32 %v6779_v58, %v10759_v44  ;;  %v6770_v44 = vadd.f32 %v10765_v26, %v10763_v8  ;;  %v6816_v8 = vadd.f32 %v10773_v45, %v10771_v51  ;;  %v7319_v58 = vld [vmem:[%s7503_s12 + $0x38] sm:$0xff]  ;;  %v5902_v45 = vpop.permute.xlu0 %5901 }
 0x39f   : > { %v6781_v6 = vpop.f32.mrf.mxu0  ;;  %v10777_v9 = vpop.f32.mrf.mxu1 }
 0x3a1   : > { %v6783_v36 = vpop.f32.mrf.mxu0  ;;  %v6820_v15 = vpop.f32.mrf.mxu1 }
 0x3a2   : > { %v5762_v36 = vadd.f32 %v6807_v54, %v5690_v60  ;;  %v7318_v60 = vld [vmem:[%s7503_s12 + $0x10] sm:$0xff] }
 0x3a3   : > { %v6784_v25 = vpop.f32.mrf.mxu0  ;;  %v6821_v23 = vpop.f32.mrf.mxu1 }
 0x3a4   : > { %v6822_v56 = vadd.f32 %v6821_v23, %v6820_v15  ;;  %v6782_v15 = vadd.f32 %v6781_v6, %v6780_v16  ;;  %v6813_v25 = vadd.f32 %v6812_v41, %v6811_v37  ;;  %v7316_v41 = vld [vmem:[%s7503_s12 + $0x8] sm:$0xff] }
 0x3a5   : > { %v6823_v55 = vpop.f32.mrf.mxu1 }
 0x3a6   : > { %v5783_v2 = vadd.f32 %v6822_v56, %v5711_v39  ;;  %v5719_v27 = vadd.f32 %v6782_v15, %v10761_v33  ;;  %v5703_v56 = vadd.f32 %v6770_v44, %v10753_v20 }
 0x3a7   : > { %v6824_v10 = vpop.f32.mrf.mxu1 }
 0x3a8   : > { %v6825_v34 = vadd.f32 %v6824_v10, %v6823_v55  ;;  %v5698_v10 = vadd.f32 %v6767_v4, %v10749_v57  ;;  %v7321_v4 = vld [vmem:[%s7503_s12 + $0x40] sm:$0xf] }
 0x3a9   : > { %v6826_v48 = vpop.f32.mrf.mxu1 }
 0x3aa   : > { %v5786_v55 = vadd.f32 %v6825_v34, %v5714_v50  ;;  %v6819_v34 = vadd.f32 %v10777_v9, %v10775_v30 }
 0x3ab   : > { %v6827_v1 = vpop.f32.mrf.mxu1 }
 0x3ac   : > { %v6828_v16 = vadd.f32 %v6827_v1, %v6826_v48 }
 0x3ad   : > { %v6829_v13 = vpop.f32.mrf.mxu1 }
 0x3ae   : > { %v5791_v54 = vadd.f32 %v6828_v16, %v5719_v27 }
 0x3af   : > { %v6830_v24 = vpop.f32.mrf.mxu1 }
 0x3b0   : > { %v5770_v24 = vadd.f32 %v6813_v25, %v5698_v10  ;;  %v7323_v25 = vld [vmem:[%s7503_s12 + $0x28] sm:$0xff] }
 0x3b1   : > { %v5830_v63 = vpop.f32.mrf.mxu0 }
 0x3b2   : > { %v5831_v28 = vadd.f32 %v5830_v63, %v5759_v5  ;;  %v6773_v5 = vadd.f32 %v10769_v11, %v10767_v52  ;;  %v5775_v11 = vadd.f32 %v6816_v8, %v5703_v56 }
 0x3b3   : > { %v6899_v3 = vpop.f32.mrf.mxu0 }
 0x3b4   : > { %v5904_v19 = vmul.f32 %v5870_v47, %v5831_v28 }
 0x3b5   : > { %v5833_v7 = vpop.f32.mrf.mxu0  ;;  %v5854_v62 = vpop.f32.mrf.mxu1 }
 0x3b6   : > { %v5913_v18 = vadd.f32 %v7315_v29, %v5904_v19  ;;  %v5834_v35 = vadd.f32 %v5833_v7, %v5762_v36  ;;  %v5855_v47 = vadd.f32 %v5854_v62, %v5783_v2  ;;  %v5706_v2 = vadd.f32 %v6773_v5, %v10755_v17  ;;  %v7322_v29 = vld [vmem:[%s7503_s12 + $0x20] sm:$0xff] }
 0x3b7   : > { %v6900_v32 = vpop.f32.mrf.mxu0  ;;  %v6911_v22 = vpop.f32.mrf.mxu1 }
 0x3b8   : > { %5922 = vst [vmem:[%s10796_s25] sm:$0xff] %v5913_v18  ;;  %v5905_v6 = vmul.f32 %v5874_v49, %v5834_v35  ;;  %v5910_v23 = vmul.f32 %v5894_v0, %v5855_v47  ;;  %v7320_v0 = vld [vmem:[%s7503_s12 + $0x18] sm:$0xff]  ;;  %v5778_v62 = vadd.f32 %v6819_v34, %v5706_v2 }
 0x3b9   : > { %v5838_v38 = vpop.f32.mrf.mxu0  ;;  %v5857_v37 = vpop.f32.mrf.mxu1 }
 0x3ba   : > { %v5914_v13 = vadd.f32 %v7316_v41, %v5905_v6  ;;  %v5919_v48 = vadd.f32 %v7317_v21, %v5910_v23  ;;  %v5839_v49 = vadd.f32 %v5838_v38, %v5767_v43  ;;  %v5858_v1 = vadd.f32 %v5857_v37, %v5786_v55 }
 0x3bb   : > { %v6903_v40 = vpop.f32.mrf.mxu0  ;;  %v6912_v57 = vpop.f32.mrf.mxu1 }
 0x3bc   : > { %5923 = vst [vmem:[%s10796_s25 + $0x8] sm:$0xff] %v5914_v13  ;;  %5928 = vst [vmem:[%s10796_s25 + $0x30] sm:$0xff] %v5919_v48  ;;  %v5906_v33 = vmul.f32 %v10779_v14, %v5839_v49  ;;  %v5911_v26 = vmul.f32 %v5898_v53, %v5858_v1 }
 0x3bd   : > { %v5841_v59 = vpop.f32.mrf.mxu0  ;;  %v5862_v63 = vpop.f32.mrf.mxu1 }
 0x3be   : > { %v5915_v39 = vadd.f32 %v7318_v60, %v5906_v33  ;;  %v5920_v51 = vadd.f32 %v7319_v58, %v5911_v26  ;;  %v5842_v28 = vadd.f32 %v5841_v59, %v5770_v24  ;;  %v5863_v14 = vadd.f32 %v5862_v63, %v5791_v54 }
 0x3bf   : > { %v6904_v46 = vpop.f32.mrf.mxu0  ;;  %v6915_v3 = vpop.f32.mrf.mxu1 }
 0x3c0   : > { %5924 = vst [vmem:[%s10796_s25 + $0x10] sm:$0xff] %v5915_v39  ;;  %5929 = vst [vmem:[%s10796_s25 + $0x38] sm:$0xff] %v5920_v51  ;;  %v5907_v20 = vmul.f32 %v10782_v31, %v5842_v28  ;;  %v5912_v52 = vmul.f32 %v5902_v45, %v5863_v14 }
 0x3c1   : > { %v5846_v19 = vpop.f32.mrf.mxu0  ;;  %v5865_v36 = vpop.f32.mrf.mxu1 }
 0x3c2   : > { %v5916_v61 = vadd.f32 %v7320_v0, %v5907_v20  ;;  %v5921_v15 = vadd.f32 %v7321_v4, %v5912_v52  ;;  %v5847_v30 = vadd.f32 %v5846_v19, %v5775_v11 }
 0x3c3   : > { %v6907_v9 = vpop.f32.mrf.mxu0  ;;  %v6916_v7 = vpop.f32.mrf.mxu1 }
 0x3c4   : > { %5925 = vst [vmem:[%s10796_s25 + $0x18] sm:$0xff] %v5916_v61  ;;  %5930 = vst [vmem:[%s10796_s25 + $0x40] sm:$0xf] %v5921_v15  ;;  %v5908_v31 = vmul.f32 %v10784_v12, %v5847_v30 }
 0x3c5   : > { %v5849_v50 = vpop.f32.mrf.mxu0 }
 0x3c6   : > { %v5917_v18 = vadd.f32 %v7322_v29, %v5908_v31  ;;  %v5850_v35 = vadd.f32 %v5849_v50, %v5778_v62 }
 0x3c7   : > { %v6908_v17 = vpop.f32.mrf.mxu0 }
 0x3c8   : > { %5926 = vst [vmem:[%s10796_s25 + $0x20] sm:$0xff] %v5917_v18  ;;  %v5909_v47 = vmul.f32 %v10788_v42, %v5850_v35 }
 0x3ca   : > { %v5918_v32 = vadd.f32 %v7323_v25, %v5909_v47 }
 0x3cc   : > { %5927 = vst [vmem:[%s10796_s25 + $0x28] sm:$0xff] %v5918_v32 }
 0x3cd PF: > { %s16_s21 = sadd.s32 1, %s7330_s21  }
 0x3ce   : > { %p13_p4 = scmp.ge.s32.totalorder %s16_s21, 4  }
 0x3d0   :  { %15 = sbr.rel (!%p13_p4) target bundleno = 1 (0x1), region = 74 }

</bundles_post_ra>
